<compile_context>
chip_gen: v6e
topology: v6e:2x2x1
jax: 0.10.0
libtpu: 0.0.40
codegen_flags: <defaults>
</compile_context>

<pallas_src>
from functools import partial

import jax
import jax.numpy as jnp
from jax.experimental import pallas as pl
from jax.experimental.pallas import tpu as pltpu

CONV_CH = 64
HIDDEN = 512
OUT_PAD = 128          # lane-dense output width (>= action_space)


def _round_up(x, m):
    return ((x + m - 1) // m) * m


def dueling_dqn_kernel(x_ref, cw_ref, cb_ref, w1_ref, b1_ref, w2_ref, b2_ref,
                       out_ref):
    # conv1 + ReLU as one block-diagonal matmul: (TB, H*W) @ (H*W, H*C)
    feat = jnp.dot(x_ref[...], cw_ref[...],
                   preferred_element_type=jnp.float32) + cb_ref[...]
    feat = jnp.maximum(feat, 0.0).astype(jnp.bfloat16)            # (TB, H*C)

    # fused fc1_adv || fc1_val + ReLU (single MXU pass, N = 2*HIDDEN)
    h1 = jnp.dot(feat, w1_ref[...],
                 preferred_element_type=jnp.float32) + b1_ref[...]
    h1 = jnp.maximum(h1, 0.0).astype(jnp.bfloat16)                # (TB, 2*HIDDEN)

    # fused fc2 with the dueling combine folded into the weights/bias.
    # Pad lanes have zero weight & bias, so they come out 0 automatically.
    out_ref[...] = jnp.dot(h1, w2_ref[...],
                           preferred_element_type=jnp.float32) + b2_ref[...]


def prepare_params(params, width, height):
    """One-time parameter plumbing: PyTorch (out,in) -> kernel (in,out),
    conv -> block-diagonal matmul, branch fusion, dueling fold, bf16 cast."""
    C, HID = CONV_CH, HIDDEN
    A = params["fc2_adv_w"].shape[0]
    assert A <= OUT_PAD

    # Block-diagonal conv weight: rows h*W+w, cols h*C+c -> conv_w[c, w].
    eye = jnp.eye(height, dtype=jnp.float32)
    cw = jnp.einsum('hk,cw->hwkc', eye, params["conv_w"].astype(jnp.float32))
    cw = cw.reshape(height * width, height * C).astype(jnp.bfloat16)
    cb = jnp.tile(params["conv_b"], height).reshape(1, height * C).astype(jnp.float32)

    def fc1_perm(w):
        # PyTorch flatten order of conv output is (c*H + h); kernel uses (h*C + c).
        return w.reshape(HID, C, height).transpose(2, 1, 0).reshape(height * C, HID)

    w1 = jnp.concatenate([fc1_perm(params["fc1_adv_w"]),
                          fc1_perm(params["fc1_val_w"])], axis=1).astype(jnp.bfloat16)
    b1 = jnp.concatenate([params["fc1_adv_b"],
                          params["fc1_val_b"]]).reshape(1, 2 * HID).astype(jnp.float32)

    # Fold dueling combine (q = val + adv - mean_a adv) into fc2 (f32, then bf16).
    W_adv = params["fc2_adv_w"].astype(jnp.float32)               # (A, HID)
    W_val = params["fc2_val_w"].astype(jnp.float32)               # (1, HID)
    W_adv_c = W_adv - jnp.mean(W_adv, axis=0, keepdims=True)      # centered
    w2 = jnp.zeros((2 * HID, OUT_PAD), jnp.float32)
    w2 = w2.at[:HID, :A].set(W_adv_c.T)
    w2 = w2.at[HID:, :A].set(jnp.broadcast_to(W_val[0][:, None], (HID, A)))
    w2 = w2.astype(jnp.bfloat16)

    b2 = jnp.zeros((1, OUT_PAD), jnp.float32)
    b2 = b2.at[0, :A].set(params["fc2_adv_b"] - jnp.mean(params["fc2_adv_b"])
                          + params["fc2_val_b"][0])

    return {"cw": cw, "cb": cb, "w1": w1, "b1": b1, "w2": w2, "b2": b2, "A": A}


def _compute_tb(B):
    """Batch tile: multiple of 8, <=512 rows, and >=2 grid steps when possible
    (so dimension_semantics=('parallel',) can shard across both v7x TCs)."""
    B8 = _round_up(max(B, 1), 8)
    if B8 <= 16:
        return B8
    return min(512, _round_up((B8 + 1) // 2, 8))


@partial(jax.jit, static_argnames=("tb",))
def _forward_padded(x_nchw, cw, cb, w1, b1, w2, b2, *, tb):
    B, _, H, W = x_nchw.shape
    HC = cw.shape[1]                                   # H * CONV_CH

    # flatten (channel dim is 1) + bf16 cast; pad fuses with the cast under jit
    x = x_nchw.reshape(B, H * W).astype(jnp.bfloat16)
    B_pad = _round_up(B, tb)
    if B_pad != B:
        x = jnp.pad(x, ((0, B_pad - B), (0, 0)))

    grid = (B_pad // tb,)
    return pl.pallas_call(
        dueling_dqn_kernel,
        out_shape=jax.ShapeDtypeStruct((B_pad, OUT_PAD), jnp.float32),
        grid=grid,
        in_specs=[
            pl.BlockSpec((tb, H * W), lambda i: (i, 0)),            # x tile (bf16)
            pl.BlockSpec((H * W, HC), lambda i: (0, 0)),            # block-diag conv w
            pl.BlockSpec((1, HC), lambda i: (0, 0)),                # conv b (tiled)
            pl.BlockSpec((HC, 2 * HIDDEN), lambda i: (0, 0)),       # fused fc1 w
            pl.BlockSpec((1, 2 * HIDDEN), lambda i: (0, 0)),        # fused fc1 b
            pl.BlockSpec((2 * HIDDEN, OUT_PAD), lambda i: (0, 0)),  # fused fc2 w (dueling folded)
            pl.BlockSpec((1, OUT_PAD), lambda i: (0, 0)),           # fused fc2 b
        ],
        out_specs=pl.BlockSpec((tb, OUT_PAD), lambda i: (i, 0)),
        compiler_params=pltpu.CompilerParams(
            dimension_semantics=("parallel",)),
    )(x, cw, cb, w1, b1, w2, b2)


def dueling_dqn_forward(x_nchw, kparams):
    B = x_nchw.shape[0]
    A = kparams["A"]
    tb = _compute_tb(B)
    out = _forward_padded(x_nchw, kparams["cw"], kparams["cb"], kparams["w1"],
                          kparams["b1"], kparams["w2"], kparams["b2"], tb=tb)
    return out[:B, :A]


def reference_forward(x_nchw, params):
    """Plain-JAX f32 mirror of the PyTorch module (NCHW semantics)."""
    B = x_nchw.shape[0]
    x = x_nchw[:, 0]                                                     # (B, H, W)
    h = jnp.einsum('bhw,cw->bch', x, params["conv_w"]) + params["conv_b"][None, :, None]
    h = jnp.maximum(h, 0.0)                                              # (B, C, H)
    feat = h.reshape(B, -1)                                              # (B, C*H)
    adv = jnp.maximum(feat @ params["fc1_adv_w"].T + params["fc1_adv_b"], 0.0)
    val = jnp.maximum(feat @ params["fc1_val_w"].T + params["fc1_val_b"], 0.0)
    adv = adv @ params["fc2_adv_w"].T + params["fc2_adv_b"]              # (B, A)
    val = val @ params["fc2_val_w"].T + params["fc2_val_b"]              # (B, 1)
    return val + adv - jnp.mean(adv, axis=1, keepdims=True)


if __name__ == "__main__":
    width, height, action_space = 16, 16, 6
    batch = 2

    key = jax.random.PRNGKey(0)
    ks = jax.random.split(key, 12)
    s = 0.05
    params = {
        "conv_w":    s * jax.random.normal(ks[0], (CONV_CH, width), jnp.float32),
        "conv_b":    s * jax.random.normal(ks[1], (CONV_CH,), jnp.float32),
        "fc1_adv_w": s * jax.random.normal(ks[2], (HIDDEN, CONV_CH * height), jnp.float32),
        "fc1_adv_b": s * jax.random.normal(ks[3], (HIDDEN,), jnp.float32),
        "fc1_val_w": s * jax.random.normal(ks[4], (HIDDEN, CONV_CH * height), jnp.float32),
        "fc1_val_b": s * jax.random.normal(ks[5], (HIDDEN,), jnp.float32),
        "fc2_adv_w": s * jax.random.normal(ks[6], (action_space, HIDDEN), jnp.float32),
        "fc2_adv_b": s * jax.random.normal(ks[7], (action_space,), jnp.float32),
        "fc2_val_w": s * jax.random.normal(ks[8], (1, HIDDEN), jnp.float32),
        "fc2_val_b": s * jax.random.normal(ks[9], (1,), jnp.float32),
    }
    x = jax.random.normal(ks[10], (batch, 1, height, width), jnp.float32)

    kparams = prepare_params(params, width, height)

    out = jax.block_until_ready(dueling_dqn_forward(x, kparams))
    ref = jax.block_until_ready(reference_forward(x, params))

    assert out.shape == (batch, action_space)
    # bf16 weights/activations at the matmul inputs (f32 accumulation) -> looser tol
    assert jnp.allclose(out, ref, atol=2e-2, rtol=2e-2)
    print("KERNEL_OK")
</pallas_src>

<mosaic_0001>
module attributes {stable_mosaic.version = 11 : i64} {
  func.func @dueling_dqn_kernel(%arg0: i32, %arg1: memref<8x256xbf16, #tpu.memory_space<vmem>>, %arg2: memref<256x1024xbf16, #tpu.memory_space<vmem>>, %arg3: memref<1x1024xf32, #tpu.memory_space<vmem>>, %arg4: memref<1024x1024xbf16, #tpu.memory_space<vmem>>, %arg5: memref<1x1024xf32, #tpu.memory_space<vmem>>, %arg6: memref<1024x128xbf16, #tpu.memory_space<vmem>>, %arg7: memref<1x128xf32, #tpu.memory_space<vmem>>, %arg8: memref<8x128xf32, #tpu.memory_space<vmem>>) attributes {dimension_semantics = [#tpu.dimension_semantics<parallel>], iteration_bounds = array<i64: 1>, scalar_prefetch = 0 : i64, scratch_operands = 0 : i64, tpu.core_type = #tpu.core_type<tc>, window_params = [{transform_indices = @transform_0, window_bounds = array<i64: 8, 256>}, {pipeline_mode = #tpu.pipeline_mode<synchronous>, transform_indices = @transform_1, window_bounds = array<i64: 256, 1024>}, {pipeline_mode = #tpu.pipeline_mode<synchronous>, transform_indices = @transform_2, window_bounds = array<i64: 1, 1024>}, {pipeline_mode = #tpu.pipeline_mode<synchronous>, transform_indices = @transform_3, window_bounds = array<i64: 1024, 1024>}, {pipeline_mode = #tpu.pipeline_mode<synchronous>, transform_indices = @transform_4, window_bounds = array<i64: 1, 1024>}, {pipeline_mode = #tpu.pipeline_mode<synchronous>, transform_indices = @transform_5, window_bounds = array<i64: 1024, 128>}, {pipeline_mode = #tpu.pipeline_mode<synchronous>, transform_indices = @transform_6, window_bounds = array<i64: 1, 128>}, {transform_indices = @transform_7, window_bounds = array<i64: 8, 128>}]} {
    %c0 = arith.constant 0 : index
    %c0_0 = arith.constant 0 : index
    %0 = vector.load %arg1[%c0, %c0_0] : memref<8x256xbf16, #tpu.memory_space<vmem>>, vector<8x256xbf16>
    %c0_1 = arith.constant 0 : index
    %c0_2 = arith.constant 0 : index
    %1 = vector.load %arg2[%c0_1, %c0_2] : memref<256x1024xbf16, #tpu.memory_space<vmem>>, vector<256x1024xbf16>
    %cst = arith.constant dense<0.000000e+00> : vector<8x1024xf32>
    %2 = tpu.matmul %0, %1, %cst {dimension_numbers = #tpu.dot_dimension_numbers<[1], [0], [0], [1], [0, 0, 1, 1], [], []>} : vector<8x256xbf16>, vector<256x1024xbf16>, vector<8x1024xf32> -> vector<8x1024xf32>
    %c0_3 = arith.constant 0 : index
    %c0_4 = arith.constant 0 : index
    %3 = vector.load %arg3[%c0_3, %c0_4] : memref<1x1024xf32, #tpu.memory_space<vmem>>, vector<1x1024xf32>
    %4 = vector.broadcast %3 : vector<1x1024xf32> to vector<8x1024xf32>
    %5 = arith.addf %2, %4 : vector<8x1024xf32>
    %cst_5 = arith.constant 0.000000e+00 : f32
    %6 = vector.broadcast %cst_5 : f32 to vector<8x1024xf32>
    %7 = arith.maximumf %5, %6 : vector<8x1024xf32>
    %8 = arith.truncf %7 : vector<8x1024xf32> to vector<8x1024xbf16>
    %c0_6 = arith.constant 0 : index
    %c0_7 = arith.constant 0 : index
    %9 = vector.load %arg4[%c0_6, %c0_7] : memref<1024x1024xbf16, #tpu.memory_space<vmem>>, vector<1024x1024xbf16>
    %cst_8 = arith.constant dense<0.000000e+00> : vector<8x1024xf32>
    %10 = tpu.matmul %8, %9, %cst_8 {dimension_numbers = #tpu.dot_dimension_numbers<[1], [0], [0], [1], [0, 0, 1, 1], [], []>} : vector<8x1024xbf16>, vector<1024x1024xbf16>, vector<8x1024xf32> -> vector<8x1024xf32>
    %c0_9 = arith.constant 0 : index
    %c0_10 = arith.constant 0 : index
    %11 = vector.load %arg5[%c0_9, %c0_10] : memref<1x1024xf32, #tpu.memory_space<vmem>>, vector<1x1024xf32>
    %12 = vector.broadcast %11 : vector<1x1024xf32> to vector<8x1024xf32>
    %13 = arith.addf %10, %12 : vector<8x1024xf32>
    %cst_11 = arith.constant 0.000000e+00 : f32
    %14 = vector.broadcast %cst_11 : f32 to vector<8x1024xf32>
    %15 = arith.maximumf %13, %14 : vector<8x1024xf32>
    %16 = arith.truncf %15 : vector<8x1024xf32> to vector<8x1024xbf16>
    %c0_12 = arith.constant 0 : index
    %c0_13 = arith.constant 0 : index
    %17 = vector.load %arg6[%c0_12, %c0_13] : memref<1024x128xbf16, #tpu.memory_space<vmem>>, vector<1024x128xbf16>
    %cst_14 = arith.constant dense<0.000000e+00> : vector<8x128xf32>
    %18 = tpu.matmul %16, %17, %cst_14 {dimension_numbers = #tpu.dot_dimension_numbers<[1], [0], [0], [1], [0, 0, 1, 1], [], []>} : vector<8x1024xbf16>, vector<1024x128xbf16>, vector<8x128xf32> -> vector<8x128xf32>
    %c0_15 = arith.constant 0 : index
    %c0_16 = arith.constant 0 : index
    %19 = vector.load %arg7[%c0_15, %c0_16] : memref<1x128xf32, #tpu.memory_space<vmem>>, vector<1x128xf32>
    %20 = vector.broadcast %19 : vector<1x128xf32> to vector<8x128xf32>
    %21 = arith.addf %18, %20 : vector<8x128xf32>
    %c0_17 = arith.constant 0 : index
    %c0_18 = arith.constant 0 : index
    %22 = vector.load %arg8[%c0_17, %c0_18] : memref<8x128xf32, #tpu.memory_space<vmem>>, vector<8x128xf32>
    tpu.vector_store %arg8[%c0_17, %c0_18], %21 {strides = array<i32>} : memref<8x128xf32, #tpu.memory_space<vmem>>, vector<8x128xf32>,
    return
  }
  func.func @transform_0(%arg0: i32) -> (i32, i32) {
    %c0_i32 = arith.constant 0 : i32
    %c0_i32_0 = arith.constant 0 : i32
    return %arg0, %c0_i32 : i32, i32
  }
  func.func @transform_1(%arg0: i32) -> (i32, i32) {
    %c0_i32 = arith.constant 0 : i32
    %c0_i32_0 = arith.constant 0 : i32
    %c0_i32_1 = arith.constant 0 : i32
    return %c0_i32, %c0_i32_0 : i32, i32
  }
  func.func @transform_2(%arg0: i32) -> (i32, i32) {
    %c0_i32 = arith.constant 0 : i32
    %c0_i32_0 = arith.constant 0 : i32
    %c0_i32_1 = arith.constant 0 : i32
    return %c0_i32, %c0_i32_0 : i32, i32
  }
  func.func @transform_3(%arg0: i32) -> (i32, i32) {
    %c0_i32 = arith.constant 0 : i32
    %c0_i32_0 = arith.constant 0 : i32
    %c0_i32_1 = arith.constant 0 : i32
    return %c0_i32, %c0_i32_0 : i32, i32
  }
  func.func @transform_4(%arg0: i32) -> (i32, i32) {
    %c0_i32 = arith.constant 0 : i32
    %c0_i32_0 = arith.constant 0 : i32
    %c0_i32_1 = arith.constant 0 : i32
    return %c0_i32, %c0_i32_0 : i32, i32
  }
  func.func @transform_5(%arg0: i32) -> (i32, i32) {
    %c0_i32 = arith.constant 0 : i32
    %c0_i32_0 = arith.constant 0 : i32
    %c0_i32_1 = arith.constant 0 : i32
    return %c0_i32, %c0_i32_0 : i32, i32
  }
  func.func @transform_6(%arg0: i32) -> (i32, i32) {
    %c0_i32 = arith.constant 0 : i32
    %c0_i32_0 = arith.constant 0 : i32
    %c0_i32_1 = arith.constant 0 : i32
    return %c0_i32, %c0_i32_0 : i32, i32
  }
  func.func @transform_7(%arg0: i32) -> (i32, i32) {
    %c0_i32 = arith.constant 0 : i32
    %c0_i32_0 = arith.constant 0 : i32
    return %arg0, %c0_i32 : i32, i32
  }
}

</mosaic_0001>

<bundles_post_ra>
// kernel: _forward_padded.1
= control target key start
LH: loop header
LB: loop body
LE: loop exit
PB: predicated region body
PF: predicated region fallthrough
CT: control target
= control target key end

     0   :  { %12 = vsyncpa [#allocation3], 0  ;;  %s6869_s0 = inlined_call_operand.vmem [shape: bf16[8,256], index: 0, kind: input, shape index: {}]   ;;  %s6870_s1 = inlined_call_operand.hbm [shape: bf16[256,1024], index: 1, kind: input, shape index: {}]   ;;  %s6871_s2 = inlined_call_operand.hbm [shape: f32[1,1024], index: 2, kind: input, shape index: {}]   ;;  %s6872_s3 = inlined_call_operand.hbm [shape: bf16[1024,1024], index: 3, kind: input, shape index: {}]   ;;  %s6873_s4 = inlined_call_operand.hbm [shape: f32[1,1024], index: 4, kind: input, shape index: {}]   ;;  %s6874_s5 = inlined_call_operand.hbm [shape: bf16[1024,128], index: 5, kind: input, shape index: {}]   ;;  %s6875_s6 = inlined_call_operand.hbm [shape: f32[1,128], index: 6, kind: input, shape index: {}]   ;;  %s6876_s7 = inlined_call_operand.hbm [shape: f32[8,128], index: 7, kind: output, shape index: {}]  }
   0x1   :  { %13 = vsyncpa [#allocation6], 0 }
   0x2   :  { %14 = vsyncpa [#allocation9], 0 }
   0x3   :  { %15 = vsyncpa [#allocation12], 0 }
   0x4   :  { %16 = vsyncpa [#allocation4], 0  ;;  %s6609_s24 = smov [#allocation5]   ;;  %s6610_s26 = smov [#allocation8]  }
   0x5   :  { %s37_s25 = sshll.u32 %s6609_s24, 4  ;;  %s59_s27 = sshll.u32 %s6610_s26, 4  ;;  %s38_s25 = int_to_ptr.vmem [resolvable:$true] %s37_s25  ;;  %s60_s27 = int_to_ptr.vmem [resolvable:$true] %s59_s27 }
   0x6   :  { %s6467_s28 = scalar_lea.vmem %s38_s25, 128  ;;  %p6472_p1 = scmp.lt.s32.totalorder %s38_s25, %s38_s25 }
   0x7   :  { %p6468_p0 = scmp.ne.s32.totalorder %s38_s25, %s6467_s28  ;;  %p6473_p2 = scmp.lt.s32.totalorder %s6467_s28, %s6467_s28 }
   0x9   :  { %p6474_p3 = por %p6473_p2, %p6472_p1 }
   0xb   :  { %p6475_p4 = pnand %p6474_p3, %p6468_p0 }
   0xd   :  { %6478 = shalt.err (!%p6475_p4)
}
   0xe   :  { %40 = dma.hbm_to_vmem [thread:$0]  %s6871_s2, 128, %s38_s25, [#allocation6]  }
   0xf   :  { %s6487_s8 = scalar_lea.vmem %s60_s27, 128  ;;  %p6492_p6 = scmp.lt.s32.totalorder %s60_s27, %s60_s27 }
  0x10   :  { %p6488_p5 = scmp.ne.s32.totalorder %s60_s27, %s6487_s8  ;;  %p6493_p7 = scmp.lt.s32.totalorder %s6487_s8, %s6487_s8 }
  0x12   :  { %p6494_p8 = por %p6493_p7, %p6492_p6 }
  0x14   :  { %p6495_p9 = pnand %p6494_p8, %p6488_p5 }
  0x16   :  { %6498 = shalt.err (!%p6495_p9)
}
  0x17   :  { %62 = dma.hbm_to_vmem [thread:$0]  %s6873_s4, 128, %s60_s27, [#allocation9]  }
  0x18   :  { %s6611_s11 = smov [#allocation2]  }
  0x19   :  { %s24_s12 = sshll.u32 %s6611_s11, 4  ;;  %s25_s12 = int_to_ptr.vmem [resolvable:$true] %s24_s12 }
  0x1a   :  { %s6507_s13 = scalar_lea.vmem %s25_s12, 16384  ;;  %p6512_p11 = scmp.lt.s32.totalorder %s25_s12, %s25_s12 }
  0x1b   :  { %p6508_p10 = scmp.ne.s32.totalorder %s25_s12, %s6507_s13  ;;  %p6513_p12 = scmp.lt.s32.totalorder %s6507_s13, %s6507_s13 }
  0x1d   :  { %p6514_p13 = por %p6513_p12, %p6512_p11 }
  0x1f   :  { %p6515_p0 = pnand %p6514_p13, %p6508_p10 }
  0x21   :  { %6518 = shalt.err (!%p6515_p0)
}
  0x22   :  { %s6612_s2 = smov 512   ;;  %s6613_s14 = smov 32  }
  0x23   :  { %30 = dma.hbm_to_vmem [thread:$0]  %s6870_s1, 16384, %s25_s12, [#allocation3], %s6612_s2, %s6612_s2, %s6613_s14  }
  0x24   :  { %s6614_s17 = smov [#allocation7]   ;;  %s6615_s4 = smov [#allocation10]  }
  0x25   :  { %s46_s18 = sshll.u32 %s6614_s17, 4  ;;  %s68_s19 = sshll.u32 %s6615_s4, 4  ;;  %s47_s18 = int_to_ptr.vmem [resolvable:$true] %s46_s18  ;;  %s69_s19 = int_to_ptr.vmem [resolvable:$true] %s68_s19 }
  0x26   :  { %s6527_s20 = scalar_lea.vmem %s47_s18, 65536  ;;  %p6532_p2 = scmp.lt.s32.totalorder %s47_s18, %s47_s18 }
  0x27   :  { %p6528_p1 = scmp.ne.s32.totalorder %s47_s18, %s6527_s20  ;;  %p6533_p3 = scmp.lt.s32.totalorder %s6527_s20, %s6527_s20 }
  0x29   :  { %p6534_p4 = por %p6533_p3, %p6532_p2 }
  0x2b   :  { %p6535_p5 = pnand %p6534_p4, %p6528_p1 }
  0x2d   :  { %6538 = shalt.err (!%p6535_p5)
}
  0x2e   :  { %52 = dma.hbm_to_vmem [thread:$0]  %s6872_s3, 65536, %s47_s18, [#allocation6], %s6612_s2, %s6612_s2, %s6613_s14  }
  0x2f   :  { %s6547_s23 = scalar_lea.vmem %s69_s19, 8192  ;;  %p6552_p7 = scmp.lt.s32.totalorder %s69_s19, %s69_s19 }
  0x30   :  { %p6548_p6 = scmp.ne.s32.totalorder %s69_s19, %s6547_s23  ;;  %p6553_p8 = scmp.lt.s32.totalorder %s6547_s23, %s6547_s23 }
  0x32   :  { %p6554_p9 = por %p6553_p8, %p6552_p7 }
  0x34   :  { %p6555_p10 = pnand %p6554_p9, %p6548_p6 }
  0x36   :  { %6558 = shalt.err (!%p6555_p10)
}
  0x37   :  { %s6616_s1 = smov 64   ;;  %s6617_s24 = smov 4  }
  0x38   :  { %74 = dma.hbm_to_vmem [thread:$0]  %s6874_s5, 8192, %s69_s19, [#allocation9], %s6616_s1, %s6616_s1, %s6617_s24  }
  0x39   :  { %s6618_s27 = smov [#allocation11]  }
  0x3a   :  { %s81_s28 = sshll.u32 %s6618_s27, 4  ;;  %s82_s28 = int_to_ptr.vmem [resolvable:$true] %s81_s28 }
  0x3b   :  { %s6567_s29 = scalar_lea.vmem %s82_s28, 16  ;;  %s6571_s3 = scalar_lea.vmem %s82_s28, 32 }
  0x3c   :  { %p6568_p11 = scmp.ne.s32.totalorder %s82_s28, %s6567_s29  ;;  %p6572_p12 = scmp.lt.s32.totalorder %s82_s28, %s82_s28 }
  0x3d   :  { %p6573_p13 = scmp.lt.s32.totalorder %s6571_s3, %s6567_s29 }
  0x3f   :  { %p6574_p0 = por %p6573_p13, %p6572_p12 }
  0x41   :  { %p6575_p1 = pnand %p6574_p0, %p6568_p11 }
  0x43   :  { %6578 = shalt.err (!%p6575_p1)
}
  0x44   :  { %84 = dma.hbm_to_vmem [thread:$0]  %s6875_s6, 16, %s82_s28, [#allocation12]  }
  0x45   :  { %6599 = dma.done.wait [#allocation3], 16384  }
  0x46   :  { %6600 = vsyncadd [#allocation3], 4294950912 }
  0x47   :  { %6601 = dma.done.wait [#allocation6], 65664  }
  0x48   :  { %6602 = vsyncadd [#allocation6], 4294901632 }
  0x49   :  { %6603 = dma.done.wait [#allocation9], 8320  }
  0x4a   :  { %6604 = vsyncadd [#allocation9], 4294958976 }
  0x4b   :  { %6605 = dma.done.wait [#allocation12], 16  }
  0x4c   :  { %6606 = vsyncadd [#allocation12], 4294967280  ;;  %v161_v0 = vld [vmem:[#allocation2 + $0x1c0] sm:$0xff]  ;;  %v162_v2 = vld [vmem:[#allocation2 + $0x1c8] sm:$0xff] }
  0x4d   :  { %v165_v1 = vld [vmem:[#allocation2 + $0x1e0] sm:$0xff]  ;;  %v166_v4 = vld [vmem:[#allocation2 + $0x1e8] sm:$0xff] }
  0x4e   :  { %v5645_v3 = vcombine.high %v161_v0, %v165_v1  ;;  %v5644_v5 = vcombine.low %v161_v0, %v165_v1  ;;  %v153_v6 = vld [vmem:[#allocation2 + $0x180] sm:$0xff]  ;;  %v5647_v8 = vcombine.high %v162_v2, %v166_v4  ;;  %v5646_v9 = vcombine.low %v162_v2, %v166_v4  ;;  %v154_v11 = vld [vmem:[#allocation2 + $0x188] sm:$0xff] }
  0x4f   :  { %v157_v7 = vld [vmem:[#allocation2 + $0x1a0] sm:$0xff]  ;;  %v158_v12 = vld [vmem:[#allocation2 + $0x1a8] sm:$0xff] }
  0x50   :  { %v5637_v10 = vcombine.high %v153_v6, %v157_v7  ;;  %v145_v13 = vld [vmem:[#allocation2 + $0x140] sm:$0xff]  ;;  %922 = vmatprep.subr.bf16.mxu0 %v5645_v3  ;;  %v5639_v14 = vcombine.high %v154_v11, %v158_v12  ;;  %v146_v16 = vld [vmem:[#allocation2 + $0x148] sm:$0xff]  ;;  %963 = vmatprep.subr.bf16.mxu1 %v5647_v8  ;;  %v5636_v18 = vcombine.low %v153_v6, %v157_v7 }
  0x51   :  { %v149_v15 = vld [vmem:[#allocation2 + $0x160] sm:$0xff]  ;;  %v150_v17 = vld [vmem:[#allocation2 + $0x168] sm:$0xff]  ;;  %923 = vmatpush1.bf16.msra.mxu0 %v5644_v5  ;;  %964 = vmatpush1.bf16.msra.mxu1 %v5646_v9  ;;  %v5638_v19 = vcombine.low %v154_v11, %v158_v12 }
  0x52   :  { %924 = vmatprep.subr.bf16.mxu0 %v5637_v10  ;;  %v5629_v20 = vcombine.high %v145_v13, %v149_v15  ;;  %965 = vmatprep.subr.bf16.mxu1 %v5639_v14  ;;  %v5631_v21 = vcombine.high %v146_v16, %v150_v17  ;;  %v137_v22 = vld [vmem:[#allocation2 + $0x100] sm:$0xff]  ;;  %v138_v24 = vld [vmem:[#allocation2 + $0x108] sm:$0xff]  ;;  %v5628_v26 = vcombine.low %v145_v13, %v149_v15 }
  0x53   :  { %v141_v23 = vld [vmem:[#allocation2 + $0x120] sm:$0xff]  ;;  %v142_v25 = vld [vmem:[#allocation2 + $0x128] sm:$0xff]  ;;  %v5630_v27 = vcombine.low %v146_v16, %v150_v17 }
  0x54   :  { %v5621_v28 = vcombine.high %v137_v22, %v141_v23  ;;  %v5623_v29 = vcombine.high %v138_v24, %v142_v25  ;;  %v129_v30 = vld [vmem:[#allocation2 + $0xc0] sm:$0xff]  ;;  %v130_v32 = vld [vmem:[#allocation2 + $0xc8] sm:$0xff]  ;;  %v5620_v34 = vcombine.low %v137_v22, %v141_v23  ;;  %v5622_v35 = vcombine.low %v138_v24, %v142_v25 }
  0x55   :  { %925 = vmatpush1.bf16.msra.mxu0 %v5636_v18  ;;  %966 = vmatpush1.bf16.msra.mxu1 %v5638_v19  ;;  %v133_v31 = vld [vmem:[#allocation2 + $0xe0] sm:$0xff]  ;;  %v134_v33 = vld [vmem:[#allocation2 + $0xe8] sm:$0xff] }
  0x56   :  { %926 = vmatprep.subr.bf16.mxu0 %v5629_v20  ;;  %967 = vmatprep.subr.bf16.mxu1 %v5631_v21  ;;  %v5613_v36 = vcombine.high %v129_v30, %v133_v31  ;;  %v5615_v37 = vcombine.high %v130_v32, %v134_v33  ;;  %v121_v38 = vld [vmem:[#allocation2 + $0x80] sm:$0xff]  ;;  %v122_v40 = vld [vmem:[#allocation2 + $0x88] sm:$0xff]  ;;  %v5612_v42 = vcombine.low %v129_v30, %v133_v31 }
  0x57   :  { %v125_v39 = vld [vmem:[#allocation2 + $0xa0] sm:$0xff]  ;;  %v126_v41 = vld [vmem:[#allocation2 + $0xa8] sm:$0xff]  ;;  %v5614_v43 = vcombine.low %v130_v32, %v134_v33 }
  0x58   :  { %v5605_v44 = vcombine.high %v121_v38, %v125_v39  ;;  %v5607_v45 = vcombine.high %v122_v40, %v126_v41  ;;  %v113_v46 = vld [vmem:[#allocation2 + $0x40] sm:$0xff]  ;;  %v114_v48 = vld [vmem:[#allocation2 + $0x48] sm:$0xff]  ;;  %v5604_v50 = vcombine.low %v121_v38, %v125_v39  ;;  %v5606_v51 = vcombine.low %v122_v40, %v126_v41 }
  0x59   :  { %927 = vmatpush1.bf16.msra.mxu0 %v5628_v26  ;;  %968 = vmatpush1.bf16.msra.mxu1 %v5630_v27  ;;  %v117_v47 = vld [vmem:[#allocation2 + $0x60] sm:$0xff]  ;;  %v118_v49 = vld [vmem:[#allocation2 + $0x68] sm:$0xff] }
  0x5a   :  { %928 = vmatprep.subr.bf16.mxu0 %v5621_v28  ;;  %969 = vmatprep.subr.bf16.mxu1 %v5623_v29  ;;  %v5597_v52 = vcombine.high %v113_v46, %v117_v47  ;;  %v6681_v53 = vld [vmem:[%s6869_s0] sm:$0xff]  ;;  %v5599_v54 = vcombine.high %v114_v48, %v118_v49  ;;  %v106_v58 = vld [vmem:[#allocation2 + $0x8] sm:$0xff]  ;;  %v5596_v60 = vcombine.low %v113_v46, %v117_v47  ;;  %s6619_s0 = smov [#allocation13]  }
  0x5b   :  { %v105_v55 = vld [vmem:[#allocation2] sm:$0xff]  ;;  %v6685_v57 = vcombine.high %v6681_v53, %v6681_v53  ;;  %v110_v59 = vld [vmem:[#allocation2 + $0x28] sm:$0xff]  ;;  %v5598_v61 = vcombine.low %v114_v48, %v118_v49  ;;  %s5574_s9 = sshll.u32 %s6619_s0, 4  ;;  %s5575_s9 = int_to_ptr.vmem [resolvable:$true] %s5574_s9 }
  0x5c   :  { %v109_v56 = vld [vmem:[#allocation2 + $0x20] sm:$0xff]  ;;  %v5591_v63 = vcombine.high %v106_v58, %v110_v59  ;;  %v226_v2 = vld [vmem:[#allocation2 + $0x3c8] sm:$0xff]  ;;  %v5590_v5 = vcombine.low %v106_v58, %v110_v59  ;;  %s6579_s10 = scalar_lea.vmem %s5575_s9, 128  ;;  %p6584_p3 = scmp.lt.s32.totalorder %s5575_s9, %s5575_s9 }
  0x5d   :  { %929 = vmatpush1.bf16.msra.mxu0 %v5620_v34  ;;  %970 = vmatpush1.bf16.msra.mxu1 %v5622_v35  ;;  %v5589_v62 = vcombine.high %v105_v55, %v109_v56  ;;  %v225_v0 = vld [vmem:[#allocation2 + $0x3c0] sm:$0xff]  ;;  %v230_v3 = vld [vmem:[#allocation2 + $0x3e8] sm:$0xff]  ;;  %v5588_v4 = vcombine.low %v105_v55, %v109_v56  ;;  %p6580_p2 = scmp.ne.s32.totalorder %s5575_s9, %s6579_s10  ;;  %p6585_p4 = scmp.lt.s32.totalorder %s6579_s10, %s6579_s10 }
  0x5e   :  { %930 = vmatprep.subr.bf16.mxu0 %v5613_v36  ;;  %971 = vmatprep.subr.bf16.mxu1 %v5615_v37  ;;  %v229_v1 = vld [vmem:[#allocation2 + $0x3e0] sm:$0xff]  ;;  %v5711_v7 = vcombine.high %v226_v2, %v230_v3  ;;  %v218_v10 = vld [vmem:[#allocation2 + $0x388] sm:$0xff]  ;;  %v5710_v13 = vcombine.low %v226_v2, %v230_v3  ;;  %v163_v2 = vld [vmem:[#allocation2 + $0x1d0] sm:$0xff] }
  0x5f   :  { %954 = vmatprep.mubr.bf16.mxu0 %v6685_v57  ;;  %995 = vmatprep.mubr.bf16.mxu1 %v6685_v57  ;;  %v5709_v6 = vcombine.high %v225_v0, %v229_v1  ;;  %v217_v8 = vld [vmem:[#allocation2 + $0x380] sm:$0xff]  ;;  %v222_v11 = vld [vmem:[#allocation2 + $0x3a8] sm:$0xff]  ;;  %v5708_v12 = vcombine.low %v225_v0, %v229_v1  ;;  %v167_v3 = vld [vmem:[#allocation2 + $0x1f0] sm:$0xff]  ;;  %p6586_p5 = por %p6585_p4, %p6584_p3 }
  0x60   :  { %v221_v9 = vld [vmem:[#allocation2 + $0x3a0] sm:$0xff]  ;;  %v5703_v15 = vcombine.high %v218_v10, %v222_v11  ;;  %v210_v18 = vld [vmem:[#allocation2 + $0x348] sm:$0xff]  ;;  %v5702_v21 = vcombine.low %v218_v10, %v222_v11  ;;  %v159_v10 = vld [vmem:[#allocation2 + $0x1b0] sm:$0xff] }
  0x61   :  { %931 = vmatpush1.bf16.msra.mxu0 %v5612_v42  ;;  %972 = vmatpush1.bf16.msra.mxu1 %v5614_v43  ;;  %v5701_v14 = vcombine.high %v217_v8, %v221_v9  ;;  %v209_v16 = vld [vmem:[#allocation2 + $0x340] sm:$0xff]  ;;  %v214_v19 = vld [vmem:[#allocation2 + $0x368] sm:$0xff]  ;;  %v5700_v20 = vcombine.low %v217_v8, %v221_v9  ;;  %v5649_v8 = vcombine.high %v163_v2, %v167_v3  ;;  %v155_v9 = vld [vmem:[#allocation2 + $0x190] sm:$0xff]  ;;  %p6587_p6 = pnand %p6586_p5, %p6580_p2 }
  0x62   :  { %932 = vmatprep.subr.bf16.mxu0 %v5605_v44  ;;  %973 = vmatprep.subr.bf16.mxu1 %v5607_v45  ;;  %v213_v17 = vld [vmem:[#allocation2 + $0x360] sm:$0xff]  ;;  %v5695_v23 = vcombine.high %v210_v18, %v214_v19  ;;  %v202_v26 = vld [vmem:[#allocation2 + $0x308] sm:$0xff]  ;;  %v5694_v29 = vcombine.low %v210_v18, %v214_v19  ;;  %v156_v11 = vld [vmem:[#allocation2 + $0x198] sm:$0xff]  ;;  %v5641_v19 = vcombine.high %v155_v9, %v159_v10 }
  0x63   :  { %v5693_v22 = vcombine.high %v209_v16, %v213_v17  ;;  %v201_v24 = vld [vmem:[#allocation2 + $0x300] sm:$0xff]  ;;  %v206_v27 = vld [vmem:[#allocation2 + $0x328] sm:$0xff]  ;;  %v5692_v28 = vcombine.low %v209_v16, %v213_v17  ;;  %v147_v16 = vld [vmem:[#allocation2 + $0x150] sm:$0xff] }
  0x64   :  { %v205_v25 = vld [vmem:[#allocation2 + $0x320] sm:$0xff]  ;;  %v5687_v31 = vcombine.high %v202_v26, %v206_v27  ;;  %v194_v34 = vld [vmem:[#allocation2 + $0x2c8] sm:$0xff]  ;;  %v5686_v37 = vcombine.low %v202_v26, %v206_v27  ;;  %v151_v17 = vld [vmem:[#allocation2 + $0x170] sm:$0xff] }
  0x65   :  { %933 = vmatpush1.bf16.msra.mxu0 %v5604_v50  ;;  %974 = vmatpush1.bf16.msra.mxu1 %v5606_v51  ;;  %v5685_v30 = vcombine.high %v201_v24, %v205_v25  ;;  %v193_v32 = vld [vmem:[#allocation2 + $0x2c0] sm:$0xff]  ;;  %v198_v35 = vld [vmem:[#allocation2 + $0x2e8] sm:$0xff]  ;;  %v5684_v36 = vcombine.low %v201_v24, %v205_v25  ;;  %v143_v24 = vld [vmem:[#allocation2 + $0x130] sm:$0xff]  ;;  %v5633_v26 = vcombine.high %v147_v16, %v151_v17 }
  0x66   :  { %934 = vmatprep.subr.bf16.mxu0 %v5597_v52  ;;  %975 = vmatprep.subr.bf16.mxu1 %v5599_v54  ;;  %v197_v33 = vld [vmem:[#allocation2 + $0x2e0] sm:$0xff]  ;;  %v5679_v39 = vcombine.high %v194_v34, %v198_v35  ;;  %v186_v42 = vld [vmem:[#allocation2 + $0x288] sm:$0xff]  ;;  %v5678_v45 = vcombine.low %v194_v34, %v198_v35  ;;  %v140_v27 = vld [vmem:[#allocation2 + $0x118] sm:$0xff] }
  0x67   :  { %v5677_v38 = vcombine.high %v193_v32, %v197_v33  ;;  %v185_v40 = vld [vmem:[#allocation2 + $0x280] sm:$0xff]  ;;  %v190_v43 = vld [vmem:[#allocation2 + $0x2a8] sm:$0xff]  ;;  %v5676_v44 = vcombine.low %v193_v32, %v197_v33  ;;  %v135_v32 = vld [vmem:[#allocation2 + $0xf0] sm:$0xff] }
  0x68   :  { %v189_v41 = vld [vmem:[#allocation2 + $0x2a0] sm:$0xff]  ;;  %v5671_v47 = vcombine.high %v186_v42, %v190_v43  ;;  %v178_v50 = vld [vmem:[#allocation2 + $0x248] sm:$0xff]  ;;  %v5670_v54 = vcombine.low %v186_v42, %v190_v43  ;;  %v132_v35 = vld [vmem:[#allocation2 + $0xd8] sm:$0xff] }
  0x69   :  { %935 = vmatpush1.bf16.msra.mxu0 %v5596_v60  ;;  %976 = vmatpush1.bf16.msra.mxu1 %v5598_v61  ;;  %v5669_v46 = vcombine.high %v185_v40, %v189_v41  ;;  %v177_v48 = vld [vmem:[#allocation2 + $0x240] sm:$0xff]  ;;  %v182_v51 = vld [vmem:[#allocation2 + $0x268] sm:$0xff]  ;;  %v5668_v52 = vcombine.low %v185_v40, %v189_v41  ;;  %v127_v40 = vld [vmem:[#allocation2 + $0xb0] sm:$0xff] }
  0x6a   :  { %936 = vmatprep.subr.bf16.mxu0 %v5589_v62  ;;  %977 = vmatprep.subr.bf16.mxu1 %v5591_v63  ;;  %v181_v49 = vld [vmem:[#allocation2 + $0x260] sm:$0xff]  ;;  %v5663_v56 = vcombine.high %v178_v50, %v182_v51  ;;  %v170_v60 = vld [vmem:[#allocation2 + $0x208] sm:$0xff]  ;;  %v5662_v63 = vcombine.low %v178_v50, %v182_v51  ;;  %v124_v42 = vld [vmem:[#allocation2 + $0x98] sm:$0xff] }
  0x6b   :  { %v5661_v55 = vcombine.high %v177_v48, %v181_v49  ;;  %v169_v58 = vld [vmem:[#allocation2 + $0x200] sm:$0xff]  ;;  %v174_v61 = vld [vmem:[#allocation2 + $0x228] sm:$0xff]  ;;  %v5660_v62 = vcombine.low %v177_v48, %v181_v49  ;;  %v128_v43 = vld [vmem:[#allocation2 + $0xb8] sm:$0xff] }
  0x6c   :  { %v173_v59 = vld [vmem:[#allocation2 + $0x220] sm:$0xff]  ;;  %v5655_v1 = vcombine.high %v170_v60, %v174_v61  ;;  %v116_v50 = vld [vmem:[#allocation2 + $0x58] sm:$0xff] }
  0x6d   :  { %937 = vmatpush1.bf16.msra.mxu0 %v5588_v4  ;;  %978 = vmatpush1.bf16.msra.mxu1 %v5590_v5  ;;  %v5653_v0 = vcombine.high %v169_v58, %v173_v59  ;;  %v164_v4 = vld [vmem:[#allocation2 + $0x1d8] sm:$0xff] }
  0x6e   :  { %938 = vmatprep.subr.bf16.mxu0 %v5709_v6  ;;  %979 = vmatprep.subr.bf16.mxu1 %v5711_v7  ;;  %v168_v5 = vld [vmem:[#allocation2 + $0x1f8] sm:$0xff]  ;;  %v5652_v6 = vcombine.low %v169_v58, %v173_v59  ;;  %v5654_v7 = vcombine.low %v170_v60, %v174_v61  ;;  %v5610_v58 = vcombine.low %v124_v42, %v128_v43 }
  0x6f   :  { %v5650_v18 = vcombine.low %v164_v4, %v168_v5  ;;  %v120_v51 = vld [vmem:[#allocation2 + $0x78] sm:$0xff] }
  0x70   :  { %v108_v60 = vld [vmem:[#allocation2 + $0x18] sm:$0xff] }
  0x71   :  { %939 = vmatpush2.bf16.msra.mxu0 %v5708_v12  ;;  %980 = vmatpush2.bf16.msra.mxu1 %v5710_v13  ;;  %v5651_v12 = vcombine.high %v164_v4, %v168_v5  ;;  %v160_v13 = vld [vmem:[#allocation2 + $0x1b8] sm:$0xff] }
  0x72   :  { %940 = vmatprep.subr.bf16.mxu0 %v5701_v14  ;;  %981 = vmatprep.subr.bf16.mxu1 %v5703_v15  ;;  %v6691_v14 = vcombine.low %v6681_v53, %v6681_v53  ;;  %v5648_v15 = vcombine.low %v163_v2, %v167_v3  ;;  %v139_v53 = vld [vmem:[#allocation2 + $0x110] sm:$0xff]  ;;  %v5642_v25 = vcombine.low %v156_v11, %v160_v13  ;;  %v112_v61 = vld [vmem:[#allocation2 + $0x38] sm:$0xff] }
  0x73   :  { %v5625_v34 = vcombine.high %v139_v53, %v143_v24  ;;  %v5602_v2 = vcombine.low %v116_v50, %v120_v51  ;;  %v228_v4 = vld [vmem:[#allocation2 + $0x3d8] sm:$0xff] }
  0x74   :  { %v232_v5 = vld [vmem:[#allocation2 + $0x3f8] sm:$0xff] }
  0x75   :  { %941 = vmatpush2.bf16.msra.mxu0 %v5700_v20  ;;  %982 = vmatpush2.bf16.msra.mxu1 %v5702_v21  ;;  %v148_v20 = vld [vmem:[#allocation2 + $0x158] sm:$0xff] }
  0x76   :  { %942 = vmatprep.subr.bf16.mxu0 %v5693_v22  ;;  %983 = vmatprep.subr.bf16.mxu1 %v5695_v23  ;;  %v152_v21 = vld [vmem:[#allocation2 + $0x178] sm:$0xff]  ;;  %v5643_v22 = vcombine.high %v156_v11, %v160_v13  ;;  %v5640_v23 = vcombine.low %v155_v9, %v159_v10  ;;  %v223_v9 = vld [vmem:[#allocation2 + $0x3b0] sm:$0xff]  ;;  %v5594_v10 = vcombine.low %v108_v60, %v112_v61 }
  0x77   :  { %v5634_v33 = vcombine.low %v148_v20, %v152_v21  ;;  %v224_v13 = vld [vmem:[#allocation2 + $0x3b8] sm:$0xff] }
  0x79   :  { %943 = vmatpush2.bf16.msra.mxu0 %v5692_v28  ;;  %984 = vmatpush2.bf16.msra.mxu1 %v5694_v29  ;;  %v144_v28 = vld [vmem:[#allocation2 + $0x138] sm:$0xff]  ;;  %v5635_v29 = vcombine.high %v148_v20, %v152_v21 }
  0x7a   :  { %944 = vmatprep.subr.bf16.mxu0 %v5685_v30  ;;  %985 = vmatprep.subr.bf16.mxu1 %v5687_v31  ;;  %v5632_v30 = vcombine.low %v147_v16, %v151_v17  ;;  %v131_v31 = vld [vmem:[#allocation2 + $0xd0] sm:$0xff]  ;;  %v5626_v41 = vcombine.low %v140_v27, %v144_v28  ;;  %v212_v21 = vld [vmem:[#allocation2 + $0x358] sm:$0xff] }
  0x7b   :  { %v211_v17 = vld [vmem:[#allocation2 + $0x350] sm:$0xff] }
  0x7d   :  { %945 = vmatpush2.bf16.msra.mxu0 %v5684_v36  ;;  %986 = vmatpush2.bf16.msra.mxu1 %v5686_v37  ;;  %v136_v36 = vld [vmem:[#allocation2 + $0xf8] sm:$0xff]  ;;  %v5627_v37 = vcombine.high %v140_v27, %v144_v28 }
  0x7e   :  { %946 = vmatprep.subr.bf16.mxu0 %v5677_v38  ;;  %987 = vmatprep.subr.bf16.mxu1 %v5679_v39  ;;  %v5624_v38 = vcombine.low %v139_v53, %v143_v24  ;;  %v123_v39 = vld [vmem:[#allocation2 + $0x90] sm:$0xff]  ;;  %v5618_v48 = vcombine.low %v132_v35, %v136_v36  ;;  %v204_v28 = vld [vmem:[#allocation2 + $0x318] sm:$0xff] }
  0x7f   :  { %v5609_v49 = vcombine.high %v123_v39, %v127_v40  ;;  %v203_v24 = vld [vmem:[#allocation2 + $0x310] sm:$0xff] }
  0x81   :  { %947 = vmatpush2.bf16.msra.mxu0 %v5676_v44  ;;  %988 = vmatpush2.bf16.msra.mxu1 %v5678_v45  ;;  %v5619_v44 = vcombine.high %v132_v35, %v136_v36  ;;  %v5616_v45 = vcombine.low %v131_v31, %v135_v32  ;;  %v195_v35 = vld [vmem:[#allocation2 + $0x2d0] sm:$0xff] }
  0x82   :  { %948 = vmatprep.subr.bf16.mxu0 %v5669_v46  ;;  %989 = vmatprep.subr.bf16.mxu1 %v5671_v47  ;;  %v115_v46 = vld [vmem:[#allocation2 + $0x50] sm:$0xff] }
  0x83   :  { %v119_v47 = vld [vmem:[#allocation2 + $0x70] sm:$0xff] }
  0x84   :  { %v5601_v59 = vcombine.high %v115_v46, %v119_v47  ;;  %v199_v36 = vld [vmem:[#allocation2 + $0x2f0] sm:$0xff] }
  0x85   :  { %949 = vmatpush2.bf16.msra.mxu0 %v5668_v52  ;;  %990 = vmatpush2.bf16.msra.mxu1 %v5670_v54  ;;  %v5611_v52 = vcombine.high %v124_v42, %v128_v43  ;;  %v5608_v54 = vcombine.low %v123_v39, %v127_v40  ;;  %v187_v42 = vld [vmem:[#allocation2 + $0x290] sm:$0xff] }
  0x86   :  { %950 = vmatprep.subr.bf16.mxu0 %v5661_v55  ;;  %991 = vmatprep.subr.bf16.mxu1 %v5663_v56  ;;  %v107_v55 = vld [vmem:[#allocation2 + $0x10] sm:$0xff] }
  0x87   :  { %v111_v56 = vld [vmem:[#allocation2 + $0x30] sm:$0xff] }
  0x88   :  { %v5593_v3 = vcombine.high %v107_v55, %v111_v56  ;;  %v191_v43 = vld [vmem:[#allocation2 + $0x2b0] sm:$0xff] }
  0x89   :  { %951 = vmatpush2.bf16.msra.mxu0 %v5660_v62  ;;  %992 = vmatpush2.bf16.msra.mxu1 %v5662_v63  ;;  %v5603_v62 = vcombine.high %v116_v50, %v120_v51  ;;  %v5600_v63 = vcombine.low %v115_v46, %v119_v47  ;;  %v5680_v46 = vcombine.low %v195_v35, %v199_v36  ;;  %v179_v50 = vld [vmem:[#allocation2 + $0x250] sm:$0xff] }
  0x8a   :  { %952 = vmatprep.subr.bf16.mxu0 %v5653_v0  ;;  %993 = vmatprep.subr.bf16.mxu1 %v5655_v1  ;;  %v227_v0 = vld [vmem:[#allocation2 + $0x3d0] sm:$0xff] }
  0x8b   :  { %v231_v1 = vld [vmem:[#allocation2 + $0x3f0] sm:$0xff] }
  0x8c   :  { %v5713_v11 = vcombine.high %v227_v0, %v231_v1  ;;  %v5712_v16 = vcombine.low %v227_v0, %v231_v1  ;;  %v183_v51 = vld [vmem:[#allocation2 + $0x270] sm:$0xff] }
  0x8d   :  { %953 = vmatpush2.bf16.msra.mxu0 %v5652_v6  ;;  %994 = vmatpush2.bf16.msra.mxu1 %v5654_v7  ;;  %v5595_v6 = vcombine.high %v108_v60, %v112_v61  ;;  %v5592_v7 = vcombine.low %v107_v55, %v111_v56  ;;  %v5672_v55 = vcombine.low %v187_v42, %v191_v43  ;;  %v171_v60 = vld [vmem:[#allocation2 + $0x210] sm:$0xff] }
  0x8e   :  { %1004 = vmatprep.subr.bf16.mxu0 %v5649_v8  ;;  %1045 = vmatprep.subr.bf16.mxu1 %v5651_v12  ;;  %v219_v8 = vld [vmem:[#allocation2 + $0x390] sm:$0xff]  ;;  %v220_v12 = vld [vmem:[#allocation2 + $0x398] sm:$0xff]  ;;  %v5664_v0 = vcombine.low %v179_v50, %v183_v51 }
  0x8f   :  { %v5705_v20 = vcombine.high %v219_v8, %v223_v9  ;;  %v5704_v53 = vcombine.low %v219_v8, %v223_v9  ;;  %v175_v61 = vld [vmem:[#allocation2 + $0x230] sm:$0xff] }
  0x90   :  { %955 = vmatmul.mubr.bf16.vlgmr.msra.gmra.mxu0 %v6691_v14  ;;  %996 = vmatmul.mubr.bf16.vlgmr.msra.gmra.mxu1 %v6691_v14  ;;  %v5656_v8 = vcombine.low %v171_v60, %v175_v61 }
  0x91   :  { %1005 = vmatpush1.bf16.msra.mxu0 %v5648_v15  ;;  %1046 = vmatpush1.bf16.msra.mxu1 %v5650_v18  ;;  %v5715_v15 = vcombine.high %v228_v4, %v232_v5  ;;  %v215_v18 = vld [vmem:[#allocation2 + $0x370] sm:$0xff] }
  0x92   :  { %1006 = vmatprep.subr.bf16.mxu0 %v5641_v19  ;;  %1047 = vmatprep.subr.bf16.mxu1 %v5643_v22  ;;  %v5714_v19 = vcombine.low %v228_v4, %v232_v5  ;;  %v216_v22 = vld [vmem:[#allocation2 + $0x378] sm:$0xff]  ;;  %v5697_v27 = vcombine.high %v211_v17, %v215_v18  ;;  %v1158_v4 = vld [vmem:[#allocation7 + $0x1c0] sm:$0xff] }
  0x93   :  { %1036 = vmatprep.mubr.bf16.mxu0 %v6685_v57  ;;  %1077 = vmatprep.mubr.bf16.mxu1 %v6685_v57  ;;  %v5617_v57 = vcombine.high %v131_v31, %v135_v32  ;;  %v5696_v31 = vcombine.low %v211_v17, %v215_v18  ;;  %v5698_v32 = vcombine.low %v212_v21, %v216_v22  ;;  %v1162_v5 = vld [vmem:[#allocation7 + $0x1e0] sm:$0xff] }
  0x94   :  { %v5772_v17 = vcombine.low %v1158_v4, %v1162_v5 }
  0x95   :  { %1007 = vmatpush1.bf16.msra.mxu0 %v5640_v23  ;;  %1048 = vmatpush1.bf16.msra.mxu1 %v5642_v25  ;;  %v5707_v23 = vcombine.high %v220_v12, %v224_v13  ;;  %v207_v25 = vld [vmem:[#allocation2 + $0x330] sm:$0xff] }
  0x96   :  { %1008 = vmatprep.subr.bf16.mxu0 %v5633_v26  ;;  %1049 = vmatprep.subr.bf16.mxu1 %v5635_v29  ;;  %v5706_v26 = vcombine.low %v220_v12, %v224_v13  ;;  %v208_v29 = vld [vmem:[#allocation2 + $0x338] sm:$0xff]  ;;  %v5688_v39 = vcombine.low %v203_v24, %v207_v25  ;;  %v1150_v12 = vld [vmem:[#allocation7 + $0x180] sm:$0xff] }
  0x97   :  { %v5690_v40 = vcombine.low %v204_v28, %v208_v29  ;;  %v1154_v13 = vld [vmem:[#allocation7 + $0x1a0] sm:$0xff] }
  0x99   :  { %1009 = vmatpush1.bf16.msra.mxu0 %v5632_v30  ;;  %1050 = vmatpush1.bf16.msra.mxu1 %v5634_v33  ;;  %v5699_v30 = vcombine.high %v212_v21, %v216_v22  ;;  %v5689_v33 = vcombine.high %v203_v24, %v207_v25  ;;  %v1142_v21 = vld [vmem:[#allocation7 + $0x140] sm:$0xff]  ;;  %v5764_v24 = vcombine.low %v1150_v12, %v1154_v13 }
  0x9a   :  { %1010 = vmatprep.subr.bf16.mxu0 %v5625_v34  ;;  %1051 = vmatprep.subr.bf16.mxu1 %v5627_v37  ;;  %v5691_v34 = vcombine.high %v204_v28, %v208_v29  ;;  %v196_v37 = vld [vmem:[#allocation2 + $0x2d8] sm:$0xff]  ;;  %v1146_v22 = vld [vmem:[#allocation7 + $0x160] sm:$0xff] }
  0x9b   :  { %v1134_v28 = vld [vmem:[#allocation7 + $0x100] sm:$0xff] }
  0x9c   :  { %v1138_v29 = vld [vmem:[#allocation7 + $0x120] sm:$0xff] }
  0x9d   :  { %1011 = vmatpush1.bf16.msra.mxu0 %v5624_v38  ;;  %1052 = vmatpush1.bf16.msra.mxu1 %v5626_v41  ;;  %v200_v38 = vld [vmem:[#allocation2 + $0x2f8] sm:$0xff]  ;;  %v5681_v41 = vcombine.high %v195_v35, %v199_v36  ;;  %v1126_v35 = vld [vmem:[#allocation7 + $0xc0] sm:$0xff] }
  0x9e   :  { %1012 = vmatprep.subr.bf16.mxu0 %v5617_v57  ;;  %1053 = vmatprep.subr.bf16.mxu1 %v5619_v44  ;;  %v5683_v57 = vcombine.high %v196_v37, %v200_v38  ;;  %v188_v44 = vld [vmem:[#allocation2 + $0x298] sm:$0xff]  ;;  %v5682_v47 = vcombine.low %v196_v37, %v200_v38  ;;  %v6699_v37 = vld [vmem:[#allocation7 + $0x9c0] sm:$0xff] }
  0x9f   :  { %v6701_v38 = vld [vmem:[#allocation7 + $0x9e0] sm:$0xff] }
  0xa1   :  { %1013 = vmatpush1.bf16.msra.mxu0 %v5616_v45  ;;  %1054 = vmatpush1.bf16.msra.mxu1 %v5618_v48  ;;  %v192_v45 = vld [vmem:[#allocation2 + $0x2b8] sm:$0xff]  ;;  %v5673_v48 = vcombine.high %v187_v42, %v191_v43  ;;  %v5748_v42 = vcombine.low %v1134_v28, %v1138_v29  ;;  %v6028_v43 = vcombine.low %v6699_v37, %v6701_v38 }
  0xa2   :  { %1014 = vmatprep.subr.bf16.mxu0 %v5609_v49  ;;  %1055 = vmatprep.subr.bf16.mxu1 %v5611_v52  ;;  %v5675_v49 = vcombine.high %v188_v44, %v192_v45  ;;  %v180_v52 = vld [vmem:[#allocation2 + $0x258] sm:$0xff]  ;;  %v5674_v56 = vcombine.low %v188_v44, %v192_v45 }
  0xa5   :  { %1015 = vmatpush1.bf16.msra.mxu0 %v5608_v54  ;;  %1056 = vmatpush1.bf16.msra.mxu1 %v5610_v58  ;;  %v184_v54 = vld [vmem:[#allocation2 + $0x278] sm:$0xff]  ;;  %v5665_v58 = vcombine.high %v179_v50, %v183_v51  ;;  %v1246_v50 = vld [vmem:[#allocation7 + $0x480] sm:$0xff] }
  0xa6   :  { %1016 = vmatprep.subr.bf16.mxu0 %v5601_v59  ;;  %1057 = vmatprep.subr.bf16.mxu1 %v5603_v62  ;;  %v5667_v59 = vcombine.high %v180_v52, %v184_v54  ;;  %v172_v62 = vld [vmem:[#allocation2 + $0x218] sm:$0xff]  ;;  %v5666_v1 = vcombine.low %v180_v52, %v184_v54  ;;  %v1250_v51 = vld [vmem:[#allocation7 + $0x4a0] sm:$0xff] }
  0xa9   :  { %1017 = vmatpush1.bf16.msra.mxu0 %v5600_v63  ;;  %1058 = vmatpush1.bf16.msra.mxu1 %v5602_v2  ;;  %v176_v63 = vld [vmem:[#allocation2 + $0x238] sm:$0xff]  ;;  %v5657_v2 = vcombine.high %v171_v60, %v175_v61  ;;  %v1238_v60 = vld [vmem:[#allocation7 + $0x440] sm:$0xff] }
  0xaa   :  { %1018 = vmatprep.subr.bf16.mxu0 %v5593_v3  ;;  %1059 = vmatprep.subr.bf16.mxu1 %v5595_v6  ;;  %v5659_v3 = vcombine.high %v172_v62, %v176_v63  ;;  %v1286_v6 = vld [vmem:[#allocation7 + $0x5c0] sm:$0xff]  ;;  %v5658_v9 = vcombine.low %v172_v62, %v176_v63  ;;  %v5860_v63 = vcombine.low %v1246_v50, %v1250_v51 }
  0xab   :  { %v1242_v61 = vld [vmem:[#allocation7 + $0x460] sm:$0xff] }
  0xad   :  { %1019 = vmatpush1.bf16.msra.mxu0 %v5592_v7  ;;  %1060 = vmatpush1.bf16.msra.mxu1 %v5594_v10  ;;  %v1290_v7 = vld [vmem:[#allocation7 + $0x5e0] sm:$0xff]  ;;  %v5773_v10 = vcombine.high %v1158_v4, %v1162_v5 }
  0xae   :  { %1020 = vmatprep.subr.bf16.mxu0 %v5713_v11  ;;  %1061 = vmatprep.subr.bf16.mxu1 %v5715_v15  ;;  %v5901_v11 = vcombine.high %v1286_v6, %v1290_v7  ;;  %v1278_v15 = vld [vmem:[#allocation7 + $0x580] sm:$0xff]  ;;  %v5900_v18 = vcombine.low %v1286_v6, %v1290_v7  ;;  %v5852_v7 = vcombine.low %v1238_v60, %v1242_v61 }
  0xaf   :  { %v1230_v4 = vld [vmem:[#allocation7 + $0x400] sm:$0xff] }
  0xb0   :  { %v1234_v5 = vld [vmem:[#allocation7 + $0x420] sm:$0xff] }
  0xb1   :  { %1021 = vmatpush2.bf16.msra.mxu0 %v5712_v16  ;;  %1062 = vmatpush2.bf16.msra.mxu1 %v5714_v19  ;;  %v1282_v16 = vld [vmem:[#allocation7 + $0x5a0] sm:$0xff]  ;;  %v5765_v19 = vcombine.high %v1150_v12, %v1154_v13 }
  0xb2   :  { %1022 = vmatprep.subr.bf16.mxu0 %v5705_v20  ;;  %1063 = vmatprep.subr.bf16.mxu1 %v5707_v23  ;;  %v5893_v20 = vcombine.high %v1278_v15, %v1282_v16  ;;  %v1270_v23 = vld [vmem:[#allocation7 + $0x540] sm:$0xff]  ;;  %v5892_v25 = vcombine.low %v1278_v15, %v1282_v16  ;;  %v5844_v16 = vcombine.low %v1230_v4, %v1234_v5 }
  0xb3   :  { %v1350_v12 = vld [vmem:[#allocation7 + $0x7c0] sm:$0xff] }
  0xb4   :  { %v1354_v13 = vld [vmem:[#allocation7 + $0x7e0] sm:$0xff] }
  0xb5   :  { %1023 = vmatpush2.bf16.msra.mxu0 %v5704_v53  ;;  %1064 = vmatpush2.bf16.msra.mxu1 %v5706_v26  ;;  %v1274_v53 = vld [vmem:[#allocation7 + $0x560] sm:$0xff]  ;;  %v5757_v26 = vcombine.high %v1142_v21, %v1146_v22 }
  0xb6   :  { %1024 = vmatprep.subr.bf16.mxu0 %v5697_v27  ;;  %1065 = vmatprep.subr.bf16.mxu1 %v5699_v30  ;;  %v5885_v27 = vcombine.high %v1270_v23, %v1274_v53  ;;  %v1262_v30 = vld [vmem:[#allocation7 + $0x500] sm:$0xff] }
  0xb9   :  { %1025 = vmatpush2.bf16.msra.mxu0 %v5696_v31  ;;  %1066 = vmatpush2.bf16.msra.mxu1 %v5698_v32  ;;  %v1266_v31 = vld [vmem:[#allocation7 + $0x520] sm:$0xff]  ;;  %v5756_v32 = vcombine.low %v1142_v21, %v1146_v22 }
  0xba   :  { %1026 = vmatprep.subr.bf16.mxu0 %v5689_v33  ;;  %1067 = vmatprep.subr.bf16.mxu1 %v5691_v34  ;;  %v5884_v33 = vcombine.low %v1270_v23, %v1274_v53  ;;  %v5749_v34 = vcombine.high %v1134_v28, %v1138_v29  ;;  %v5877_v36 = vcombine.high %v1262_v30, %v1266_v31  ;;  %v1342_v21 = vld [vmem:[#allocation7 + $0x780] sm:$0xff] }
  0xbb   :  { %v5876_v45 = vcombine.low %v1262_v30, %v1266_v31  ;;  %v1346_v22 = vld [vmem:[#allocation7 + $0x7a0] sm:$0xff]  ;;  %v5964_v53 = vcombine.low %v1350_v12, %v1354_v13 }
  0xbc   :  { %v1334_v28 = vld [vmem:[#allocation7 + $0x740] sm:$0xff]  ;;  %v5956_v31 = vcombine.low %v1342_v21, %v1346_v22 }
  0xbd   :  { %1027 = vmatpush2.bf16.msra.mxu0 %v5688_v39  ;;  %1068 = vmatpush2.bf16.msra.mxu1 %v5690_v40  ;;  %v6703_v39 = vld [vmem:[#allocation7 + $0xdc0] sm:$0xff] }
  0xbe   :  { %1028 = vmatprep.subr.bf16.mxu0 %v5681_v41  ;;  %1069 = vmatprep.subr.bf16.mxu1 %v5683_v57  ;;  %v1254_v40 = vld [vmem:[#allocation7 + $0x4c0] sm:$0xff] }
  0xbf   :  { %v1258_v41 = vld [vmem:[#allocation7 + $0x4e0] sm:$0xff] }
  0xc0   :  { %v6705_v57 = vld [vmem:[#allocation7 + $0xde0] sm:$0xff]  ;;  %v5868_v54 = vcombine.low %v1254_v40, %v1258_v41 }
  0xc1   :  { %1029 = vmatpush2.bf16.msra.mxu0 %v5680_v46  ;;  %1070 = vmatpush2.bf16.msra.mxu1 %v5682_v47  ;;  %v6156_v44 = vcombine.low %v6703_v39, %v6705_v57  ;;  %v5869_v47 = vcombine.high %v1254_v40, %v1258_v41  ;;  %v1338_v29 = vld [vmem:[#allocation7 + $0x760] sm:$0xff] }
  0xc2   :  { %1030 = vmatprep.subr.bf16.mxu0 %v5673_v48  ;;  %1071 = vmatprep.subr.bf16.mxu1 %v5675_v49  ;;  %v1118_v48 = vld [vmem:[#allocation7 + $0x80] sm:$0xff]  ;;  %v5948_v41 = vcombine.low %v1334_v28, %v1338_v29 }
  0xc3   :  { %v1122_v49 = vld [vmem:[#allocation7 + $0xa0] sm:$0xff] }
  0xc4   :  { %v5732_v62 = vcombine.low %v1118_v48, %v1122_v49 }
  0xc5   :  { %1031 = vmatpush2.bf16.msra.mxu0 %v5672_v55  ;;  %1072 = vmatpush2.bf16.msra.mxu1 %v5674_v56  ;;  %v5733_v55 = vcombine.high %v1118_v48, %v1122_v49  ;;  %v5861_v56 = vcombine.high %v1246_v50, %v1250_v51  ;;  %v1318_v48 = vld [vmem:[#allocation7 + $0x6c0] sm:$0xff] }
  0xc6   :  { %1032 = vmatprep.subr.bf16.mxu0 %v5665_v58  ;;  %1073 = vmatprep.subr.bf16.mxu1 %v5667_v59  ;;  %v1110_v58 = vld [vmem:[#allocation7 + $0x40] sm:$0xff] }
  0xc7   :  { %v1114_v59 = vld [vmem:[#allocation7 + $0x60] sm:$0xff] }
  0xc8   :  { %v5724_v6 = vcombine.low %v1110_v58, %v1114_v59  ;;  %v1322_v49 = vld [vmem:[#allocation7 + $0x6e0] sm:$0xff] }
  0xc9   :  { %1033 = vmatpush2.bf16.msra.mxu0 %v5664_v0  ;;  %1074 = vmatpush2.bf16.msra.mxu1 %v5666_v1  ;;  %v5725_v0 = vcombine.high %v1110_v58, %v1114_v59  ;;  %v5853_v1 = vcombine.high %v1238_v60, %v1242_v61  ;;  %v1310_v58 = vld [vmem:[#allocation7 + $0x680] sm:$0xff]  ;;  %v5932_v61 = vcombine.low %v1318_v48, %v1322_v49 }
  0xca   :  { %1034 = vmatprep.subr.bf16.mxu0 %v5657_v2  ;;  %1075 = vmatprep.subr.bf16.mxu1 %v5659_v3  ;;  %v1102_v2 = vld [vmem:[#allocation7] sm:$0xff] }
  0xcb   :  { %v1106_v3 = vld [vmem:[#allocation7 + $0x20] sm:$0xff] }
  0xcc   :  { %v5716_v15 = vcombine.low %v1102_v2, %v1106_v3  ;;  %v1314_v59 = vld [vmem:[#allocation7 + $0x6a0] sm:$0xff] }
  0xcd   :  { %1035 = vmatpush2.bf16.msra.mxu0 %v5656_v8  ;;  %1076 = vmatpush2.bf16.msra.mxu1 %v5658_v9  ;;  %v5717_v8 = vcombine.high %v1102_v2, %v1106_v3  ;;  %v5845_v9 = vcombine.high %v1230_v4, %v1234_v5  ;;  %v1302_v2 = vld [vmem:[#allocation7 + $0x640] sm:$0xff]  ;;  %v5924_v5 = vcombine.low %v1310_v58, %v1314_v59 }
  0xce   :  { %4216 = vmatprep.subr.bf16.mxu0 %v5773_v10  ;;  %4257 = vmatprep.subr.bf16.mxu1 %v5901_v11  ;;  %v1222_v10 = vld [vmem:[#allocation7 + $0x3c0] sm:$0xff] }
  0xcf   :  { %v1226_v11 = vld [vmem:[#allocation7 + $0x3e0] sm:$0xff] }
  0xd0   :  { %1037 = vmatmul.mubr.bf16.vlgmr.msra.gmra.mxu0 %v6691_v14  ;;  %1078 = vmatmul.mubr.bf16.vlgmr.msra.gmra.mxu1 %v6691_v14  ;;  %v1130_v14 = vld [vmem:[#allocation7 + $0xe0] sm:$0xff]  ;;  %v5836_v23 = vcombine.low %v1222_v10, %v1226_v11 }
  0xd1   :  { %4217 = vmatpush1.bf16.msra.mxu0 %v5772_v17  ;;  %4258 = vmatpush1.bf16.msra.mxu1 %v5900_v18  ;;  %v5741_v46 = vcombine.high %v1126_v35, %v1130_v14  ;;  %v5740_v52 = vcombine.low %v1126_v35, %v1130_v14  ;;  %v5837_v17 = vcombine.high %v1222_v10, %v1226_v11  ;;  %v1202_v35 = vld [vmem:[#allocation7 + $0x320] sm:$0xff] }
  0xd2   :  { %4218 = vmatprep.subr.bf16.mxu0 %v5765_v19  ;;  %4259 = vmatprep.subr.bf16.mxu1 %v5893_v20  ;;  %v5965_v18 = vcombine.high %v1350_v12, %v1354_v13  ;;  %v1214_v19 = vld [vmem:[#allocation7 + $0x380] sm:$0xff] }
  0xd3   :  { %v1218_v20 = vld [vmem:[#allocation7 + $0x3a0] sm:$0xff] }
  0xd4   :  { %v5828_v30 = vcombine.low %v1214_v19, %v1218_v20  ;;  %v1326_v14 = vld [vmem:[#allocation7 + $0x700] sm:$0xff] }
  0xd5   :  { %4219 = vmatpush1.bf16.msra.mxu0 %v5764_v24  ;;  %4260 = vmatpush1.bf16.msra.mxu1 %v5892_v25  ;;  %v5829_v24 = vcombine.high %v1214_v19, %v1218_v20  ;;  %v5957_v25 = vcombine.high %v1342_v21, %v1346_v22  ;;  %v1306_v3 = vld [vmem:[#allocation7 + $0x660] sm:$0xff]  ;;  %v6029_v19 = vcombine.high %v6699_v37, %v6701_v38  ;;  %v235_v21 = vlaneseq }
  0xd6   :  { %4220 = vmatprep.subr.bf16.mxu0 %v5757_v26  ;;  %4261 = vmatprep.subr.bf16.mxu1 %v5885_v27  ;;  %v1206_v26 = vld [vmem:[#allocation7 + $0x340] sm:$0xff]  ;;  %v5916_v13 = vcombine.low %v1302_v2, %v1306_v3  ;;  %v6157_v20 = vcombine.high %v6703_v39, %v6705_v57 }
  0xd7   :  { %v1210_v27 = vld [vmem:[#allocation7 + $0x360] sm:$0xff]  ;;  %v6715_v22 = vshrl.u32 %v235_v21, 7 }
  0xd8   :  { %v5820_v40 = vcombine.low %v1206_v26, %v1210_v27  ;;  %v1294_v10 = vld [vmem:[#allocation7 + $0x600] sm:$0xff] }
  0xd9   :  { %4221 = vmatpush1.bf16.msra.mxu0 %v5756_v32  ;;  %4262 = vmatpush1.bf16.msra.mxu1 %v5884_v33  ;;  %v5821_v32 = vcombine.high %v1206_v26, %v1210_v27  ;;  %v5949_v33 = vcombine.high %v1334_v28, %v1338_v29  ;;  %v1298_v11 = vld [vmem:[#allocation7 + $0x620] sm:$0xff]  ;;  %v249_v26 = vsub.s32 3, %v6715_v22 }
  0xda   :  { %4222 = vmatprep.subr.bf16.mxu0 %v5749_v34  ;;  %4263 = vmatprep.subr.bf16.mxu1 %v5877_v36  ;;  %v1198_v34 = vld [vmem:[#allocation7 + $0x300] sm:$0xff] }
  0xdb   :  { %v1330_v36 = vld [vmem:[#allocation7 + $0x720] sm:$0xff]  ;;  %v5812_v50 = vcombine.low %v1198_v34, %v1202_v35 }
  0xdc   :  { %v5940_v51 = vcombine.low %v1326_v14, %v1330_v36  ;;  %v1386_v39 = vld [vmem:[#allocation7 + $0x8e0] sm:$0xff] }
  0xdd   :  { %4223 = vmatpush1.bf16.msra.mxu0 %v5748_v42  ;;  %4264 = vmatpush1.bf16.msra.mxu1 %v5876_v45  ;;  %v5813_v42 = vcombine.high %v1198_v34, %v1202_v35  ;;  %v5941_v45 = vcombine.high %v1326_v14, %v1330_v36  ;;  %v1510_v57 = vld [vmem:[#allocation7 + $0xcc0] sm:$0xff] }
  0xde   :  { %4224 = vmatprep.subr.bf16.mxu0 %v5741_v46  ;;  %4265 = vmatprep.subr.bf16.mxu1 %v5869_v47  ;;  %v1190_v46 = vld [vmem:[#allocation7 + $0x2c0] sm:$0xff] }
  0xdf   :  { %v1194_v47 = vld [vmem:[#allocation7 + $0x2e0] sm:$0xff] }
  0xe0   :  { %v5804_v60 = vcombine.low %v1190_v46, %v1194_v47  ;;  %v1506_v21 = vld [vmem:[#allocation7 + $0xca0] sm:$0xff] }
  0xe1   :  { %4225 = vmatpush1.bf16.msra.mxu0 %v5740_v52  ;;  %4266 = vmatpush1.bf16.msra.mxu1 %v5868_v54  ;;  %v5805_v52 = vcombine.high %v1190_v46, %v1194_v47  ;;  %v5933_v54 = vcombine.high %v1318_v48, %v1322_v49  ;;  %v1406_v48 = vld [vmem:[#allocation7 + $0x980] sm:$0xff] }
  0xe2   :  { %4226 = vmatprep.subr.bf16.mxu0 %v5733_v55  ;;  %4267 = vmatprep.subr.bf16.mxu1 %v5861_v56  ;;  %v1182_v55 = vld [vmem:[#allocation7 + $0x280] sm:$0xff] }
  0xe3   :  { %v1186_v56 = vld [vmem:[#allocation7 + $0x2a0] sm:$0xff] }
  0xe4   :  { %v5796_v4 = vcombine.low %v1182_v55, %v1186_v56  ;;  %v1410_v49 = vld [vmem:[#allocation7 + $0x9a0] sm:$0xff] }
  0xe5   :  { %4227 = vmatpush1.bf16.msra.mxu0 %v5732_v62  ;;  %4268 = vmatpush1.bf16.msra.mxu1 %v5860_v63  ;;  %v5797_v62 = vcombine.high %v1182_v55, %v1186_v56  ;;  %v5925_v63 = vcombine.high %v1310_v58, %v1314_v59 }
  0xe6   :  { %4228 = vmatprep.subr.bf16.mxu0 %v5725_v0  ;;  %4269 = vmatprep.subr.bf16.mxu1 %v5853_v1  ;;  %v1174_v0 = vld [vmem:[#allocation7 + $0x240] sm:$0xff] }
  0xe7   :  { %v1178_v1 = vld [vmem:[#allocation7 + $0x260] sm:$0xff] }
  0xe8   :  { %v5788_v12 = vcombine.low %v1174_v0, %v1178_v1 }
  0xe9   :  { %4229 = vmatpush1.bf16.msra.mxu0 %v5724_v6  ;;  %4270 = vmatpush1.bf16.msra.mxu1 %v5852_v7  ;;  %v5789_v6 = vcombine.high %v1174_v0, %v1178_v1  ;;  %v5917_v7 = vcombine.high %v1302_v2, %v1306_v3  ;;  %v1402_v0 = vld [vmem:[#allocation7 + $0x960] sm:$0xff]  ;;  %v6020_v3 = vcombine.low %v1406_v48, %v1410_v49 }
  0xea   :  { %4230 = vmatprep.subr.bf16.mxu0 %v5717_v8  ;;  %4271 = vmatprep.subr.bf16.mxu1 %v5845_v9  ;;  %v1166_v8 = vld [vmem:[#allocation7 + $0x200] sm:$0xff] }
  0xeb   :  { %v1170_v9 = vld [vmem:[#allocation7 + $0x220] sm:$0xff] }
  0xec   :  { %v1526_v1 = vld [vmem:[#allocation7 + $0xd40] sm:$0xff] }
  0xed   :  { %4231 = vmatpush1.bf16.msra.mxu0 %v5716_v15  ;;  %4272 = vmatpush1.bf16.msra.mxu1 %v5844_v16  ;;  %v5781_v15 = vcombine.high %v1166_v8, %v1170_v9  ;;  %v5909_v16 = vcombine.high %v1294_v10, %v1298_v11  ;;  %v1530_v2 = vld [vmem:[#allocation7 + $0xd60] sm:$0xff] }
  0xee   :  { %4232 = vmatprep.subr.bf16.mxu0 %v5837_v17  ;;  %4273 = vmatprep.subr.bf16.mxu1 %v5965_v18  ;;  %v5780_v17 = vcombine.low %v1166_v8, %v1170_v9  ;;  %v5908_v18 = vcombine.low %v1294_v10, %v1298_v11  ;;  %v1394_v8 = vld [vmem:[#allocation7 + $0x920] sm:$0xff]  ;;  %v6140_v37 = vcombine.low %v1526_v1, %v1530_v2 }
  0xef   :  { %v1518_v9 = vld [vmem:[#allocation7 + $0xd00] sm:$0xff] }
  0xf0   :  { %v1522_v10 = vld [vmem:[#allocation7 + $0xd20] sm:$0xff] }
  0xf1   :  { %4233 = vmatpush2.bf16.msra.mxu0 %v5836_v23  ;;  %4274 = vmatpush2.bf16.msra.mxu1 %v5964_v53  ;;  %v237_v23 = vsub.s32 0, %v6715_v22  ;;  %v6718_v53 = vld [vmem:[#allocation5] sm:$0xff] }
  0xf2   :  { %4234 = vmatprep.subr.bf16.mxu0 %v5829_v24  ;;  %4275 = vmatprep.subr.bf16.mxu1 %v5957_v25  ;;  %v245_v24 = vsub.s32 2, %v6715_v22  ;;  %v241_v25 = vsub.s32 1, %v6715_v22 }
  0xf3   :  { %v238_v27 = vrot.slane %v6718_v53, %v237_v23 }
  0xf4   :  { %v246_v28 = vrot.slane %v6718_v53, %v245_v24  ;;  %v242_v29 = vrot.slane %v6718_v53, %v241_v25 }
  0xf5   :  { %4235 = vmatpush2.bf16.msra.mxu0 %v5828_v30  ;;  %4276 = vmatpush2.bf16.msra.mxu1 %v5956_v31  ;;  %v250_v31 = vrot.slane %v6718_v53, %v249_v26 }
  0xf6   :  { %4236 = vmatprep.subr.bf16.mxu0 %v5821_v32  ;;  %4277 = vmatprep.subr.bf16.mxu1 %v5949_v33 }
  0xf9   :  { %4237 = vmatpush2.bf16.msra.mxu0 %v5820_v40  ;;  %4278 = vmatpush2.bf16.msra.mxu1 %v5948_v41 }
  0xfa   :  { %4238 = vmatprep.subr.bf16.mxu0 %v5813_v42  ;;  %4279 = vmatprep.subr.bf16.mxu1 %v5941_v45 }
  0xfd   :  { %4239 = vmatpush2.bf16.msra.mxu0 %v5812_v50  ;;  %4280 = vmatpush2.bf16.msra.mxu1 %v5940_v51 }
  0xfe   :  { %4240 = vmatprep.subr.bf16.mxu0 %v5805_v52  ;;  %4281 = vmatprep.subr.bf16.mxu1 %v5933_v54  ;;  %v1534_v52 = vld [vmem:[#allocation7 + $0xd80] sm:$0xff] }
  0xff   :  { %v1538_v54 = vld [vmem:[#allocation7 + $0xda0] sm:$0xff] }
 0x101   :  { %4241 = vmatpush2.bf16.msra.mxu0 %v5804_v60  ;;  %4282 = vmatpush2.bf16.msra.mxu1 %v5932_v61  ;;  %v6021_v61 = vcombine.high %v1406_v48, %v1410_v49 }
 0x102   :  { %4242 = vmatprep.subr.bf16.mxu0 %v5797_v62  ;;  %4283 = vmatprep.subr.bf16.mxu1 %v5925_v63  ;;  %v6149_v62 = vcombine.high %v1534_v52, %v1538_v54  ;;  %v1398_v63 = vld [vmem:[#allocation7 + $0x940] sm:$0xff] }
 0x103   :  { %v6012_v11 = vcombine.low %v1398_v63, %v1402_v0 }
 0x105   :  { %4243 = vmatpush2.bf16.msra.mxu0 %v5796_v4  ;;  %4284 = vmatpush2.bf16.msra.mxu1 %v5924_v5  ;;  %v6148_v4 = vcombine.low %v1534_v52, %v1538_v54  ;;  %v6013_v5 = vcombine.high %v1398_v63, %v1402_v0  ;;  %v1482_v52 = vld [vmem:[#allocation7 + $0xbe0] sm:$0xff] }
 0x106   :  { %4244 = vmatprep.subr.bf16.mxu0 %v5789_v6  ;;  %4285 = vmatprep.subr.bf16.mxu1 %v5917_v7  ;;  %v6141_v6 = vcombine.high %v1526_v1, %v1530_v2  ;;  %v1390_v7 = vld [vmem:[#allocation7 + $0x900] sm:$0xff] }
 0x107   :  { %v6005_v38 = vcombine.high %v1390_v7, %v1394_v8  ;;  %v1606_v54 = vld [vmem:[#allocation7 + $0xfc0] sm:$0xff] }
 0x108   :  { %v1470_v1 = vld [vmem:[#allocation7 + $0xb80] sm:$0xff] }
 0x109   :  { %4245 = vmatpush2.bf16.msra.mxu0 %v5788_v12  ;;  %4286 = vmatpush2.bf16.msra.mxu1 %v5916_v13  ;;  %v1382_v12 = vld [vmem:[#allocation7 + $0x8c0] sm:$0xff]  ;;  %v6004_v13 = vcombine.low %v1390_v7, %v1394_v8 }
 0x10a   :  { %4246 = vmatprep.subr.bf16.mxu0 %v5781_v15  ;;  %4287 = vmatprep.subr.bf16.mxu1 %v5909_v16  ;;  %v6132_v15 = vcombine.low %v1518_v9, %v1522_v10  ;;  %v5997_v16 = vcombine.high %v1382_v12, %v1386_v39  ;;  %v1474_v2 = vld [vmem:[#allocation7 + $0xba0] sm:$0xff] }
 0x10b   :  { %v6085_v7 = vcombine.high %v1470_v1, %v1474_v2 }
 0x10d   :  { %4247 = vmatpush2.bf16.msra.mxu0 %v5780_v17  ;;  %4288 = vmatpush2.bf16.msra.mxu1 %v5908_v18  ;;  %v1374_v18 = vld [vmem:[#allocation7 + $0x880] sm:$0xff] }
 0x10e   :  { %4298 = vmatprep.subr.bf16.mxu0 %v6029_v19  ;;  %4339 = vmatprep.subr.bf16.mxu1 %v6157_v20  ;;  %v1378_v19 = vld [vmem:[#allocation7 + $0x8a0] sm:$0xff] }
 0x10f   :  { %v1502_v20 = vld [vmem:[#allocation7 + $0xc80] sm:$0xff] }
 0x150   :  { %v956_v30 = vpop.f32.mrf.mxu0  ;;  %v997_v33 = vpop.f32.mrf.mxu1 }
 0x151   :  { %v957_v32 = vadd.f32 %v956_v30, %v238_v27  ;;  %v998_v34 = vadd.f32 %v997_v33, %v246_v28  ;;  %v5996_v27 = vcombine.low %v1382_v12, %v1386_v39  ;;  %v6117_v30 = vcombine.high %v1502_v20, %v1506_v21  ;;  %v1494_v33 = vld [vmem:[#allocation7 + $0xc40] sm:$0xff] }
 0x152   :  { %v958_v35 = vpop.f32.mrf.mxu0  ;;  %v999_v36 = vpop.f32.mrf.mxu1 }
 0x153   :  { %v959_v14 = vadd.f32 %v958_v35, %v242_v29  ;;  %v1086_v40 = vmax.f32 %v957_v32, 0.0  ;;  %v1088_v41 = vmax.f32 %v998_v34, 0.0  ;;  %v1000_v42 = vadd.f32 %v999_v36, %v250_v31  ;;  %v1366_v31 = vld [vmem:[#allocation7 + $0x840] sm:$0xff] }
 0x154   :  { %v960_v45 = vpop.f32.mrf.mxu0  ;;  %v1001_v47 = vpop.f32.mrf.mxu1  ;;  %v5989_v29 = vcombine.high %v1374_v18, %v1378_v19  ;;  %v1370_v32 = vld [vmem:[#allocation7 + $0x860] sm:$0xff]  ;;  %v5988_v35 = vcombine.low %v1374_v18, %v1378_v19 }
 0x155   :  { %v1087_v46 = vmax.f32 %v959_v14, 0.0  ;;  %v1089_v50 = vmax.f32 %v1000_v42, 0.0  ;;  %v6735_v55 = vpack.c.bf16 %v1088_v41, %v1088_v41  ;;  %v6739_v59 = vpack.c.bf16 %v1086_v40, %v1086_v40  ;;  %v1498_v34 = vld [vmem:[#allocation7 + $0xc60] sm:$0xff] }
 0x156   :  { %v961_v51 = vpop.f32.mrf.mxu0  ;;  %v1002_v58 = vpop.f32.mrf.mxu1  ;;  %v6116_v14 = vcombine.low %v1502_v20, %v1506_v21  ;;  %v5981_v36 = vcombine.high %v1366_v31, %v1370_v32  ;;  %v6109_v40 = vcombine.high %v1494_v33, %v1498_v34  ;;  %v1358_v41 = vld [vmem:[#allocation7 + $0x800] sm:$0xff]  ;;  %v5980_v47 = vcombine.low %v1366_v31, %v1370_v32 }
 0x157   :  { %v6737_v56 = vpack.c.bf16 %v1087_v46, %v1087_v46  ;;  %v6741_v60 = vpack.c.bf16 %v1089_v50, %v1089_v50  ;;  %v1362_v42 = vld [vmem:[#allocation7 + $0x820] sm:$0xff]  ;;  %v6108_v48 = vcombine.low %v1494_v33, %v1498_v34 }
 0x158   :  { %v1486_v45 = vld [vmem:[#allocation7 + $0xc00] sm:$0xff]  ;;  %v5973_v49 = vcombine.high %v1358_v41, %v1362_v42 }
 0x159   :  { %4248 = vmatprep.mubr.bf16.mxu0 %v6737_v56  ;;  %4289 = vmatprep.mubr.bf16.mxu1 %v6741_v60  ;;  %v1490_v46 = vld [vmem:[#allocation7 + $0xc20] sm:$0xff] }
 0x15a   :  { %4249 = vmatmul.mubr.bf16.vlgmr.msra.gmra.mxu0 %v6739_v59  ;;  %4290 = vmatmul.mubr.bf16.vlgmr.msra.gmra.mxu1 %v6735_v55  ;;  %v6101_v50 = vcombine.high %v1486_v45, %v1490_v46  ;;  %v1478_v51 = vld [vmem:[#allocation7 + $0xbc0] sm:$0xff] }
 0x15b   :  { %4299 = vmatpush1.bf16.msra.mxu0 %v6028_v43  ;;  %4340 = vmatpush1.bf16.msra.mxu1 %v6156_v44  ;;  %v6133_v43 = vcombine.high %v1518_v9, %v1522_v10  ;;  %v1514_v44 = vld [vmem:[#allocation7 + $0xce0] sm:$0xff]  ;;  %v6093_v63 = vcombine.high %v1478_v51, %v1482_v52 }
 0x15c   :  { %4300 = vmatprep.subr.bf16.mxu0 %v6021_v61  ;;  %4341 = vmatprep.subr.bf16.mxu1 %v6149_v62  ;;  %v6125_v17 = vcombine.high %v1510_v57, %v1514_v44  ;;  %v6124_v28 = vcombine.low %v1510_v57, %v1514_v44  ;;  %v1610_v58 = vld [vmem:[#allocation7 + $0xfe0] sm:$0xff]  ;;  %v5972_v61 = vcombine.low %v1358_v41, %v1362_v42 }
 0x15d   :  { %v6100_v62 = vcombine.low %v1486_v45, %v1490_v46  ;;  %v6221_v0 = vcombine.high %v1606_v54, %v1610_v58  ;;  %v1462_v9 = vld [vmem:[#allocation7 + $0xb40] sm:$0xff]  ;;  %v253_v45 = vsub.s32 4, %v6715_v22 }
 0x15e   :  { %v1466_v10 = vld [vmem:[#allocation7 + $0xb60] sm:$0xff] }
 0x15f   :  { %4301 = vmatpush1.bf16.msra.mxu0 %v6020_v3  ;;  %4342 = vmatpush1.bf16.msra.mxu1 %v6148_v4  ;;  %v1598_v3 = vld [vmem:[#allocation7 + $0xf80] sm:$0xff]  ;;  %v6077_v12 = vcombine.high %v1462_v9, %v1466_v10 }
 0x160   :  { %4302 = vmatprep.subr.bf16.mxu0 %v6013_v5  ;;  %4343 = vmatprep.subr.bf16.mxu1 %v6141_v6  ;;  %v1602_v4 = vld [vmem:[#allocation7 + $0xfa0] sm:$0xff]  ;;  %v6092_v5 = vcombine.low %v1478_v51, %v1482_v52  ;;  %v6220_v6 = vcombine.low %v1606_v54, %v1610_v58  ;;  %v257_v52 = vsub.s32 5, %v6715_v22 }
 0x161   :  { %v6213_v8 = vcombine.high %v1598_v3, %v1602_v4  ;;  %v1454_v57 = vld [vmem:[#allocation7 + $0xb00] sm:$0xff] }
 0x162   :  { %v1458_v44 = vld [vmem:[#allocation7 + $0xb20] sm:$0xff] }
 0x163   :  { %4303 = vmatpush1.bf16.msra.mxu0 %v6012_v11  ;;  %4344 = vmatpush1.bf16.msra.mxu1 %v6140_v37  ;;  %v1590_v11 = vld [vmem:[#allocation7 + $0xf40] sm:$0xff]  ;;  %v6069_v18 = vcombine.high %v1454_v57, %v1458_v44 }
 0x164   :  { %4304 = vmatprep.subr.bf16.mxu0 %v6005_v38  ;;  %4345 = vmatprep.subr.bf16.mxu1 %v6133_v43  ;;  %v1594_v37 = vld [vmem:[#allocation7 + $0xf60] sm:$0xff]  ;;  %v6084_v38 = vcombine.low %v1470_v1, %v1474_v2  ;;  %v6212_v43 = vcombine.low %v1598_v3, %v1602_v4 }
 0x165   :  { %v6205_v39 = vcombine.high %v1590_v11, %v1594_v37  ;;  %v1446_v20 = vld [vmem:[#allocation7 + $0xac0] sm:$0xff] }
 0x166   :  { %v1450_v21 = vld [vmem:[#allocation7 + $0xae0] sm:$0xff] }
 0x167   :  { %4305 = vmatpush1.bf16.msra.mxu0 %v6004_v13  ;;  %4346 = vmatpush1.bf16.msra.mxu1 %v6132_v15  ;;  %v1582_v13 = vld [vmem:[#allocation7 + $0xf00] sm:$0xff]  ;;  %v6061_v31 = vcombine.high %v1446_v20, %v1450_v21 }
 0x168   :  { %4306 = vmatprep.subr.bf16.mxu0 %v5997_v16  ;;  %4347 = vmatprep.subr.bf16.mxu1 %v6125_v17  ;;  %v1586_v15 = vld [vmem:[#allocation7 + $0xf20] sm:$0xff]  ;;  %v6076_v16 = vcombine.low %v1462_v9, %v1466_v10  ;;  %v6204_v17 = vcombine.low %v1590_v11, %v1594_v37 }
 0x169   :  { %v6197_v19 = vcombine.high %v1582_v13, %v1586_v15  ;;  %v1438_v33 = vld [vmem:[#allocation7 + $0xa80] sm:$0xff] }
 0x16a   :  { %v1442_v34 = vld [vmem:[#allocation7 + $0xaa0] sm:$0xff] }
 0x16b   :  { %4307 = vmatpush1.bf16.msra.mxu0 %v5996_v27  ;;  %4348 = vmatpush1.bf16.msra.mxu1 %v6124_v28  ;;  %v1574_v27 = vld [vmem:[#allocation7 + $0xec0] sm:$0xff]  ;;  %v6053_v41 = vcombine.high %v1438_v33, %v1442_v34  ;;  %v6052_v51 = vcombine.low %v1438_v33, %v1442_v34  ;;  %v1151_v33 = vld [vmem:[#allocation7 + $0x188] sm:$0xff] }
 0x16c   :  { %4308 = vmatprep.subr.bf16.mxu0 %v5989_v29  ;;  %4349 = vmatprep.subr.bf16.mxu1 %v6117_v30  ;;  %v1578_v28 = vld [vmem:[#allocation7 + $0xee0] sm:$0xff]  ;;  %v6068_v29 = vcombine.low %v1454_v57, %v1458_v44  ;;  %v6196_v30 = vcombine.low %v1582_v13, %v1586_v15  ;;  %v1287_v44 = vld [vmem:[#allocation7 + $0x5c8] sm:$0xff] }
 0x16d   :  { %v6189_v32 = vcombine.high %v1574_v27, %v1578_v28  ;;  %v1430_v46 = vld [vmem:[#allocation7 + $0xa40] sm:$0xff]  ;;  %v1291_v13 = vld [vmem:[#allocation7 + $0x5e8] sm:$0xff] }
 0x16e   :  { %v1426_v1 = vld [vmem:[#allocation7 + $0xa20] sm:$0xff]  ;;  %v1155_v34 = vld [vmem:[#allocation7 + $0x1a8] sm:$0xff] }
 0x16f   :  { %4309 = vmatpush1.bf16.msra.mxu0 %v5988_v35  ;;  %4350 = vmatpush1.bf16.msra.mxu1 %v6116_v14  ;;  %v1566_v35 = vld [vmem:[#allocation7 + $0xe80] sm:$0xff] }
 0x170   :  { %4310 = vmatprep.subr.bf16.mxu0 %v5981_v36  ;;  %4351 = vmatprep.subr.bf16.mxu1 %v6109_v40  ;;  %v1570_v14 = vld [vmem:[#allocation7 + $0xea0] sm:$0xff]  ;;  %v6060_v36 = vcombine.low %v1446_v20, %v1450_v21  ;;  %v6188_v40 = vcombine.low %v1574_v27, %v1578_v28 }
 0x171   :  { %v6181_v42 = vcombine.high %v1566_v35, %v1570_v14  ;;  %v6180_v54 = vcombine.low %v1566_v35, %v1570_v14  ;;  %v1550_v3 = vld [vmem:[#allocation7 + $0xe00] sm:$0xff] }
 0x172   :  { %v1554_v4 = vld [vmem:[#allocation7 + $0xe20] sm:$0xff] }
 0x173   :  { %4311 = vmatpush1.bf16.msra.mxu0 %v5980_v47  ;;  %4352 = vmatpush1.bf16.msra.mxu1 %v6108_v48  ;;  %v1434_v47 = vld [vmem:[#allocation7 + $0xa60] sm:$0xff]  ;;  %v261_v48 = vsub.s32 6, %v6715_v22 }
 0x174   :  { %4312 = vmatprep.subr.bf16.mxu0 %v5973_v49  ;;  %4353 = vmatprep.subr.bf16.mxu1 %v6101_v50  ;;  %v1558_v49 = vld [vmem:[#allocation7 + $0xe40] sm:$0xff]  ;;  %v6045_v58 = vcombine.high %v1430_v46, %v1434_v47 }
 0x175   :  { %v1562_v50 = vld [vmem:[#allocation7 + $0xe60] sm:$0xff]  ;;  %v262_v2 = vrot.slane %v6718_v53, %v261_v48 }
 0x177   :  { %4313 = vmatpush1.bf16.msra.mxu0 %v5972_v61  ;;  %4354 = vmatpush1.bf16.msra.mxu1 %v6100_v62  ;;  %v265_v61 = vsub.s32 7, %v6715_v22  ;;  %v254_v62 = vrot.slane %v6718_v53, %v253_v45 }
 0x178   :  { %4314 = vmatprep.subr.bf16.mxu0 %v6093_v63  ;;  %4355 = vmatprep.subr.bf16.mxu1 %v6221_v0  ;;  %v6173_v63 = vcombine.high %v1558_v49, %v1562_v50  ;;  %v1422_v0 = vld [vmem:[#allocation7 + $0xa00] sm:$0xff] }
 0x179   :  { %v266_v9 = vrot.slane %v6718_v53, %v265_v61  ;;  %v6037_v10 = vcombine.high %v1422_v0, %v1426_v1 }
 0x17b   :  { %4315 = vmatpush2.bf16.msra.mxu0 %v6092_v5  ;;  %4356 = vmatpush2.bf16.msra.mxu1 %v6220_v6  ;;  %v6044_v5 = vcombine.low %v1430_v46, %v1434_v47  ;;  %v258_v6 = vrot.slane %v6718_v53, %v257_v52 }
 0x17c   :  { %4316 = vmatprep.subr.bf16.mxu0 %v6085_v7  ;;  %4357 = vmatprep.subr.bf16.mxu1 %v6213_v8  ;;  %v6172_v8 = vcombine.low %v1558_v49, %v1562_v50  ;;  %v5902_v49 = vcombine.low %v1287_v44, %v1291_v13  ;;  %v5767_v50 = vcombine.high %v1151_v33, %v1155_v34 }
 0x17f   :  { %4317 = vmatpush2.bf16.msra.mxu0 %v6084_v38  ;;  %4358 = vmatpush2.bf16.msra.mxu1 %v6212_v43  ;;  %v6165_v38 = vcombine.high %v1550_v3, %v1554_v4  ;;  %v1159_v43 = vld [vmem:[#allocation7 + $0x1c8] sm:$0xff] }
 0x180   :  { %4318 = vmatprep.subr.bf16.mxu0 %v6077_v12  ;;  %4359 = vmatprep.subr.bf16.mxu1 %v6205_v39  ;;  %v1163_v12 = vld [vmem:[#allocation7 + $0x1e8] sm:$0xff] }
 0x181   :  { %v5775_v27 = vcombine.high %v1159_v43, %v1163_v12 }
 0x183   :  { %4319 = vmatpush2.bf16.msra.mxu0 %v6076_v16  ;;  %4360 = vmatpush2.bf16.msra.mxu1 %v6204_v17  ;;  %v6036_v17 = vcombine.low %v1422_v0, %v1426_v1  ;;  %v5766_v0 = vcombine.low %v1151_v33, %v1155_v34 }
 0x184   :  { %4320 = vmatprep.subr.bf16.mxu0 %v6069_v18  ;;  %4361 = vmatprep.subr.bf16.mxu1 %v6197_v19  ;;  %v6164_v18 = vcombine.low %v1550_v3, %v1554_v4  ;;  %v1135_v4 = vld [vmem:[#allocation7 + $0x108] sm:$0xff] }
 0x187   :  { %4321 = vmatpush2.bf16.msra.mxu0 %v6068_v29  ;;  %4362 = vmatpush2.bf16.msra.mxu1 %v6196_v30  ;;  %v5903_v30 = vcombine.high %v1287_v44, %v1291_v13 }
 0x188   :  { %4322 = vmatprep.subr.bf16.mxu0 %v6061_v31  ;;  %4363 = vmatprep.subr.bf16.mxu1 %v6189_v32 }
 0x18b   :  { %4323 = vmatpush2.bf16.msra.mxu0 %v6060_v36  ;;  %4364 = vmatpush2.bf16.msra.mxu1 %v6188_v40  ;;  %v5774_v40 = vcombine.low %v1159_v43, %v1163_v12  ;;  %v1255_v43 = vld [vmem:[#allocation7 + $0x4c8] sm:$0xff] }
 0x18c   :  { %4324 = vmatprep.subr.bf16.mxu0 %v6053_v41  ;;  %4365 = vmatprep.subr.bf16.mxu1 %v6181_v42  ;;  %v1279_v41 = vld [vmem:[#allocation7 + $0x588] sm:$0xff] }
 0x18d   :  { %v1283_v42 = vld [vmem:[#allocation7 + $0x5a8] sm:$0xff] }
 0x18e   :  { %v5894_v1 = vcombine.low %v1279_v41, %v1283_v42  ;;  %v1259_v12 = vld [vmem:[#allocation7 + $0x4e8] sm:$0xff] }
 0x18f   :  { %4325 = vmatpush2.bf16.msra.mxu0 %v6052_v51  ;;  %4366 = vmatpush2.bf16.msra.mxu1 %v6180_v54  ;;  %v1143_v51 = vld [vmem:[#allocation7 + $0x148] sm:$0xff]  ;;  %v5871_v13 = vcombine.high %v1255_v43, %v1259_v12 }
 0x190   :  { %v1038_v7 = vpop.f32.mrf.mxu0  ;;  %4326 = vmatprep.subr.bf16.mxu0 %v6045_v58  ;;  %v1079_v37 = vpop.f32.mrf.mxu1  ;;  %4367 = vmatprep.subr.bf16.mxu1 %v6173_v63  ;;  %v1147_v54 = vld [vmem:[#allocation7 + $0x168] sm:$0xff]  ;;  %v5895_v58 = vcombine.high %v1279_v41, %v1283_v42 }
 0x191   :  { %v1039_v11 = vadd.f32 %v1038_v7, %v254_v62  ;;  %v1080_v39 = vadd.f32 %v1079_v37, %v262_v2  ;;  %v1271_v62 = vld [vmem:[#allocation7 + $0x548] sm:$0xff]  ;;  %v5759_v2 = vcombine.high %v1143_v51, %v1147_v54 }
 0x192   :  { %v1040_v57 = vpop.f32.mrf.mxu0  ;;  %v1081_v16 = vpop.f32.mrf.mxu1  ;;  %v1275_v63 = vld [vmem:[#allocation7 + $0x568] sm:$0xff] }
 0x193   :  { %v1041_v15 = vadd.f32 %v1040_v57, %v258_v6  ;;  %4327 = vmatpush2.bf16.msra.mxu0 %v6044_v5  ;;  %v1090_v19 = vmax.f32 %v1039_v11, 0.0  ;;  %v1092_v20 = vmax.f32 %v1080_v39, 0.0  ;;  %v1082_v21 = vadd.f32 %v1081_v16, %v266_v9  ;;  %4368 = vmatpush2.bf16.msra.mxu1 %v6172_v8  ;;  %v1139_v5 = vld [vmem:[#allocation7 + $0x128] sm:$0xff] }
 0x194   :  { %v1042_v53 = vpop.f32.mrf.mxu0  ;;  %4328 = vmatprep.subr.bf16.mxu0 %v6037_v10  ;;  %v1083_v29 = vpop.f32.mrf.mxu1  ;;  %4369 = vmatprep.subr.bf16.mxu1 %v6165_v38  ;;  %v5887_v3 = vcombine.high %v1271_v62, %v1275_v63  ;;  %v1263_v6 = vld [vmem:[#allocation7 + $0x508] sm:$0xff]  ;;  %v5758_v8 = vcombine.low %v1143_v51, %v1147_v54  ;;  %v5886_v9 = vcombine.low %v1271_v62, %v1275_v63 }
 0x195   :  { %v1091_v28 = vmax.f32 %v1041_v15, 0.0  ;;  %v1093_v31 = vmax.f32 %v1082_v21, 0.0  ;;  %v6769_v35 = vpack.c.bf16 %v1092_v20, %v1092_v20  ;;  %v6773_v46 = vpack.c.bf16 %v1090_v19, %v1090_v19  ;;  %v1267_v7 = vld [vmem:[#allocation7 + $0x528] sm:$0xff] }
 0x196   :  { %v1043_v32 = vpop.f32.mrf.mxu0  ;;  %v1084_v36 = vpop.f32.mrf.mxu1  ;;  %v5751_v10 = vcombine.high %v1135_v4, %v1139_v5  ;;  %v5879_v11 = vcombine.high %v1263_v6, %v1267_v7  ;;  %v1127_v37 = vld [vmem:[#allocation7 + $0xc8] sm:$0xff]  ;;  %v5750_v39 = vcombine.low %v1135_v4, %v1139_v5  ;;  %v5878_v57 = vcombine.low %v1263_v6, %v1267_v7 }
 0x197   :  { %v6771_v14 = vpack.c.bf16 %v1091_v28, %v1091_v28  ;;  %4329 = vmatpush2.bf16.msra.mxu0 %v6036_v17  ;;  %v6775_v47 = vpack.c.bf16 %v1093_v31, %v1093_v31  ;;  %4370 = vmatpush2.bf16.msra.mxu1 %v6164_v18  ;;  %v1131_v38 = vld [vmem:[#allocation7 + $0xe8] sm:$0xff]  ;;  %v5870_v20 = vcombine.low %v1255_v43, %v1259_v12 }
 0x198   :  { %4380 = vmatprep.subr.bf16.mxu0 %v5775_v27  ;;  %4421 = vmatprep.subr.bf16.mxu1 %v5903_v30  ;;  %v5743_v44 = vcombine.high %v1127_v37, %v1131_v38  ;;  %v1119_v15 = vld [vmem:[#allocation7 + $0x88] sm:$0xff]  ;;  %v5742_v19 = vcombine.low %v1127_v37, %v1131_v38 }
 0x199   :  { %4330 = vmatprep.mubr.bf16.mxu0 %v6771_v14  ;;  %4371 = vmatprep.mubr.bf16.mxu1 %v6775_v47  ;;  %v1123_v16 = vld [vmem:[#allocation7 + $0xa8] sm:$0xff] }
 0x19a   :  { %4331 = vmatmul.mubr.bf16.vlgmr.msra.gmra.mxu0 %v6773_v46  ;;  %4372 = vmatmul.mubr.bf16.vlgmr.msra.gmra.mxu1 %v6769_v35  ;;  %v1247_v17 = vld [vmem:[#allocation7 + $0x488] sm:$0xff]  ;;  %v5735_v21 = vcombine.high %v1119_v15, %v1123_v16  ;;  %v5734_v31 = vcombine.low %v1119_v15, %v1123_v16 }
 0x19b   :  { %4381 = vmatpush1.bf16.msra.mxu0 %v5774_v40  ;;  %4422 = vmatpush1.bf16.msra.mxu1 %v5902_v49  ;;  %v1251_v18 = vld [vmem:[#allocation7 + $0x4a8] sm:$0xff] }
 0x19c   :  { %4412 = vmatprep.mubr.bf16.mxu0 %v6737_v56  ;;  %4453 = vmatprep.mubr.bf16.mxu1 %v6741_v60  ;;  %v5863_v53 = vcombine.high %v1247_v17, %v1251_v18  ;;  %v1111_v27 = vld [vmem:[#allocation7 + $0x48] sm:$0xff]  ;;  %v5862_v32 = vcombine.low %v1247_v17, %v1251_v18 }
 0x19d   :  { %4382 = vmatprep.subr.bf16.mxu0 %v5767_v50  ;;  %4423 = vmatprep.subr.bf16.mxu1 %v5895_v58  ;;  %v1115_v28 = vld [vmem:[#allocation7 + $0x68] sm:$0xff] }
 0x19e   :  { %v1239_v29 = vld [vmem:[#allocation7 + $0x448] sm:$0xff]  ;;  %v5727_v33 = vcombine.high %v1111_v27, %v1115_v28  ;;  %v5726_v49 = vcombine.low %v1111_v27, %v1115_v28 }
 0x19f   :  { %4383 = vmatpush1.bf16.msra.mxu0 %v5766_v0  ;;  %4424 = vmatpush1.bf16.msra.mxu1 %v5894_v1  ;;  %v1243_v30 = vld [vmem:[#allocation7 + $0x468] sm:$0xff] }
 0x1a0   :  { %4384 = vmatprep.subr.bf16.mxu0 %v5759_v2  ;;  %4425 = vmatprep.subr.bf16.mxu1 %v5887_v3  ;;  %v5855_v34 = vcombine.high %v1239_v29, %v1243_v30  ;;  %v1103_v36 = vld [vmem:[#allocation7 + $0x8] sm:$0xff]  ;;  %v5854_v50 = vcombine.low %v1239_v29, %v1243_v30 }
 0x1a1   :  { %v1107_v40 = vld [vmem:[#allocation7 + $0x28] sm:$0xff] }
 0x1a2   :  { %v1231_v41 = vld [vmem:[#allocation7 + $0x408] sm:$0xff]  ;;  %v5719_v51 = vcombine.high %v1103_v36, %v1107_v40  ;;  %v5718_v1 = vcombine.low %v1103_v36, %v1107_v40 }
 0x1a3   :  { %4385 = vmatpush1.bf16.msra.mxu0 %v5758_v8  ;;  %4426 = vmatpush1.bf16.msra.mxu1 %v5886_v9  ;;  %v1235_v42 = vld [vmem:[#allocation7 + $0x428] sm:$0xff] }
 0x1a4   :  { %4386 = vmatprep.subr.bf16.mxu0 %v5751_v10  ;;  %4427 = vmatprep.subr.bf16.mxu1 %v5879_v11  ;;  %v5847_v54 = vcombine.high %v1231_v41, %v1235_v42  ;;  %v1223_v58 = vld [vmem:[#allocation7 + $0x3c8] sm:$0xff]  ;;  %v5846_v2 = vcombine.low %v1231_v41, %v1235_v42 }
 0x1a5   :  { %v1227_v62 = vld [vmem:[#allocation7 + $0x3e8] sm:$0xff] }
 0x1a6   :  { %v1351_v63 = vld [vmem:[#allocation7 + $0x7c8] sm:$0xff]  ;;  %v5839_v3 = vcombine.high %v1223_v58, %v1227_v62  ;;  %v5838_v9 = vcombine.low %v1223_v58, %v1227_v62 }
 0x1a7   :  { %4387 = vmatpush1.bf16.msra.mxu0 %v5750_v39  ;;  %4428 = vmatpush1.bf16.msra.mxu1 %v5878_v57  ;;  %v1355_v0 = vld [vmem:[#allocation7 + $0x7e8] sm:$0xff] }
 0x1a8   :  { %4388 = vmatprep.subr.bf16.mxu0 %v5743_v44  ;;  %4429 = vmatprep.subr.bf16.mxu1 %v5871_v13  ;;  %v5967_v4 = vcombine.high %v1351_v63, %v1355_v0  ;;  %v1215_v5 = vld [vmem:[#allocation7 + $0x388] sm:$0xff]  ;;  %v5966_v10 = vcombine.low %v1351_v63, %v1355_v0 }
 0x1a9   :  { %v1219_v6 = vld [vmem:[#allocation7 + $0x3a8] sm:$0xff] }
 0x1aa   :  { %v1343_v7 = vld [vmem:[#allocation7 + $0x788] sm:$0xff]  ;;  %v5831_v11 = vcombine.high %v1215_v5, %v1219_v6  ;;  %v5830_v57 = vcombine.low %v1215_v5, %v1219_v6 }
 0x1ab   :  { %4389 = vmatpush1.bf16.msra.mxu0 %v5742_v19  ;;  %4430 = vmatpush1.bf16.msra.mxu1 %v5870_v20  ;;  %v1347_v8 = vld [vmem:[#allocation7 + $0x7a8] sm:$0xff] }
 0x1ac   :  { %4390 = vmatprep.subr.bf16.mxu0 %v5735_v21  ;;  %4431 = vmatprep.subr.bf16.mxu1 %v5863_v53  ;;  %v5959_v37 = vcombine.high %v1343_v7, %v1347_v8  ;;  %v1207_v38 = vld [vmem:[#allocation7 + $0x348] sm:$0xff]  ;;  %v5958_v44 = vcombine.low %v1343_v7, %v1347_v8 }
 0x1ad   :  { %v1211_v43 = vld [vmem:[#allocation7 + $0x368] sm:$0xff] }
 0x1ae   :  { %v1335_v12 = vld [vmem:[#allocation7 + $0x748] sm:$0xff]  ;;  %v5823_v13 = vcombine.high %v1207_v38, %v1211_v43  ;;  %v5822_v20 = vcombine.low %v1207_v38, %v1211_v43 }
 0x1af   :  { %4391 = vmatpush1.bf16.msra.mxu0 %v5734_v31  ;;  %4432 = vmatpush1.bf16.msra.mxu1 %v5862_v32  ;;  %v1339_v39 = vld [vmem:[#allocation7 + $0x768] sm:$0xff] }
 0x1b0   :  { %4392 = vmatprep.subr.bf16.mxu0 %v5727_v33  ;;  %4433 = vmatprep.subr.bf16.mxu1 %v5855_v34  ;;  %v5951_v15 = vcombine.high %v1335_v12, %v1339_v39  ;;  %v1199_v16 = vld [vmem:[#allocation7 + $0x308] sm:$0xff]  ;;  %v5950_v21 = vcombine.low %v1335_v12, %v1339_v39 }
 0x1b1   :  { %v1203_v17 = vld [vmem:[#allocation7 + $0x328] sm:$0xff] }
 0x1b2   :  { %v1327_v18 = vld [vmem:[#allocation7 + $0x708] sm:$0xff]  ;;  %v5815_v53 = vcombine.high %v1199_v16, %v1203_v17  ;;  %v5814_v32 = vcombine.low %v1199_v16, %v1203_v17 }
 0x1b3   :  { %4393 = vmatpush1.bf16.msra.mxu0 %v5726_v49  ;;  %4434 = vmatpush1.bf16.msra.mxu1 %v5854_v50  ;;  %v1331_v19 = vld [vmem:[#allocation7 + $0x728] sm:$0xff] }
 0x1b4   :  { %4394 = vmatprep.subr.bf16.mxu0 %v5719_v51  ;;  %4435 = vmatprep.subr.bf16.mxu1 %v5847_v54  ;;  %v5943_v27 = vcombine.high %v1327_v18, %v1331_v19  ;;  %v1191_v28 = vld [vmem:[#allocation7 + $0x2c8] sm:$0xff]  ;;  %v5942_v33 = vcombine.low %v1327_v18, %v1331_v19 }
 0x1b5   :  { %v1195_v29 = vld [vmem:[#allocation7 + $0x2e8] sm:$0xff] }
 0x1b6   :  { %v1319_v30 = vld [vmem:[#allocation7 + $0x6c8] sm:$0xff]  ;;  %v5807_v34 = vcombine.high %v1191_v28, %v1195_v29  ;;  %v5806_v50 = vcombine.low %v1191_v28, %v1195_v29 }
 0x1b7   :  { %4395 = vmatpush1.bf16.msra.mxu0 %v5718_v1  ;;  %4436 = vmatpush1.bf16.msra.mxu1 %v5846_v2  ;;  %v1323_v31 = vld [vmem:[#allocation7 + $0x6e8] sm:$0xff] }
 0x1b8   :  { %4396 = vmatprep.subr.bf16.mxu0 %v5839_v3  ;;  %4437 = vmatprep.subr.bf16.mxu1 %v5967_v4  ;;  %v5935_v36 = vcombine.high %v1319_v30, %v1323_v31  ;;  %v1183_v40 = vld [vmem:[#allocation7 + $0x288] sm:$0xff]  ;;  %v5934_v51 = vcombine.low %v1319_v30, %v1323_v31 }
 0x1b9   :  { %v1187_v41 = vld [vmem:[#allocation7 + $0x2a8] sm:$0xff] }
 0x1ba   :  { %v1311_v42 = vld [vmem:[#allocation7 + $0x688] sm:$0xff]  ;;  %v5799_v54 = vcombine.high %v1183_v40, %v1187_v41  ;;  %v5798_v2 = vcombine.low %v1183_v40, %v1187_v41 }
 0x1bb   :  { %4397 = vmatpush2.bf16.msra.mxu0 %v5838_v9  ;;  %4438 = vmatpush2.bf16.msra.mxu1 %v5966_v10  ;;  %v1315_v49 = vld [vmem:[#allocation7 + $0x6a8] sm:$0xff] }
 0x1bc   :  { %4398 = vmatprep.subr.bf16.mxu0 %v5831_v11  ;;  %4439 = vmatprep.subr.bf16.mxu1 %v5959_v37  ;;  %v5927_v58 = vcombine.high %v1311_v42, %v1315_v49  ;;  %v1175_v62 = vld [vmem:[#allocation7 + $0x248] sm:$0xff]  ;;  %v5926_v3 = vcombine.low %v1311_v42, %v1315_v49 }
 0x1bd   :  { %v1179_v63 = vld [vmem:[#allocation7 + $0x268] sm:$0xff] }
 0x1be   :  { %v1303_v0 = vld [vmem:[#allocation7 + $0x648] sm:$0xff]  ;;  %v5791_v4 = vcombine.high %v1175_v62, %v1179_v63  ;;  %v5790_v10 = vcombine.low %v1175_v62, %v1179_v63 }
 0x1bf   :  { %4399 = vmatpush2.bf16.msra.mxu0 %v5830_v57  ;;  %4440 = vmatpush2.bf16.msra.mxu1 %v5958_v44  ;;  %v1307_v1 = vld [vmem:[#allocation7 + $0x668] sm:$0xff] }
 0x1c0   :  { %4400 = vmatprep.subr.bf16.mxu0 %v5823_v13  ;;  %4441 = vmatprep.subr.bf16.mxu1 %v5951_v15  ;;  %v5919_v5 = vcombine.high %v1303_v0, %v1307_v1  ;;  %v1167_v6 = vld [vmem:[#allocation7 + $0x208] sm:$0xff]  ;;  %v5918_v11 = vcombine.low %v1303_v0, %v1307_v1 }
 0x1c1   :  { %v1171_v7 = vld [vmem:[#allocation7 + $0x228] sm:$0xff] }
 0x1c2   :  { %v1295_v8 = vld [vmem:[#allocation7 + $0x608] sm:$0xff]  ;;  %v5783_v37 = vcombine.high %v1167_v6, %v1171_v7  ;;  %v5782_v44 = vcombine.low %v1167_v6, %v1171_v7 }
 0x1c3   :  { %4401 = vmatpush2.bf16.msra.mxu0 %v5822_v20  ;;  %4442 = vmatpush2.bf16.msra.mxu1 %v5950_v21  ;;  %v1299_v9 = vld [vmem:[#allocation7 + $0x628] sm:$0xff] }
 0x1c4   :  { %4402 = vmatprep.subr.bf16.mxu0 %v5815_v53  ;;  %4443 = vmatprep.subr.bf16.mxu1 %v5943_v27  ;;  %v5911_v38 = vcombine.high %v1295_v8, %v1299_v9  ;;  %v1415_v43 = vld [vmem:[#allocation7 + $0x9c8] sm:$0xff]  ;;  %v5910_v13 = vcombine.low %v1295_v8, %v1299_v9 }
 0x1c5   :  { %v1419_v12 = vld [vmem:[#allocation7 + $0x9e8] sm:$0xff] }
 0x1c6   :  { %v1543_v39 = vld [vmem:[#allocation7 + $0xdc8] sm:$0xff]  ;;  %v6031_v15 = vcombine.high %v1415_v43, %v1419_v12  ;;  %v6030_v19 = vcombine.low %v1415_v43, %v1419_v12 }
 0x1c7   :  { %4403 = vmatpush2.bf16.msra.mxu0 %v5814_v32  ;;  %4444 = vmatpush2.bf16.msra.mxu1 %v5942_v33  ;;  %v1547_v57 = vld [vmem:[#allocation7 + $0xde8] sm:$0xff] }
 0x1c8   :  { %4404 = vmatprep.subr.bf16.mxu0 %v5807_v34  ;;  %4445 = vmatprep.subr.bf16.mxu1 %v5935_v36  ;;  %v6159_v16 = vcombine.high %v1543_v39, %v1547_v57  ;;  %v1407_v17 = vld [vmem:[#allocation7 + $0x988] sm:$0xff]  ;;  %v6158_v53 = vcombine.low %v1543_v39, %v1547_v57 }
 0x1c9   :  { %v1411_v18 = vld [vmem:[#allocation7 + $0x9a8] sm:$0xff] }
 0x1ca   :  { %v1535_v20 = vld [vmem:[#allocation7 + $0xd88] sm:$0xff]  ;;  %v6023_v27 = vcombine.high %v1407_v17, %v1411_v18  ;;  %v6022_v33 = vcombine.low %v1407_v17, %v1411_v18 }
 0x1cb   :  { %4405 = vmatpush2.bf16.msra.mxu0 %v5806_v50  ;;  %4446 = vmatpush2.bf16.msra.mxu1 %v5934_v51  ;;  %v1539_v21 = vld [vmem:[#allocation7 + $0xda8] sm:$0xff] }
 0x1cc   :  { %4406 = vmatprep.subr.bf16.mxu0 %v5799_v54  ;;  %4447 = vmatprep.subr.bf16.mxu1 %v5927_v58  ;;  %v1399_v28 = vld [vmem:[#allocation7 + $0x948] sm:$0xff]  ;;  %v6151_v30 = vcombine.high %v1535_v20, %v1539_v21  ;;  %v6150_v34 = vcombine.low %v1535_v20, %v1539_v21 }
 0x1cd   :  { %v1403_v29 = vld [vmem:[#allocation7 + $0x968] sm:$0xff] }
 0x1ce   :  { %v1527_v31 = vld [vmem:[#allocation7 + $0xd48] sm:$0xff]  ;;  %v6015_v36 = vcombine.high %v1399_v28, %v1403_v29  ;;  %v6014_v51 = vcombine.low %v1399_v28, %v1403_v29 }
 0x1cf   :  { %4407 = vmatpush2.bf16.msra.mxu0 %v5798_v2  ;;  %4448 = vmatpush2.bf16.msra.mxu1 %v5926_v3  ;;  %v1531_v32 = vld [vmem:[#allocation7 + $0xd68] sm:$0xff] }
 0x1d0   :  { %4408 = vmatprep.subr.bf16.mxu0 %v5791_v4  ;;  %4449 = vmatprep.subr.bf16.mxu1 %v5919_v5  ;;  %v6143_v40 = vcombine.high %v1527_v31, %v1531_v32  ;;  %v1391_v41 = vld [vmem:[#allocation7 + $0x908] sm:$0xff]  ;;  %v6142_v54 = vcombine.low %v1527_v31, %v1531_v32 }
 0x1d1   :  { %v1395_v42 = vld [vmem:[#allocation7 + $0x928] sm:$0xff] }
 0x1d2   :  { %v1519_v49 = vld [vmem:[#allocation7 + $0xd08] sm:$0xff]  ;;  %v6007_v58 = vcombine.high %v1391_v41, %v1395_v42  ;;  %v6006_v3 = vcombine.low %v1391_v41, %v1395_v42 }
 0x1d3   :  { %4409 = vmatpush2.bf16.msra.mxu0 %v5790_v10  ;;  %4450 = vmatpush2.bf16.msra.mxu1 %v5918_v11  ;;  %v1523_v50 = vld [vmem:[#allocation7 + $0xd28] sm:$0xff] }
 0x1d4   :  { %4410 = vmatprep.subr.bf16.mxu0 %v5783_v37  ;;  %4451 = vmatprep.subr.bf16.mxu1 %v5911_v38  ;;  %v6135_v62 = vcombine.high %v1519_v49, %v1523_v50  ;;  %v1383_v63 = vld [vmem:[#allocation7 + $0x8c8] sm:$0xff]  ;;  %v6134_v4 = vcombine.low %v1519_v49, %v1523_v50 }
 0x1d5   :  { %v1387_v0 = vld [vmem:[#allocation7 + $0x8e8] sm:$0xff] }
 0x1d6   :  { %v1511_v1 = vld [vmem:[#allocation7 + $0xcc8] sm:$0xff]  ;;  %v5999_v5 = vcombine.high %v1383_v63, %v1387_v0  ;;  %v5998_v11 = vcombine.low %v1383_v63, %v1387_v0 }
 0x1d7   :  { %4411 = vmatpush2.bf16.msra.mxu0 %v5782_v44  ;;  %4452 = vmatpush2.bf16.msra.mxu1 %v5910_v13  ;;  %v1515_v2 = vld [vmem:[#allocation7 + $0xce8] sm:$0xff] }
 0x1d8   :  { %4462 = vmatprep.subr.bf16.mxu0 %v6031_v15  ;;  %4503 = vmatprep.subr.bf16.mxu1 %v6159_v16  ;;  %v6127_v6 = vcombine.high %v1511_v1, %v1515_v2  ;;  %v1375_v7 = vld [vmem:[#allocation7 + $0x888] sm:$0xff]  ;;  %v6126_v37 = vcombine.low %v1511_v1, %v1515_v2 }
 0x1d9   :  { %v1379_v8 = vld [vmem:[#allocation7 + $0x8a8] sm:$0xff] }
 0x1da   :  { %4413 = vmatmul.mubr.bf16.vlgmr.msra.gmra.mxu0 %v6739_v59  ;;  %4454 = vmatmul.mubr.bf16.vlgmr.msra.gmra.mxu1 %v6735_v55  ;;  %v1503_v9 = vld [vmem:[#allocation7 + $0xc88] sm:$0xff]  ;;  %v5991_v38 = vcombine.high %v1375_v7, %v1379_v8  ;;  %v5990_v13 = vcombine.low %v1375_v7, %v1379_v8 }
 0x1db   :  { %4463 = vmatpush1.bf16.msra.mxu0 %v6030_v19  ;;  %4494 = vmatprep.mubr.bf16.mxu0 %v6771_v14  ;;  %v1507_v10 = vld [vmem:[#allocation7 + $0xca8] sm:$0xff] }
 0x1dc   :  { %4504 = vmatpush1.bf16.msra.mxu1 %v6158_v53  ;;  %4535 = vmatprep.mubr.bf16.mxu1 %v6775_v47  ;;  %v6119_v43 = vcombine.high %v1503_v9, %v1507_v10  ;;  %v1367_v12 = vld [vmem:[#allocation7 + $0x848] sm:$0xff]  ;;  %v6118_v15 = vcombine.low %v1503_v9, %v1507_v10 }
 0x1dd   :  { %4464 = vmatprep.subr.bf16.mxu0 %v6023_v27  ;;  %4505 = vmatprep.subr.bf16.mxu1 %v6151_v30  ;;  %v1371_v39 = vld [vmem:[#allocation7 + $0x868] sm:$0xff] }
 0x1de   :  { %v1495_v57 = vld [vmem:[#allocation7 + $0xc48] sm:$0xff]  ;;  %v5983_v16 = vcombine.high %v1367_v12, %v1371_v39  ;;  %v5982_v53 = vcombine.low %v1367_v12, %v1371_v39 }
 0x1df   :  { %4465 = vmatpush1.bf16.msra.mxu0 %v6022_v33  ;;  %v1499_v44 = vld [vmem:[#allocation7 + $0xc68] sm:$0xff] }
 0x1e0   :  { %4506 = vmatpush1.bf16.msra.mxu1 %v6150_v34  ;;  %4466 = vmatprep.subr.bf16.mxu0 %v6015_v36  ;;  %v6111_v17 = vcombine.high %v1495_v57, %v1499_v44  ;;  %v1359_v18 = vld [vmem:[#allocation7 + $0x808] sm:$0xff]  ;;  %v6110_v27 = vcombine.low %v1495_v57, %v1499_v44 }
 0x1e1   :  { %4507 = vmatprep.subr.bf16.mxu1 %v6143_v40  ;;  %v1363_v19 = vld [vmem:[#allocation7 + $0x828] sm:$0xff] }
 0x1e2   :  { %v1487_v20 = vld [vmem:[#allocation7 + $0xc08] sm:$0xff]  ;;  %v5975_v28 = vcombine.high %v1359_v18, %v1363_v19  ;;  %v5974_v34 = vcombine.low %v1359_v18, %v1363_v19 }
 0x1e3   :  { %4467 = vmatpush1.bf16.msra.mxu0 %v6014_v51  ;;  %v1491_v21 = vld [vmem:[#allocation7 + $0xc28] sm:$0xff] }
 0x1e4   :  { %4508 = vmatpush1.bf16.msra.mxu1 %v6142_v54  ;;  %4468 = vmatprep.subr.bf16.mxu0 %v6007_v58  ;;  %v6103_v29 = vcombine.high %v1487_v20, %v1491_v21  ;;  %v1479_v30 = vld [vmem:[#allocation7 + $0xbc8] sm:$0xff]  ;;  %v6102_v36 = vcombine.low %v1487_v20, %v1491_v21 }
 0x1e5   :  { %4509 = vmatprep.subr.bf16.mxu1 %v6135_v62  ;;  %v1483_v31 = vld [vmem:[#allocation7 + $0xbe8] sm:$0xff] }
 0x1e6   :  { %v1607_v32 = vld [vmem:[#allocation7 + $0xfc8] sm:$0xff]  ;;  %v6095_v40 = vcombine.high %v1479_v30, %v1483_v31  ;;  %v6094_v54 = vcombine.low %v1479_v30, %v1483_v31 }
 0x1e7   :  { %4469 = vmatpush1.bf16.msra.mxu0 %v6006_v3  ;;  %v1611_v33 = vld [vmem:[#allocation7 + $0xfe8] sm:$0xff] }
 0x1e8   :  { %4510 = vmatpush1.bf16.msra.mxu1 %v6134_v4  ;;  %4470 = vmatprep.subr.bf16.mxu0 %v5999_v5  ;;  %v6223_v41 = vcombine.high %v1607_v32, %v1611_v33  ;;  %v1471_v42 = vld [vmem:[#allocation7 + $0xb88] sm:$0xff]  ;;  %v6222_v58 = vcombine.low %v1607_v32, %v1611_v33 }
 0x1e9   :  { %4511 = vmatprep.subr.bf16.mxu1 %v6127_v6  ;;  %v1475_v49 = vld [vmem:[#allocation7 + $0xba8] sm:$0xff] }
 0x1ea   :  { %v1599_v50 = vld [vmem:[#allocation7 + $0xf88] sm:$0xff]  ;;  %v6087_v62 = vcombine.high %v1471_v42, %v1475_v49  ;;  %v6086_v4 = vcombine.low %v1471_v42, %v1475_v49 }
 0x1eb   :  { %4471 = vmatpush1.bf16.msra.mxu0 %v5998_v11  ;;  %v1603_v51 = vld [vmem:[#allocation7 + $0xfa8] sm:$0xff] }
 0x1ec   :  { %4512 = vmatpush1.bf16.msra.mxu1 %v6126_v37  ;;  %4472 = vmatprep.subr.bf16.mxu0 %v5991_v38  ;;  %v6215_v63 = vcombine.high %v1599_v50, %v1603_v51  ;;  %v1463_v0 = vld [vmem:[#allocation7 + $0xb48] sm:$0xff]  ;;  %v6214_v5 = vcombine.low %v1599_v50, %v1603_v51 }
 0x1ed   :  { %4513 = vmatprep.subr.bf16.mxu1 %v6119_v43  ;;  %v1467_v1 = vld [vmem:[#allocation7 + $0xb68] sm:$0xff] }
 0x1ee   :  { %v1591_v2 = vld [vmem:[#allocation7 + $0xf48] sm:$0xff]  ;;  %v6079_v6 = vcombine.high %v1463_v0, %v1467_v1  ;;  %v6078_v37 = vcombine.low %v1463_v0, %v1467_v1  ;;  %v1160_v1 = vld [vmem:[#allocation7 + $0x1d0] sm:$0xff] }
 0x1ef   :  { %4473 = vmatpush1.bf16.msra.mxu0 %v5990_v13  ;;  %v1595_v3 = vld [vmem:[#allocation7 + $0xf68] sm:$0xff] }
 0x1f0   :  { %4514 = vmatpush1.bf16.msra.mxu1 %v6118_v15  ;;  %4474 = vmatprep.subr.bf16.mxu0 %v5983_v16  ;;  %v6207_v7 = vcombine.high %v1591_v2, %v1595_v3  ;;  %v1455_v8 = vld [vmem:[#allocation7 + $0xb08] sm:$0xff]  ;;  %v6206_v38 = vcombine.low %v1591_v2, %v1595_v3  ;;  %v1164_v2 = vld [vmem:[#allocation7 + $0x1f0] sm:$0xff] }
 0x1f1   :  { %4515 = vmatprep.subr.bf16.mxu1 %v6111_v17  ;;  %v1459_v9 = vld [vmem:[#allocation7 + $0xb28] sm:$0xff]  ;;  %v1288_v3 = vld [vmem:[#allocation7 + $0x5d0] sm:$0xff] }
 0x1f2   :  { %v1583_v10 = vld [vmem:[#allocation7 + $0xf08] sm:$0xff]  ;;  %v6071_v43 = vcombine.high %v1455_v8, %v1459_v9  ;;  %v6070_v15 = vcombine.low %v1455_v8, %v1459_v9  ;;  %v6787_v8 = vld [vmem:[#allocation8] sm:$0xff] }
 0x1f3   :  { %4475 = vmatpush1.bf16.msra.mxu0 %v5982_v53  ;;  %v1587_v11 = vld [vmem:[#allocation7 + $0xf28] sm:$0xff] }
 0x1f4   :  { %4516 = vmatpush1.bf16.msra.mxu1 %v6110_v27  ;;  %4476 = vmatprep.subr.bf16.mxu0 %v5975_v28  ;;  %v6199_v12 = vcombine.high %v1583_v10, %v1587_v11  ;;  %v1447_v39 = vld [vmem:[#allocation7 + $0xac8] sm:$0xff]  ;;  %v6198_v16 = vcombine.low %v1583_v10, %v1587_v11  ;;  %v1152_v10 = vld [vmem:[#allocation7 + $0x190] sm:$0xff] }
 0x1f5   :  { %4517 = vmatprep.subr.bf16.mxu1 %v6103_v29  ;;  %v1451_v57 = vld [vmem:[#allocation7 + $0xae8] sm:$0xff]  ;;  %v1156_v11 = vld [vmem:[#allocation7 + $0x1b0] sm:$0xff] }
 0x1f6   :  { %v1575_v44 = vld [vmem:[#allocation7 + $0xec8] sm:$0xff]  ;;  %v6063_v17 = vcombine.high %v1447_v39, %v1451_v57  ;;  %v6062_v27 = vcombine.low %v1447_v39, %v1451_v57  ;;  %v1623_v57 = vrot.slane %v6787_v8, %v241_v25 }
 0x1f7   :  { %4477 = vmatpush1.bf16.msra.mxu0 %v5974_v34  ;;  %v1579_v13 = vld [vmem:[#allocation7 + $0xee8] sm:$0xff] }
 0x1f8   :  { %4518 = vmatpush1.bf16.msra.mxu1 %v6102_v36  ;;  %4478 = vmatprep.subr.bf16.mxu0 %v6095_v40  ;;  %v6191_v18 = vcombine.high %v1575_v44, %v1579_v13  ;;  %v1439_v19 = vld [vmem:[#allocation7 + $0xa88] sm:$0xff]  ;;  %v6190_v28 = vcombine.low %v1575_v44, %v1579_v13  ;;  %v5769_v44 = vcombine.high %v1152_v10, %v1156_v11  ;;  %v1144_v13 = vld [vmem:[#allocation7 + $0x150] sm:$0xff] }
 0x1f9   :  { %4519 = vmatprep.subr.bf16.mxu1 %v6223_v41  ;;  %v1443_v20 = vld [vmem:[#allocation7 + $0xaa8] sm:$0xff] }
 0x1fa   :  { %v1567_v21 = vld [vmem:[#allocation7 + $0xe88] sm:$0xff]  ;;  %v6055_v29 = vcombine.high %v1439_v19, %v1443_v20  ;;  %v6054_v36 = vcombine.low %v1439_v19, %v1443_v20  ;;  %v1276_v19 = vld [vmem:[#allocation7 + $0x570] sm:$0xff] }
 0x1fb   :  { %4479 = vmatpush2.bf16.msra.mxu0 %v6094_v54  ;;  %v1571_v53 = vld [vmem:[#allocation7 + $0xea8] sm:$0xff] }
 0x1fc   :  { %4520 = vmatpush2.bf16.msra.mxu1 %v6222_v58  ;;  %4480 = vmatprep.subr.bf16.mxu0 %v6087_v62  ;;  %v6183_v30 = vcombine.high %v1567_v21, %v1571_v53  ;;  %v1431_v31 = vld [vmem:[#allocation7 + $0xa48] sm:$0xff]  ;;  %v6182_v40 = vcombine.low %v1567_v21, %v1571_v53  ;;  %v5768_v21 = vcombine.low %v1152_v10, %v1156_v11  ;;  %v1248_v10 = vld [vmem:[#allocation7 + $0x490] sm:$0xff] }
 0x1fd   :  { %4521 = vmatprep.subr.bf16.mxu1 %v6215_v63  ;;  %v1435_v32 = vld [vmem:[#allocation7 + $0xa68] sm:$0xff]  ;;  %v1252_v11 = vld [vmem:[#allocation7 + $0x4b0] sm:$0xff] }
 0x1fe   :  { %v1559_v33 = vld [vmem:[#allocation7 + $0xe48] sm:$0xff]  ;;  %v6047_v41 = vcombine.high %v1431_v31, %v1435_v32  ;;  %v6046_v58 = vcombine.low %v1431_v31, %v1435_v32  ;;  %v1136_v32 = vld [vmem:[#allocation7 + $0x110] sm:$0xff] }
 0x1ff   :  { %4481 = vmatpush2.bf16.msra.mxu0 %v6086_v4  ;;  %v1563_v34 = vld [vmem:[#allocation7 + $0xe68] sm:$0xff]  ;;  %v1292_v4 = vld [vmem:[#allocation7 + $0x5f0] sm:$0xff] }
 0x200   :  { %4522 = vmatpush2.bf16.msra.mxu1 %v6214_v5  ;;  %4482 = vmatprep.subr.bf16.mxu0 %v6079_v6  ;;  %v6175_v42 = vcombine.high %v1559_v33, %v1563_v34  ;;  %v1423_v49 = vld [vmem:[#allocation7 + $0xa08] sm:$0xff]  ;;  %v6174_v62 = vcombine.low %v1559_v33, %v1563_v34  ;;  %v5905_v9 = vcombine.high %v1288_v3, %v1292_v4  ;;  %v1140_v33 = vld [vmem:[#allocation7 + $0x130] sm:$0xff] }
 0x201   :  { %4523 = vmatprep.subr.bf16.mxu1 %v6207_v7  ;;  %v1427_v50 = vld [vmem:[#allocation7 + $0xa28] sm:$0xff]  ;;  %v5777_v7 = vcombine.high %v1160_v1, %v1164_v2  ;;  %v5904_v39 = vcombine.low %v1288_v3, %v1292_v4  ;;  %v5752_v3 = vcombine.low %v1136_v32, %v1140_v33 }
 0x202   :  { %v1551_v51 = vld [vmem:[#allocation7 + $0xe08] sm:$0xff]  ;;  %v6039_v63 = vcombine.high %v1423_v49, %v1427_v50  ;;  %v6038_v5 = vcombine.low %v1423_v49, %v1427_v50 }
 0x203   :  { %4483 = vmatpush2.bf16.msra.mxu0 %v6078_v37  ;;  %v1555_v54 = vld [vmem:[#allocation7 + $0xe28] sm:$0xff]  ;;  %v5776_v37 = vcombine.low %v1160_v1, %v1164_v2  ;;  %v1256_v1 = vld [vmem:[#allocation7 + $0x4d0] sm:$0xff] }
 0x204   :  { %4524 = vmatpush2.bf16.msra.mxu1 %v6206_v38  ;;  %4484 = vmatprep.subr.bf16.mxu0 %v6071_v43  ;;  %v6167_v0 = vcombine.high %v1551_v51, %v1555_v54  ;;  %v6166_v6 = vcombine.low %v1551_v51, %v1555_v54  ;;  %v1619_v38 = vrot.slane %v6787_v8, %v237_v23  ;;  %v1280_v43 = vld [vmem:[#allocation7 + $0x590] sm:$0xff] }
 0x205   :  { %4525 = vmatprep.subr.bf16.mxu1 %v6199_v12  ;;  %v1284_v12 = vld [vmem:[#allocation7 + $0x5b0] sm:$0xff]  ;;  %v5753_v54 = vcombine.high %v1136_v32, %v1140_v33 }
 0x206   :  { %v5896_v25 = vcombine.low %v1280_v43, %v1284_v12  ;;  %v1260_v2 = vld [vmem:[#allocation7 + $0x4f0] sm:$0xff] }
 0x207   :  { %4485 = vmatpush2.bf16.msra.mxu0 %v6070_v15  ;;  %v1148_v15 = vld [vmem:[#allocation7 + $0x170] sm:$0xff] }
 0x208   :  { %4526 = vmatpush2.bf16.msra.mxu1 %v6198_v16  ;;  %4486 = vmatprep.subr.bf16.mxu0 %v6063_v17  ;;  %v5897_v17 = vcombine.high %v1280_v43, %v1284_v12  ;;  %v5760_v49 = vcombine.low %v1144_v13, %v1148_v15  ;;  %v5865_v12 = vcombine.high %v1248_v10, %v1252_v11  ;;  %v1352_v32 = vld [vmem:[#allocation7 + $0x7d0] sm:$0xff] }
 0x209   :  { %4527 = vmatprep.subr.bf16.mxu1 %v6191_v18  ;;  %v1272_v18 = vld [vmem:[#allocation7 + $0x550] sm:$0xff] }
 0x20a   :  { %v5889_v31 = vcombine.high %v1272_v18, %v1276_v19  ;;  %v5888_v51 = vcombine.low %v1272_v18, %v1276_v19  ;;  %v1104_v19 = vld [vmem:[#allocation7 + $0x10] sm:$0xff] }
 0x20b   :  { %4487 = vmatpush2.bf16.msra.mxu0 %v6062_v27  ;;  %v5761_v27 = vcombine.high %v1144_v13, %v1148_v15  ;;  %v1244_v13 = vld [vmem:[#allocation7 + $0x470] sm:$0xff] }
 0x20c   :  { %4528 = vmatpush2.bf16.msra.mxu1 %v6190_v28  ;;  %4488 = vmatprep.subr.bf16.mxu0 %v6055_v29  ;;  %v1356_v33 = vld [vmem:[#allocation7 + $0x7f0] sm:$0xff] }
 0x20d   :  { %4529 = vmatprep.subr.bf16.mxu1 %v6183_v30 }
 0x20f   :  { %4489 = vmatpush2.bf16.msra.mxu0 %v6054_v36  ;;  %v1264_v36 = vld [vmem:[#allocation7 + $0x510] sm:$0xff] }
 0x210   :  { %4530 = vmatpush2.bf16.msra.mxu1 %v6182_v40  ;;  %4490 = vmatprep.subr.bf16.mxu0 %v6047_v41  ;;  %v1268_v40 = vld [vmem:[#allocation7 + $0x530] sm:$0xff] }
 0x211   :  { %4531 = vmatprep.subr.bf16.mxu1 %v6175_v42  ;;  %v5880_v4 = vcombine.low %v1264_v36, %v1268_v40 }
 0x213   :  { %4491 = vmatpush2.bf16.msra.mxu0 %v6046_v58 }
 0x214   :  { %4532 = vmatpush2.bf16.msra.mxu1 %v6174_v62  ;;  %4492 = vmatprep.subr.bf16.mxu0 %v6039_v63  ;;  %v5881_v62 = vcombine.high %v1264_v36, %v1268_v40  ;;  %v1128_v63 = vld [vmem:[#allocation7 + $0xd0] sm:$0xff] }
 0x215   :  { %4533 = vmatprep.subr.bf16.mxu1 %v6167_v0  ;;  %v1132_v0 = vld [vmem:[#allocation7 + $0xf0] sm:$0xff] }
 0x217   :  { %4493 = vmatpush2.bf16.msra.mxu0 %v6038_v5  ;;  %v5745_v5 = vcombine.high %v1128_v63, %v1132_v0 }
 0x218   :  { %4534 = vmatpush2.bf16.msra.mxu1 %v6166_v6  ;;  %4544 = vmatprep.subr.bf16.mxu0 %v5777_v7  ;;  %v5873_v6 = vcombine.high %v1256_v1, %v1260_v2  ;;  %v1120_v7 = vld [vmem:[#allocation7 + $0x90] sm:$0xff] }
 0x219   :  { %4585 = vmatprep.subr.bf16.mxu1 %v5905_v9  ;;  %v1124_v9 = vld [vmem:[#allocation7 + $0xb0] sm:$0xff] }
 0x21a   :  { %4495 = vmatmul.mubr.bf16.vlgmr.msra.gmra.mxu0 %v6773_v46  ;;  %v4250_v16 = vpop.f32.mrf.mxu0  ;;  %v4291_v20 = vpop.f32.mrf.mxu1  ;;  %v5737_v43 = vcombine.high %v1120_v7, %v1124_v9  ;;  %v5736_v15 = vcombine.low %v1120_v7, %v1124_v9 }
 0x21b   :  { %4536 = vmatmul.mubr.bf16.vlgmr.msra.gmra.mxu1 %v6769_v35  ;;  %v4251_v23 = vadd.f32 %v4250_v16, %v1619_v38  ;;  %4545 = vmatpush1.bf16.msra.mxu0 %v5776_v37  ;;  %v5744_v37 = vcombine.low %v1128_v63, %v1132_v0  ;;  %v5872_v38 = vcombine.low %v1256_v1, %v1260_v2  ;;  %v1208_v1 = vld [vmem:[#allocation7 + $0x350] sm:$0xff] }
 0x21c   :  { %4576 = vmatprep.mubr.bf16.mxu0 %v6737_v56  ;;  %4586 = vmatpush1.bf16.msra.mxu1 %v5904_v39  ;;  %v4252_v53 = vpop.f32.mrf.mxu0  ;;  %v4293_v30 = vpop.f32.mrf.mxu1  ;;  %v1112_v39 = vld [vmem:[#allocation7 + $0x50] sm:$0xff]  ;;  %v5864_v16 = vcombine.low %v1248_v10, %v1252_v11 }
 0x21d   :  { %v6798_v28 = vadd.f32 %v4291_v20, %v4251_v23  ;;  %4617 = vmatprep.mubr.bf16.mxu1 %v6741_v60  ;;  %v4253_v29 = vadd.f32 %v4252_v53, %v1623_v57  ;;  %4546 = vmatprep.subr.bf16.mxu0 %v5769_v44  ;;  %v1116_v57 = vld [vmem:[#allocation7 + $0x70] sm:$0xff] }
 0x21e   :  { %4587 = vmatprep.subr.bf16.mxu1 %v5897_v17  ;;  %v4254_v34 = vpop.f32.mrf.mxu0  ;;  %v4295_v42 = vpop.f32.mrf.mxu1  ;;  %v1240_v44 = vld [vmem:[#allocation7 + $0x450] sm:$0xff]  ;;  %v5729_v17 = vcombine.high %v1112_v39, %v1116_v57  ;;  %v5728_v53 = vcombine.low %v1112_v39, %v1116_v57 }
 0x21f   :  { %v6801_v41 = vadd.f32 %v4293_v30, %v4253_v29  ;;  %4547 = vmatpush1.bf16.msra.mxu0 %v5768_v21  ;;  %v5857_v18 = vcombine.high %v1240_v44, %v1244_v13  ;;  %v1108_v23 = vld [vmem:[#allocation7 + $0x30] sm:$0xff]  ;;  %v5969_v42 = vcombine.high %v1352_v32, %v1356_v33 }
 0x220   :  { %4588 = vmatpush1.bf16.msra.mxu1 %v5896_v25  ;;  %v4255_v50 = vpop.f32.mrf.mxu0  ;;  %4548 = vmatprep.subr.bf16.mxu0 %v5761_v27  ;;  %v4296_v58 = vpop.f32.mrf.mxu1  ;;  %v1232_v20 = vld [vmem:[#allocation7 + $0x410] sm:$0xff]  ;;  %v5856_v25 = vcombine.low %v1240_v44, %v1244_v13  ;;  %v5721_v27 = vcombine.high %v1104_v19, %v1108_v23  ;;  %v5720_v34 = vcombine.low %v1104_v19, %v1108_v23 }
 0x221   :  { %4589 = vmatprep.subr.bf16.mxu1 %v5889_v31  ;;  %v1236_v21 = vld [vmem:[#allocation7 + $0x430] sm:$0xff] }
 0x222   :  { %v5849_v29 = vcombine.high %v1232_v20, %v1236_v21  ;;  %v1224_v30 = vld [vmem:[#allocation7 + $0x3d0] sm:$0xff]  ;;  %v5848_v36 = vcombine.low %v1232_v20, %v1236_v21 }
 0x223   :  { %4549 = vmatpush1.bf16.msra.mxu0 %v5760_v49  ;;  %v1228_v31 = vld [vmem:[#allocation7 + $0x3f0] sm:$0xff] }
 0x224   :  { %4590 = vmatpush1.bf16.msra.mxu1 %v5888_v51  ;;  %4550 = vmatprep.subr.bf16.mxu0 %v5753_v54  ;;  %v5841_v40 = vcombine.high %v1224_v30, %v1228_v31  ;;  %v1216_v49 = vld [vmem:[#allocation7 + $0x390] sm:$0xff]  ;;  %v5840_v58 = vcombine.low %v1224_v30, %v1228_v31 }
 0x225   :  { %4591 = vmatprep.subr.bf16.mxu1 %v5881_v62  ;;  %v1220_v50 = vld [vmem:[#allocation7 + $0x3b0] sm:$0xff]  ;;  %v5968_v62 = vcombine.low %v1352_v32, %v1356_v33 }
 0x226   :  { %v1344_v51 = vld [vmem:[#allocation7 + $0x790] sm:$0xff]  ;;  %v5833_v63 = vcombine.high %v1216_v49, %v1220_v50 }
 0x227   :  { %4551 = vmatpush1.bf16.msra.mxu0 %v5752_v3  ;;  %v1348_v54 = vld [vmem:[#allocation7 + $0x7b0] sm:$0xff] }
 0x228   :  { %4592 = vmatpush1.bf16.msra.mxu1 %v5880_v4  ;;  %4552 = vmatprep.subr.bf16.mxu0 %v5745_v5  ;;  %v5961_v0 = vcombine.high %v1344_v51, %v1348_v54  ;;  %v1212_v2 = vld [vmem:[#allocation7 + $0x370] sm:$0xff]  ;;  %v5832_v5 = vcombine.low %v1216_v49, %v1220_v50 }
 0x229   :  { %4593 = vmatprep.subr.bf16.mxu1 %v5873_v6  ;;  %v1336_v3 = vld [vmem:[#allocation7 + $0x750] sm:$0xff]  ;;  %v5960_v6 = vcombine.low %v1344_v51, %v1348_v54  ;;  %v5825_v7 = vcombine.high %v1208_v1, %v1212_v2 }
 0x22a   :  { %v1340_v4 = vld [vmem:[#allocation7 + $0x770] sm:$0xff] }
 0x22b   :  { %4553 = vmatpush1.bf16.msra.mxu0 %v5744_v37  ;;  %v5953_v9 = vcombine.high %v1336_v3, %v1340_v4  ;;  %v1200_v10 = vld [vmem:[#allocation7 + $0x310] sm:$0xff] }
 0x22c   :  { %4594 = vmatpush1.bf16.msra.mxu1 %v5872_v38  ;;  %4554 = vmatprep.subr.bf16.mxu0 %v5737_v43  ;;  %v1204_v11 = vld [vmem:[#allocation7 + $0x330] sm:$0xff]  ;;  %v5824_v43 = vcombine.low %v1208_v1, %v1212_v2 }
 0x22d   :  { %4595 = vmatprep.subr.bf16.mxu1 %v5865_v12  ;;  %v1328_v37 = vld [vmem:[#allocation7 + $0x710] sm:$0xff]  ;;  %v5952_v12 = vcombine.low %v1336_v3, %v1340_v4  ;;  %v5817_v39 = vcombine.high %v1200_v10, %v1204_v11 }
 0x22e   :  { %v1332_v38 = vld [vmem:[#allocation7 + $0x730] sm:$0xff] }
 0x22f   :  { %4555 = vmatpush1.bf16.msra.mxu0 %v5736_v15  ;;  %v5945_v57 = vcombine.high %v1328_v37, %v1332_v38  ;;  %v1192_v44 = vld [vmem:[#allocation7 + $0x2d0] sm:$0xff] }
 0x230   :  { %4596 = vmatpush1.bf16.msra.mxu1 %v5864_v16  ;;  %4556 = vmatprep.subr.bf16.mxu0 %v5729_v17  ;;  %v1196_v13 = vld [vmem:[#allocation7 + $0x2f0] sm:$0xff]  ;;  %v5816_v17 = vcombine.low %v1200_v10, %v1204_v11 }
 0x231   :  { %4597 = vmatprep.subr.bf16.mxu1 %v5857_v18  ;;  %v1320_v15 = vld [vmem:[#allocation7 + $0x6d0] sm:$0xff]  ;;  %v5944_v18 = vcombine.low %v1328_v37, %v1332_v38  ;;  %v5809_v19 = vcombine.high %v1192_v44, %v1196_v13 }
 0x232   :  { %v1324_v16 = vld [vmem:[#allocation7 + $0x6f0] sm:$0xff] }
 0x233   :  { %4557 = vmatpush1.bf16.msra.mxu0 %v5728_v53  ;;  %v5937_v23 = vcombine.high %v1320_v15, %v1324_v16  ;;  %v1184_v20 = vld [vmem:[#allocation7 + $0x290] sm:$0xff] }
 0x234   :  { %4598 = vmatpush1.bf16.msra.mxu1 %v5856_v25  ;;  %4558 = vmatprep.subr.bf16.mxu0 %v5721_v27  ;;  %v1188_v21 = vld [vmem:[#allocation7 + $0x2b0] sm:$0xff]  ;;  %v5808_v27 = vcombine.low %v1192_v44, %v1196_v13 }
 0x235   :  { %4599 = vmatprep.subr.bf16.mxu1 %v5849_v29  ;;  %v1312_v53 = vld [vmem:[#allocation7 + $0x690] sm:$0xff]  ;;  %v5936_v29 = vcombine.low %v1320_v15, %v1324_v16  ;;  %v5801_v30 = vcombine.high %v1184_v20, %v1188_v21 }
 0x236   :  { %v1316_v25 = vld [vmem:[#allocation7 + $0x6b0] sm:$0xff] }
 0x237   :  { %4559 = vmatpush1.bf16.msra.mxu0 %v5720_v34  ;;  %v5929_v31 = vcombine.high %v1312_v53, %v1316_v25  ;;  %v1176_v32 = vld [vmem:[#allocation7 + $0x250] sm:$0xff] }
 0x238   :  { %4600 = vmatpush1.bf16.msra.mxu1 %v5848_v36  ;;  %4560 = vmatprep.subr.bf16.mxu0 %v5841_v40  ;;  %v1180_v33 = vld [vmem:[#allocation7 + $0x270] sm:$0xff]  ;;  %v5800_v40 = vcombine.low %v1184_v20, %v1188_v21 }
 0x239   :  { %4601 = vmatprep.subr.bf16.mxu1 %v5969_v42  ;;  %v1304_v34 = vld [vmem:[#allocation7 + $0x650] sm:$0xff]  ;;  %v5928_v42 = vcombine.low %v1312_v53, %v1316_v25  ;;  %v5793_v49 = vcombine.high %v1176_v32, %v1180_v33 }
 0x23a   :  { %v1308_v36 = vld [vmem:[#allocation7 + $0x670] sm:$0xff] }
 0x23b   :  { %4561 = vmatpush2.bf16.msra.mxu0 %v5840_v58  ;;  %v5921_v50 = vcombine.high %v1304_v34, %v1308_v36  ;;  %v1168_v51 = vld [vmem:[#allocation7 + $0x210] sm:$0xff] }
 0x23c   :  { %4602 = vmatpush2.bf16.msra.mxu1 %v5968_v62  ;;  %4562 = vmatprep.subr.bf16.mxu0 %v5833_v63  ;;  %v1172_v54 = vld [vmem:[#allocation7 + $0x230] sm:$0xff]  ;;  %v5792_v63 = vcombine.low %v1176_v32, %v1180_v33 }
 0x23d   :  { %4603 = vmatprep.subr.bf16.mxu1 %v5961_v0  ;;  %v1296_v58 = vld [vmem:[#allocation7 + $0x610] sm:$0xff]  ;;  %v5920_v0 = vcombine.low %v1304_v34, %v1308_v36  ;;  %v5785_v1 = vcombine.high %v1168_v51, %v1172_v54 }
 0x23e   :  { %v1300_v62 = vld [vmem:[#allocation7 + $0x630] sm:$0xff] }
 0x23f   :  { %4563 = vmatpush2.bf16.msra.mxu0 %v5832_v5  ;;  %v5913_v2 = vcombine.high %v1296_v58, %v1300_v62  ;;  %v1416_v3 = vld [vmem:[#allocation7 + $0x9d0] sm:$0xff] }
 0x240   :  { %4604 = vmatpush2.bf16.msra.mxu1 %v5960_v6  ;;  %4564 = vmatprep.subr.bf16.mxu0 %v5825_v7  ;;  %v1420_v4 = vld [vmem:[#allocation7 + $0x9f0] sm:$0xff]  ;;  %v5784_v7 = vcombine.low %v1168_v51, %v1172_v54 }
 0x241   :  { %4605 = vmatprep.subr.bf16.mxu1 %v5953_v9  ;;  %v1544_v5 = vld [vmem:[#allocation7 + $0xdd0] sm:$0xff]  ;;  %v5912_v9 = vcombine.low %v1296_v58, %v1300_v62  ;;  %v6033_v10 = vcombine.high %v1416_v3, %v1420_v4 }
 0x242   :  { %v1548_v6 = vld [vmem:[#allocation7 + $0xdf0] sm:$0xff] }
 0x243   :  { %4565 = vmatpush2.bf16.msra.mxu0 %v5824_v43  ;;  %v6161_v11 = vcombine.high %v1544_v5, %v1548_v6  ;;  %v1408_v37 = vld [vmem:[#allocation7 + $0x990] sm:$0xff]  ;;  %v6032_v43 = vcombine.low %v1416_v3, %v1420_v4 }
 0x244   :  { %4606 = vmatpush2.bf16.msra.mxu1 %v5952_v12  ;;  %4566 = vmatprep.subr.bf16.mxu0 %v5817_v39  ;;  %v1412_v38 = vld [vmem:[#allocation7 + $0x9b0] sm:$0xff] }
 0x245   :  { %4607 = vmatprep.subr.bf16.mxu1 %v5945_v57  ;;  %v1536_v12 = vld [vmem:[#allocation7 + $0xd90] sm:$0xff]  ;;  %v6160_v57 = vcombine.low %v1544_v5, %v1548_v6  ;;  %v6025_v44 = vcombine.high %v1408_v37, %v1412_v38  ;;  %v6024_v21 = vcombine.low %v1408_v37, %v1412_v38 }
 0x246   :  { %v1540_v39 = vld [vmem:[#allocation7 + $0xdb0] sm:$0xff] }
 0x247   :  { %4567 = vmatpush2.bf16.msra.mxu0 %v5816_v17  ;;  %v1400_v13 = vld [vmem:[#allocation7 + $0x950] sm:$0xff]  ;;  %v6153_v17 = vcombine.high %v1536_v12, %v1540_v39  ;;  %v6152_v25 = vcombine.low %v1536_v12, %v1540_v39 }
 0x248   :  { %4608 = vmatpush2.bf16.msra.mxu1 %v5944_v18  ;;  %4568 = vmatprep.subr.bf16.mxu0 %v5809_v19  ;;  %v1404_v15 = vld [vmem:[#allocation7 + $0x970] sm:$0xff] }
 0x249   :  { %4609 = vmatprep.subr.bf16.mxu1 %v5937_v23  ;;  %v1528_v18 = vld [vmem:[#allocation7 + $0xd50] sm:$0xff] }
 0x24a   :  { %v1532_v19 = vld [vmem:[#allocation7 + $0xd70] sm:$0xff] }
 0x24b   :  { %4569 = vmatpush2.bf16.msra.mxu0 %v5808_v27  ;;  %v6017_v27 = vcombine.high %v1400_v13, %v1404_v15  ;;  %v6145_v32 = vcombine.high %v1528_v18, %v1532_v19  ;;  %v1392_v33 = vld [vmem:[#allocation7 + $0x910] sm:$0xff]  ;;  %v6144_v54 = vcombine.low %v1528_v18, %v1532_v19 }
 0x24c   :  { %4610 = vmatpush2.bf16.msra.mxu1 %v5936_v29  ;;  %4570 = vmatprep.subr.bf16.mxu0 %v5801_v30  ;;  %v1520_v36 = vld [vmem:[#allocation7 + $0xd10] sm:$0xff] }
 0x24d   :  { %4611 = vmatprep.subr.bf16.mxu1 %v5929_v31  ;;  %v1368_v39 = vld [vmem:[#allocation7 + $0x850] sm:$0xff] }
 0x24e   :  { %v1360_v19 = vld [vmem:[#allocation7 + $0x810] sm:$0xff] }
 0x24f   :  { %4571 = vmatpush2.bf16.msra.mxu0 %v5800_v40  ;;  %v1524_v40 = vld [vmem:[#allocation7 + $0xd30] sm:$0xff] }
 0x250   :  { %4612 = vmatpush2.bf16.msra.mxu1 %v5928_v42  ;;  %4572 = vmatprep.subr.bf16.mxu0 %v5793_v49  ;;  %v6137_v62 = vcombine.high %v1520_v36, %v1524_v40  ;;  %v6136_v4 = vcombine.low %v1520_v36, %v1524_v40 }
 0x251   :  { %4613 = vmatprep.subr.bf16.mxu1 %v5921_v50  ;;  %v6016_v50 = vcombine.low %v1400_v13, %v1404_v15  ;;  %v1500_v13 = vld [vmem:[#allocation7 + $0xc70] sm:$0xff] }
 0x253   :  { %4573 = vmatpush2.bf16.msra.mxu0 %v5792_v63  ;;  %v1384_v63 = vld [vmem:[#allocation7 + $0x8d0] sm:$0xff] }
 0x254   :  { %4614 = vmatpush2.bf16.msra.mxu1 %v5920_v0  ;;  %4574 = vmatprep.subr.bf16.mxu0 %v5785_v1  ;;  %v1388_v0 = vld [vmem:[#allocation7 + $0x8f0] sm:$0xff] }
 0x255   :  { %4615 = vmatprep.subr.bf16.mxu1 %v5913_v2  ;;  %v1512_v1 = vld [vmem:[#allocation7 + $0xcd0] sm:$0xff]  ;;  %v6001_v5 = vcombine.high %v1384_v63, %v1388_v0  ;;  %v6000_v37 = vcombine.low %v1384_v63, %v1388_v0 }
 0x256   :  { %v1516_v2 = vld [vmem:[#allocation7 + $0xcf0] sm:$0xff] }
 0x257   :  { %4575 = vmatpush2.bf16.msra.mxu0 %v5784_v7  ;;  %v6129_v6 = vcombine.high %v1512_v1, %v1516_v2  ;;  %v1376_v7 = vld [vmem:[#allocation7 + $0x890] sm:$0xff]  ;;  %v6128_v38 = vcombine.low %v1512_v1, %v1516_v2 }
 0x258   :  { %4616 = vmatpush2.bf16.msra.mxu1 %v5912_v9  ;;  %4626 = vmatprep.subr.bf16.mxu0 %v6033_v10  ;;  %v1380_v9 = vld [vmem:[#allocation7 + $0x8b0] sm:$0xff] }
 0x259   :  { %4667 = vmatprep.subr.bf16.mxu1 %v6161_v11  ;;  %v1504_v10 = vld [vmem:[#allocation7 + $0xc90] sm:$0xff]  ;;  %v5992_v15 = vcombine.low %v1376_v7, %v1380_v9 }
 0x25a   :  { %4577 = vmatmul.mubr.bf16.vlgmr.msra.gmra.mxu0 %v6739_v59  ;;  %v4332_v16 = vpop.f32.mrf.mxu0  ;;  %v4373_v20 = vpop.f32.mrf.mxu1  ;;  %v1508_v11 = vld [vmem:[#allocation7 + $0xcb0] sm:$0xff] }
 0x25b   :  { %4618 = vmatmul.mubr.bf16.vlgmr.msra.gmra.mxu1 %v6735_v55  ;;  %v4333_v23 = vadd.f32 %v4332_v16, %v6798_v28  ;;  %4627 = vmatpush1.bf16.msra.mxu0 %v6032_v43  ;;  %v1396_v28 = vld [vmem:[#allocation7 + $0x930] sm:$0xff]  ;;  %v5993_v43 = vcombine.high %v1376_v7, %v1380_v9  ;;  %v6121_v12 = vcombine.high %v1504_v10, %v1508_v11 }
 0x25c   :  { %4658 = vmatprep.mubr.bf16.mxu0 %v6771_v14  ;;  %4668 = vmatpush1.bf16.msra.mxu1 %v6160_v57  ;;  %v4334_v53 = vpop.f32.mrf.mxu0  ;;  %v4375_v31 = vpop.f32.mrf.mxu1  ;;  %v6009_v58 = vcombine.high %v1392_v33, %v1396_v28  ;;  %v6008_v3 = vcombine.low %v1392_v33, %v1396_v28  ;;  %v1372_v57 = vld [vmem:[#allocation7 + $0x870] sm:$0xff]  ;;  %v6120_v16 = vcombine.low %v1504_v10, %v1508_v11 }
 0x25d   :  { %v6807_v29 = vadd.f32 %v4373_v20, %v4333_v23  ;;  %4699 = vmatprep.mubr.bf16.mxu1 %v6775_v47  ;;  %v4335_v30 = vadd.f32 %v4334_v53, %v6801_v41  ;;  %4628 = vmatprep.subr.bf16.mxu0 %v6025_v44  ;;  %v1496_v44 = vld [vmem:[#allocation7 + $0xc50] sm:$0xff]  ;;  %v5984_v53 = vcombine.low %v1368_v39, %v1372_v57 }
 0x25e   :  { %4669 = vmatprep.subr.bf16.mxu1 %v6153_v17  ;;  %v4336_v34 = vpop.f32.mrf.mxu0  ;;  %v4377_v49 = vpop.f32.mrf.mxu1  ;;  %v5985_v17 = vcombine.high %v1368_v39, %v1372_v57  ;;  %v6113_v18 = vcombine.high %v1496_v44, %v1500_v13  ;;  %v1364_v23 = vld [vmem:[#allocation7 + $0x830] sm:$0xff] }
 0x25f   :  { %v6811_v42 = vadd.f32 %v4375_v31, %v4335_v30  ;;  %4629 = vmatpush1.bf16.msra.mxu0 %v6024_v21  ;;  %v1488_v20 = vld [vmem:[#allocation7 + $0xc10] sm:$0xff]  ;;  %v5976_v34 = vcombine.low %v1360_v19, %v1364_v23 }
 0x260   :  { %4670 = vmatpush1.bf16.msra.mxu1 %v6152_v25  ;;  %v4337_v51 = vpop.f32.mrf.mxu0  ;;  %4630 = vmatprep.subr.bf16.mxu0 %v6017_v27  ;;  %v4378_v41 = vpop.f32.mrf.mxu1  ;;  %v1492_v21 = vld [vmem:[#allocation7 + $0xc30] sm:$0xff]  ;;  %v6112_v25 = vcombine.low %v1496_v44, %v1500_v13  ;;  %v5977_v27 = vcombine.high %v1360_v19, %v1364_v23 }
 0x261   :  { %4671 = vmatprep.subr.bf16.mxu1 %v6145_v32  ;;  %v6105_v30 = vcombine.high %v1488_v20, %v1492_v21  ;;  %v1480_v31 = vld [vmem:[#allocation7 + $0xbd0] sm:$0xff]  ;;  %v6104_v36 = vcombine.low %v1488_v20, %v1492_v21 }
 0x262   :  { %v1484_v32 = vld [vmem:[#allocation7 + $0xbf0] sm:$0xff] }
 0x263   :  { %4631 = vmatpush1.bf16.msra.mxu0 %v6016_v50  ;;  %v1608_v33 = vld [vmem:[#allocation7 + $0xfd0] sm:$0xff]  ;;  %v6097_v40 = vcombine.high %v1480_v31, %v1484_v32  ;;  %v6096_v41 = vcombine.low %v1480_v31, %v1484_v32 }
 0x264   :  { %4672 = vmatpush1.bf16.msra.mxu1 %v6144_v54  ;;  %4632 = vmatprep.subr.bf16.mxu0 %v6009_v58  ;;  %v1612_v28 = vld [vmem:[#allocation7 + $0xff0] sm:$0xff] }
 0x265   :  { %4673 = vmatprep.subr.bf16.mxu1 %v6137_v62  ;;  %v6225_v49 = vcombine.high %v1608_v33, %v1612_v28  ;;  %v1472_v50 = vld [vmem:[#allocation7 + $0xb90] sm:$0xff]  ;;  %v6224_v62 = vcombine.low %v1608_v33, %v1612_v28 }
 0x266   :  { %v1476_v51 = vld [vmem:[#allocation7 + $0xbb0] sm:$0xff] }
 0x267   :  { %4633 = vmatpush1.bf16.msra.mxu0 %v6008_v3  ;;  %v1600_v54 = vld [vmem:[#allocation7 + $0xf90] sm:$0xff]  ;;  %v6089_v63 = vcombine.high %v1472_v50, %v1476_v51 }
 0x268   :  { %4674 = vmatpush1.bf16.msra.mxu1 %v6136_v4  ;;  %4634 = vmatprep.subr.bf16.mxu0 %v6001_v5  ;;  %v1604_v58 = vld [vmem:[#allocation7 + $0xfb0] sm:$0xff]  ;;  %v6088_v5 = vcombine.low %v1472_v50, %v1476_v51 }
 0x269   :  { %4675 = vmatprep.subr.bf16.mxu1 %v6129_v6  ;;  %v6217_v0 = vcombine.high %v1600_v54, %v1604_v58  ;;  %v1464_v1 = vld [vmem:[#allocation7 + $0xb50] sm:$0xff]  ;;  %v6216_v6 = vcombine.low %v1600_v54, %v1604_v58 }
 0x26a   :  { %v1468_v2 = vld [vmem:[#allocation7 + $0xb70] sm:$0xff] }
 0x26b   :  { %4635 = vmatpush1.bf16.msra.mxu0 %v6000_v37  ;;  %v1592_v3 = vld [vmem:[#allocation7 + $0xf50] sm:$0xff]  ;;  %v6081_v7 = vcombine.high %v1464_v1, %v1468_v2 }
 0x26c   :  { %4676 = vmatpush1.bf16.msra.mxu1 %v6128_v38  ;;  %4636 = vmatprep.subr.bf16.mxu0 %v5993_v43  ;;  %v1596_v4 = vld [vmem:[#allocation7 + $0xf70] sm:$0xff]  ;;  %v6080_v43 = vcombine.low %v1464_v1, %v1468_v2 }
 0x26d   :  { %4677 = vmatprep.subr.bf16.mxu1 %v6121_v12  ;;  %v6209_v9 = vcombine.high %v1592_v3, %v1596_v4  ;;  %v1456_v10 = vld [vmem:[#allocation7 + $0xb10] sm:$0xff]  ;;  %v6208_v12 = vcombine.low %v1592_v3, %v1596_v4  ;;  %v1161_v3 = vld [vmem:[#allocation7 + $0x1d8] sm:$0xff] }
 0x26e   :  { %v1460_v11 = vld [vmem:[#allocation7 + $0xb30] sm:$0xff]  ;;  %v1165_v4 = vld [vmem:[#allocation7 + $0x1f8] sm:$0xff] }
 0x26f   :  { %4637 = vmatpush1.bf16.msra.mxu0 %v5992_v15  ;;  %v1584_v37 = vld [vmem:[#allocation7 + $0xf10] sm:$0xff]  ;;  %v6073_v39 = vcombine.high %v1456_v10, %v1460_v11 }
 0x270   :  { %4678 = vmatpush1.bf16.msra.mxu1 %v6120_v16  ;;  %4638 = vmatprep.subr.bf16.mxu0 %v5985_v17  ;;  %v1588_v38 = vld [vmem:[#allocation7 + $0xf30] sm:$0xff]  ;;  %v6072_v17 = vcombine.low %v1456_v10, %v1460_v11  ;;  %v5779_v10 = vcombine.high %v1161_v3, %v1165_v4 }
 0x271   :  { %4679 = vmatprep.subr.bf16.mxu1 %v6113_v18  ;;  %v6201_v57 = vcombine.high %v1584_v37, %v1588_v38  ;;  %v1448_v44 = vld [vmem:[#allocation7 + $0xad0] sm:$0xff]  ;;  %v6200_v18 = vcombine.low %v1584_v37, %v1588_v38  ;;  %v1153_v37 = vld [vmem:[#allocation7 + $0x198] sm:$0xff] }
 0x272   :  { %v1452_v13 = vld [vmem:[#allocation7 + $0xaf0] sm:$0xff]  ;;  %v1157_v38 = vld [vmem:[#allocation7 + $0x1b8] sm:$0xff] }
 0x273   :  { %4639 = vmatpush1.bf16.msra.mxu0 %v5984_v53  ;;  %v1576_v15 = vld [vmem:[#allocation7 + $0xed0] sm:$0xff]  ;;  %v6065_v19 = vcombine.high %v1448_v44, %v1452_v13 }
 0x274   :  { %4680 = vmatpush1.bf16.msra.mxu1 %v6112_v25  ;;  %4640 = vmatprep.subr.bf16.mxu0 %v5977_v27  ;;  %v1580_v16 = vld [vmem:[#allocation7 + $0xef0] sm:$0xff]  ;;  %v6064_v27 = vcombine.low %v1448_v44, %v1452_v13  ;;  %v1631_v13 = vrot.slane %v6787_v8, %v249_v26 }
 0x275   :  { %4681 = vmatprep.subr.bf16.mxu1 %v6105_v30  ;;  %v6193_v23 = vcombine.high %v1576_v15, %v1580_v16  ;;  %v1440_v20 = vld [vmem:[#allocation7 + $0xa90] sm:$0xff]  ;;  %v6192_v30 = vcombine.low %v1576_v15, %v1580_v16  ;;  %v5771_v15 = vcombine.high %v1153_v37, %v1157_v38  ;;  %v1145_v16 = vld [vmem:[#allocation7 + $0x158] sm:$0xff] }
 0x276   :  { %v1444_v21 = vld [vmem:[#allocation7 + $0xab0] sm:$0xff] }
 0x277   :  { %4641 = vmatpush1.bf16.msra.mxu0 %v5976_v34  ;;  %v1568_v53 = vld [vmem:[#allocation7 + $0xe90] sm:$0xff]  ;;  %v6057_v31 = vcombine.high %v1440_v20, %v1444_v21 }
 0x278   :  { %4682 = vmatpush1.bf16.msra.mxu1 %v6104_v36  ;;  %4642 = vmatprep.subr.bf16.mxu0 %v6097_v40  ;;  %v1572_v25 = vld [vmem:[#allocation7 + $0xeb0] sm:$0xff]  ;;  %v6056_v40 = vcombine.low %v1440_v20, %v1444_v21 }
 0x279   :  { %4683 = vmatprep.subr.bf16.mxu1 %v6225_v49  ;;  %v6185_v32 = vcombine.high %v1568_v53, %v1572_v25  ;;  %v1432_v33 = vld [vmem:[#allocation7 + $0xa50] sm:$0xff]  ;;  %v6184_v49 = vcombine.low %v1568_v53, %v1572_v25  ;;  %v5770_v53 = vcombine.low %v1153_v37, %v1157_v38 }
 0x27a   :  { %v1436_v28 = vld [vmem:[#allocation7 + $0xa70] sm:$0xff] }
 0x27b   :  { %4643 = vmatpush2.bf16.msra.mxu0 %v6096_v41  ;;  %v1560_v34 = vld [vmem:[#allocation7 + $0xe50] sm:$0xff]  ;;  %v6049_v50 = vcombine.high %v1432_v33, %v1436_v28 }
 0x27c   :  { %4684 = vmatpush2.bf16.msra.mxu1 %v6224_v62  ;;  %4644 = vmatprep.subr.bf16.mxu0 %v6089_v63  ;;  %v1564_v36 = vld [vmem:[#allocation7 + $0xe70] sm:$0xff]  ;;  %v6048_v63 = vcombine.low %v1432_v33, %v1436_v28  ;;  %v1137_v33 = vld [vmem:[#allocation7 + $0x118] sm:$0xff] }
 0x27d   :  { %4685 = vmatprep.subr.bf16.mxu1 %v6217_v0  ;;  %v6177_v51 = vcombine.high %v1560_v34, %v1564_v36  ;;  %v1424_v54 = vld [vmem:[#allocation7 + $0xa10] sm:$0xff]  ;;  %v6176_v0 = vcombine.low %v1560_v34, %v1564_v36  ;;  %v1141_v28 = vld [vmem:[#allocation7 + $0x138] sm:$0xff] }
 0x27e   :  { %v1428_v58 = vld [vmem:[#allocation7 + $0xa30] sm:$0xff]  ;;  %v1265_v36 = vld [vmem:[#allocation7 + $0x518] sm:$0xff] }
 0x27f   :  { %4645 = vmatpush2.bf16.msra.mxu0 %v6088_v5  ;;  %v1552_v41 = vld [vmem:[#allocation7 + $0xe10] sm:$0xff]  ;;  %v6041_v1 = vcombine.high %v1424_v54, %v1428_v58  ;;  %v1289_v5 = vld [vmem:[#allocation7 + $0x5d8] sm:$0xff] }
 0x280   :  { %4686 = vmatpush2.bf16.msra.mxu1 %v6216_v6  ;;  %4646 = vmatprep.subr.bf16.mxu0 %v6081_v7  ;;  %v1556_v62 = vld [vmem:[#allocation7 + $0xe30] sm:$0xff]  ;;  %v1293_v6 = vld [vmem:[#allocation7 + $0x5f8] sm:$0xff]  ;;  %v6040_v7 = vcombine.low %v1424_v54, %v1428_v58 }
 0x281   :  { %4687 = vmatprep.subr.bf16.mxu1 %v6209_v9  ;;  %v6169_v2 = vcombine.high %v1552_v41, %v1556_v62  ;;  %v6168_v9 = vcombine.low %v1552_v41, %v1556_v62  ;;  %v5907_v11 = vcombine.high %v1289_v5, %v1293_v6  ;;  %v5906_v44 = vcombine.low %v1289_v5, %v1293_v6  ;;  %v1129_v62 = vld [vmem:[#allocation7 + $0xd8] sm:$0xff] }
 0x282   :  { %v1121_v6 = vld [vmem:[#allocation7 + $0x98] sm:$0xff] }
 0x283   :  { %4647 = vmatpush2.bf16.msra.mxu0 %v6080_v43  ;;  %v1627_v43 = vrot.slane %v6787_v8, %v245_v24  ;;  %v1277_v24 = vld [vmem:[#allocation7 + $0x578] sm:$0xff] }
 0x284   :  { %4688 = vmatpush2.bf16.msra.mxu1 %v6208_v12  ;;  %4648 = vmatprep.subr.bf16.mxu0 %v6073_v39  ;;  %v5778_v12 = vcombine.low %v1161_v3, %v1165_v4  ;;  %v1281_v39 = vld [vmem:[#allocation7 + $0x598] sm:$0xff] }
 0x285   :  { %4689 = vmatprep.subr.bf16.mxu1 %v6201_v57  ;;  %v1285_v57 = vld [vmem:[#allocation7 + $0x5b8] sm:$0xff] }
 0x286   :  { %v5898_v26 = vcombine.low %v1281_v39, %v1285_v57 }
 0x287   :  { %4649 = vmatpush2.bf16.msra.mxu0 %v6072_v17  ;;  %v1149_v17 = vld [vmem:[#allocation7 + $0x178] sm:$0xff] }
 0x288   :  { %4690 = vmatpush2.bf16.msra.mxu1 %v6200_v18  ;;  %4650 = vmatprep.subr.bf16.mxu0 %v6065_v19  ;;  %v5899_v19 = vcombine.high %v1281_v39, %v1285_v57  ;;  %v5763_v8 = vcombine.high %v1145_v16, %v1149_v17  ;;  %v1117_v39 = vld [vmem:[#allocation7 + $0x78] sm:$0xff] }
 0x289   :  { %4691 = vmatprep.subr.bf16.mxu1 %v6193_v23  ;;  %v1273_v23 = vld [vmem:[#allocation7 + $0x558] sm:$0xff] }
 0x28a   :  { %v5890_v54 = vcombine.low %v1273_v23, %v1277_v24  ;;  %v1241_v57 = vld [vmem:[#allocation7 + $0x458] sm:$0xff] }
 0x28b   :  { %4651 = vmatpush2.bf16.msra.mxu0 %v6064_v27 }
 0x28c   :  { %4692 = vmatpush2.bf16.msra.mxu1 %v6192_v30  ;;  %4652 = vmatprep.subr.bf16.mxu0 %v6057_v31 }
 0x28d   :  { %4693 = vmatprep.subr.bf16.mxu1 %v6185_v32  ;;  %v5891_v32 = vcombine.high %v1273_v23, %v1277_v24  ;;  %v1233_v23 = vld [vmem:[#allocation7 + $0x418] sm:$0xff] }
 0x28e   :  { %v1237_v24 = vld [vmem:[#allocation7 + $0x438] sm:$0xff] }
 0x28f   :  { %4653 = vmatpush2.bf16.msra.mxu0 %v6056_v40  ;;  %v1269_v40 = vld [vmem:[#allocation7 + $0x538] sm:$0xff] }
 0x290   :  { %4694 = vmatpush2.bf16.msra.mxu1 %v6184_v49  ;;  %4654 = vmatprep.subr.bf16.mxu0 %v6049_v50  ;;  %v5762_v50 = vcombine.low %v1145_v16, %v1149_v17  ;;  %v5883_v41 = vcombine.high %v1265_v36, %v1269_v40  ;;  %v5882_v3 = vcombine.low %v1265_v36, %v1269_v40  ;;  %v1217_v36 = vld [vmem:[#allocation7 + $0x398] sm:$0xff] }
 0x291   :  { %4695 = vmatprep.subr.bf16.mxu1 %v6177_v51  ;;  %v1221_v40 = vld [vmem:[#allocation7 + $0x3b8] sm:$0xff] }
 0x293   :  { %4655 = vmatpush2.bf16.msra.mxu0 %v6048_v63  ;;  %v1133_v63 = vld [vmem:[#allocation7 + $0xf8] sm:$0xff] }
 0x294   :  { %4696 = vmatpush2.bf16.msra.mxu1 %v6176_v0  ;;  %4656 = vmatprep.subr.bf16.mxu0 %v6041_v1  ;;  %v1257_v0 = vld [vmem:[#allocation7 + $0x4d8] sm:$0xff]  ;;  %v5747_v4 = vcombine.high %v1129_v62, %v1133_v63 }
 0x295   :  { %4697 = vmatprep.subr.bf16.mxu1 %v6169_v2  ;;  %v1261_v1 = vld [vmem:[#allocation7 + $0x4f8] sm:$0xff]  ;;  %v5754_v2 = vcombine.low %v1137_v33, %v1141_v28 }
 0x296   :  { %v5875_v5 = vcombine.high %v1257_v0, %v1261_v1  ;;  %v5874_v37 = vcombine.low %v1257_v0, %v1261_v1  ;;  %v1341_v0 = vld [vmem:[#allocation7 + $0x778] sm:$0xff]  ;;  %v5834_v1 = vcombine.low %v1217_v36, %v1221_v40 }
 0x297   :  { %4657 = vmatpush2.bf16.msra.mxu0 %v6040_v7  ;;  %v1125_v7 = vld [vmem:[#allocation7 + $0xb8] sm:$0xff] }
 0x298   :  { %4698 = vmatpush2.bf16.msra.mxu1 %v6168_v9  ;;  %4708 = vmatprep.subr.bf16.mxu0 %v5779_v10  ;;  %v1249_v9 = vld [vmem:[#allocation7 + $0x498] sm:$0xff]  ;;  %v5739_v38 = vcombine.high %v1121_v6, %v1125_v7 }
 0x299   :  { %4749 = vmatprep.subr.bf16.mxu1 %v5907_v11  ;;  %v1253_v10 = vld [vmem:[#allocation7 + $0x4b8] sm:$0xff]  ;;  %v5746_v11 = vcombine.low %v1129_v62, %v1133_v63 }
 0x29a   :  { %v4414_v18 = vpop.f32.mrf.mxu0  ;;  %4659 = vmatmul.mubr.bf16.vlgmr.msra.gmra.mxu0 %v6773_v46  ;;  %v4455_v21 = vpop.f32.mrf.mxu1  ;;  %v1213_v62 = vld [vmem:[#allocation7 + $0x378] sm:$0xff] }
 0x29b   :  { %v4415_v20 = vadd.f32 %v4414_v18, %v1627_v43  ;;  %4700 = vmatmul.mubr.bf16.vlgmr.msra.gmra.mxu1 %v6769_v35  ;;  %4709 = vmatpush1.bf16.msra.mxu0 %v5778_v12  ;;  %v5867_v43 = vcombine.high %v1249_v9, %v1253_v10  ;;  %v1113_v12 = vld [vmem:[#allocation7 + $0x58] sm:$0xff] }
 0x29c   :  { %4740 = vmatprep.mubr.bf16.mxu0 %v6737_v56  ;;  %4750 = vmatpush1.bf16.msra.mxu1 %v5906_v44  ;;  %v4416_v25 = vpop.f32.mrf.mxu0  ;;  %v4457_v31 = vpop.f32.mrf.mxu1  ;;  %v1245_v44 = vld [vmem:[#allocation7 + $0x478] sm:$0xff]  ;;  %v5731_v16 = vcombine.high %v1113_v12, %v1117_v39 }
 0x29d   :  { %v6822_v27 = vadd.f32 %v4455_v21, %v4415_v20  ;;  %4781 = vmatprep.mubr.bf16.mxu1 %v6741_v60  ;;  %v4417_v30 = vadd.f32 %v4416_v25, %v1631_v13  ;;  %4710 = vmatprep.subr.bf16.mxu0 %v5771_v15  ;;  %v5755_v60 = vcombine.high %v1137_v33, %v1141_v28  ;;  %v1105_v18 = vld [vmem:[#allocation7 + $0x18] sm:$0xff] }
 0x29e   :  { %v4418_v34 = vpop.f32.mrf.mxu0  ;;  %4751 = vmatprep.subr.bf16.mxu1 %v5899_v19  ;;  %v4459_v56 = vpop.f32.mrf.mxu1  ;;  %v5738_v13 = vcombine.low %v1121_v6, %v1125_v7  ;;  %v5866_v15 = vcombine.low %v1249_v9, %v1253_v10  ;;  %v5859_v17 = vcombine.high %v1241_v57, %v1245_v44  ;;  %v1109_v19 = vld [vmem:[#allocation7 + $0x38] sm:$0xff]  ;;  %v5730_v20 = vcombine.low %v1113_v12, %v1117_v39 }
 0x29f   :  { %v6825_v49 = vadd.f32 %v4457_v31, %v4417_v30  ;;  %4711 = vmatpush1.bf16.msra.mxu0 %v5770_v53  ;;  %v5858_v21 = vcombine.low %v1241_v57, %v1245_v44  ;;  %v5723_v53 = vcombine.high %v1105_v18, %v1109_v19  ;;  %v5851_v25 = vcombine.high %v1233_v23, %v1237_v24  ;;  %v1353_v30 = vld [vmem:[#allocation7 + $0x7d8] sm:$0xff] }
 0x2a0   :  { %4752 = vmatpush1.bf16.msra.mxu1 %v5898_v26  ;;  %v4419_v51 = vpop.f32.mrf.mxu0  ;;  %4712 = vmatprep.subr.bf16.mxu0 %v5763_v8  ;;  %v4460_v58 = vpop.f32.mrf.mxu1  ;;  %v1225_v26 = vld [vmem:[#allocation7 + $0x3d8] sm:$0xff]  ;;  %v5850_v33 = vcombine.low %v1233_v23, %v1237_v24 }
 0x2a1   :  { %4753 = vmatprep.subr.bf16.mxu1 %v5891_v32  ;;  %v1229_v8 = vld [vmem:[#allocation7 + $0x3f8] sm:$0xff]  ;;  %v5722_v32 = vcombine.low %v1105_v18, %v1109_v19 }
 0x2a2   :  { %v1357_v31 = vld [vmem:[#allocation7 + $0x7f8] sm:$0xff]  ;;  %v5843_v28 = vcombine.high %v1225_v26, %v1229_v8  ;;  %v5842_v51 = vcombine.low %v1225_v26, %v1229_v8 }
 0x2a3   :  { %4713 = vmatpush1.bf16.msra.mxu0 %v5762_v50  ;;  %v5971_v34 = vcombine.high %v1353_v30, %v1357_v31  ;;  %v1345_v56 = vld [vmem:[#allocation7 + $0x798] sm:$0xff] }
 0x2a4   :  { %4754 = vmatpush1.bf16.msra.mxu1 %v5890_v54  ;;  %4714 = vmatprep.subr.bf16.mxu0 %v5755_v60  ;;  %v1349_v50 = vld [vmem:[#allocation7 + $0x7b8] sm:$0xff]  ;;  %v5970_v54 = vcombine.low %v1353_v30, %v1357_v31  ;;  %v5835_v60 = vcombine.high %v1217_v36, %v1221_v40 }
 0x2a5   :  { %4755 = vmatprep.subr.bf16.mxu1 %v5883_v41  ;;  %v5963_v58 = vcombine.high %v1345_v56, %v1349_v50  ;;  %v1209_v41 = vld [vmem:[#allocation7 + $0x358] sm:$0xff] }
 0x2a6   :  { %v1337_v63 = vld [vmem:[#allocation7 + $0x758] sm:$0xff]  ;;  %v5826_v10 = vcombine.low %v1209_v41, %v1213_v62 }
 0x2a7   :  { %4715 = vmatpush1.bf16.msra.mxu0 %v5754_v2  ;;  %v5962_v2 = vcombine.low %v1345_v56, %v1349_v50  ;;  %v1205_v6 = vld [vmem:[#allocation7 + $0x338] sm:$0xff] }
 0x2a8   :  { %4756 = vmatpush1.bf16.msra.mxu1 %v5882_v3  ;;  %4716 = vmatprep.subr.bf16.mxu0 %v5747_v4  ;;  %v5827_v3 = vcombine.high %v1209_v41, %v1213_v62  ;;  %v5955_v4 = vcombine.high %v1337_v63, %v1341_v0  ;;  %v1329_v7 = vld [vmem:[#allocation7 + $0x718] sm:$0xff] }
 0x2a9   :  { %4757 = vmatprep.subr.bf16.mxu1 %v5875_v5  ;;  %v1201_v5 = vld [vmem:[#allocation7 + $0x318] sm:$0xff] }
 0x2aa   :  { %v1333_v9 = vld [vmem:[#allocation7 + $0x738] sm:$0xff]  ;;  %v5818_v44 = vcombine.low %v1201_v5, %v1205_v6 }
 0x2ab   :  { %4717 = vmatpush1.bf16.msra.mxu0 %v5746_v11  ;;  %v5954_v11 = vcombine.low %v1337_v63, %v1341_v0  ;;  %v1197_v12 = vld [vmem:[#allocation7 + $0x2f8] sm:$0xff] }
 0x2ac   :  { %4758 = vmatpush1.bf16.msra.mxu1 %v5874_v37  ;;  %4718 = vmatprep.subr.bf16.mxu0 %v5739_v38  ;;  %v5819_v37 = vcombine.high %v1201_v5, %v1205_v6  ;;  %v5947_v38 = vcombine.high %v1329_v7, %v1333_v9  ;;  %v1321_v39 = vld [vmem:[#allocation7 + $0x6d8] sm:$0xff] }
 0x2ad   :  { %4759 = vmatprep.subr.bf16.mxu1 %v5867_v43  ;;  %v1193_v43 = vld [vmem:[#allocation7 + $0x2d8] sm:$0xff] }
 0x2ae   :  { %v1325_v57 = vld [vmem:[#allocation7 + $0x6f8] sm:$0xff]  ;;  %v5810_v24 = vcombine.low %v1193_v43, %v1197_v12 }
 0x2af   :  { %4719 = vmatpush1.bf16.msra.mxu0 %v5738_v13  ;;  %v5946_v13 = vcombine.low %v1329_v7, %v1333_v9  ;;  %v1189_v18 = vld [vmem:[#allocation7 + $0x2b8] sm:$0xff] }
 0x2b0   :  { %4760 = vmatpush1.bf16.msra.mxu1 %v5866_v15  ;;  %4720 = vmatprep.subr.bf16.mxu0 %v5731_v16  ;;  %v5811_v15 = vcombine.high %v1193_v43, %v1197_v12  ;;  %v5939_v16 = vcombine.high %v1321_v39, %v1325_v57  ;;  %v1313_v19 = vld [vmem:[#allocation7 + $0x698] sm:$0xff] }
 0x2b1   :  { %4761 = vmatprep.subr.bf16.mxu1 %v5859_v17  ;;  %v1185_v17 = vld [vmem:[#allocation7 + $0x298] sm:$0xff] }
 0x2b2   :  { %v1317_v23 = vld [vmem:[#allocation7 + $0x6b8] sm:$0xff]  ;;  %v5802_v31 = vcombine.low %v1185_v17, %v1189_v18 }
 0x2b3   :  { %4721 = vmatpush1.bf16.msra.mxu0 %v5730_v20  ;;  %v5938_v20 = vcombine.low %v1321_v39, %v1325_v57  ;;  %v1181_v26 = vld [vmem:[#allocation7 + $0x278] sm:$0xff] }
 0x2b4   :  { %4762 = vmatpush1.bf16.msra.mxu1 %v5858_v21  ;;  %4722 = vmatprep.subr.bf16.mxu0 %v5723_v53  ;;  %v5803_v21 = vcombine.high %v1185_v17, %v1189_v18  ;;  %v5931_v53 = vcombine.high %v1313_v19, %v1317_v23  ;;  %v1305_v8 = vld [vmem:[#allocation7 + $0x658] sm:$0xff] }
 0x2b5   :  { %4763 = vmatprep.subr.bf16.mxu1 %v5851_v25  ;;  %v1177_v25 = vld [vmem:[#allocation7 + $0x258] sm:$0xff] }
 0x2b6   :  { %v1309_v30 = vld [vmem:[#allocation7 + $0x678] sm:$0xff]  ;;  %v5794_v50 = vcombine.low %v1177_v25, %v1181_v26 }
 0x2b7   :  { %4723 = vmatpush1.bf16.msra.mxu0 %v5722_v32  ;;  %v5930_v32 = vcombine.low %v1313_v19, %v1317_v23  ;;  %v1173_v36 = vld [vmem:[#allocation7 + $0x238] sm:$0xff] }
 0x2b8   :  { %4764 = vmatpush1.bf16.msra.mxu1 %v5850_v33  ;;  %4724 = vmatprep.subr.bf16.mxu0 %v5843_v28  ;;  %v5795_v33 = vcombine.high %v1177_v25, %v1181_v26  ;;  %v5923_v28 = vcombine.high %v1305_v8, %v1309_v30  ;;  %v1297_v40 = vld [vmem:[#allocation7 + $0x618] sm:$0xff] }
 0x2b9   :  { %4765 = vmatprep.subr.bf16.mxu1 %v5971_v34  ;;  %v1169_v34 = vld [vmem:[#allocation7 + $0x218] sm:$0xff] }
 0x2ba   :  { %v1301_v56 = vld [vmem:[#allocation7 + $0x638] sm:$0xff]  ;;  %v5786_v0 = vcombine.low %v1169_v34, %v1173_v36 }
 0x2bb   :  { %4725 = vmatpush2.bf16.msra.mxu0 %v5842_v51  ;;  %v5922_v51 = vcombine.low %v1305_v8, %v1309_v30  ;;  %v1421_v41 = vld [vmem:[#allocation7 + $0x9f8] sm:$0xff] }
 0x2bc   :  { %4766 = vmatpush2.bf16.msra.mxu1 %v5970_v54  ;;  %4726 = vmatprep.subr.bf16.mxu0 %v5835_v60  ;;  %v5787_v54 = vcombine.high %v1169_v34, %v1173_v36  ;;  %v5915_v60 = vcombine.high %v1297_v40, %v1301_v56  ;;  %v1545_v62 = vld [vmem:[#allocation7 + $0xdd8] sm:$0xff] }
 0x2bd   :  { %4767 = vmatprep.subr.bf16.mxu1 %v5963_v58  ;;  %v1417_v58 = vld [vmem:[#allocation7 + $0x9d8] sm:$0xff] }
 0x2be   :  { %v1549_v63 = vld [vmem:[#allocation7 + $0xdf8] sm:$0xff]  ;;  %v6034_v6 = vcombine.low %v1417_v58, %v1421_v41 }
 0x2bf   :  { %4727 = vmatpush2.bf16.msra.mxu0 %v5834_v1  ;;  %v5914_v1 = vcombine.low %v1297_v40, %v1301_v56  ;;  %v1413_v5 = vld [vmem:[#allocation7 + $0x9b8] sm:$0xff] }
 0x2c0   :  { %4768 = vmatpush2.bf16.msra.mxu1 %v5962_v2  ;;  %4728 = vmatprep.subr.bf16.mxu0 %v5827_v3  ;;  %v6035_v2 = vcombine.high %v1417_v58, %v1421_v41  ;;  %v6163_v3 = vcombine.high %v1545_v62, %v1549_v63  ;;  %v1537_v7 = vld [vmem:[#allocation7 + $0xd98] sm:$0xff] }
 0x2c1   :  { %4769 = vmatprep.subr.bf16.mxu1 %v5955_v4  ;;  %v1409_v4 = vld [vmem:[#allocation7 + $0x998] sm:$0xff] }
 0x2c2   :  { %v1541_v9 = vld [vmem:[#allocation7 + $0xdb8] sm:$0xff] }
 0x2c3   :  { %4729 = vmatpush2.bf16.msra.mxu0 %v5826_v10  ;;  %v6162_v10 = vcombine.low %v1545_v62, %v1549_v63  ;;  %v6155_v12 = vcombine.high %v1537_v7, %v1541_v9  ;;  %v1529_v39 = vld [vmem:[#allocation7 + $0xd58] sm:$0xff]  ;;  %v6154_v17 = vcombine.low %v1537_v7, %v1541_v9 }
 0x2c4   :  { %4770 = vmatpush2.bf16.msra.mxu1 %v5954_v11  ;;  %4730 = vmatprep.subr.bf16.mxu0 %v5819_v37  ;;  %v6027_v11 = vcombine.high %v1409_v4, %v1413_v5  ;;  %v1401_v37 = vld [vmem:[#allocation7 + $0x958] sm:$0xff] }
 0x2c5   :  { %4771 = vmatprep.subr.bf16.mxu1 %v5947_v38  ;;  %v1405_v38 = vld [vmem:[#allocation7 + $0x978] sm:$0xff] }
 0x2c6   :  { %v1533_v57 = vld [vmem:[#allocation7 + $0xd78] sm:$0xff]  ;;  %v6019_v18 = vcombine.high %v1401_v37, %v1405_v38 }
 0x2c7   :  { %4731 = vmatpush2.bf16.msra.mxu0 %v5818_v44  ;;  %v1393_v23 = vld [vmem:[#allocation7 + $0x918] sm:$0xff]  ;;  %v6146_v26 = vcombine.low %v1529_v39, %v1533_v57 }
 0x2c8   :  { %4772 = vmatpush2.bf16.msra.mxu1 %v5946_v13  ;;  %4732 = vmatprep.subr.bf16.mxu0 %v5811_v15  ;;  %v6026_v15 = vcombine.low %v1409_v4, %v1413_v5  ;;  %v1361_v9 = vld [vmem:[#allocation7 + $0x818] sm:$0xff] }
 0x2c9   :  { %4773 = vmatprep.subr.bf16.mxu1 %v5939_v16 }
 0x2cb   :  { %4733 = vmatpush2.bf16.msra.mxu0 %v5810_v24  ;;  %v1397_v24 = vld [vmem:[#allocation7 + $0x938] sm:$0xff] }
 0x2cc   :  { %4774 = vmatpush2.bf16.msra.mxu1 %v5938_v20  ;;  %4734 = vmatprep.subr.bf16.mxu0 %v5803_v21  ;;  %v1521_v20 = vld [vmem:[#allocation7 + $0xd18] sm:$0xff]  ;;  %v6011_v8 = vcombine.high %v1393_v23, %v1397_v24  ;;  %v6010_v34 = vcombine.low %v1393_v23, %v1397_v24 }
 0x2cd   :  { %4775 = vmatprep.subr.bf16.mxu1 %v5931_v53  ;;  %v1525_v21 = vld [vmem:[#allocation7 + $0xd38] sm:$0xff]  ;;  %v6018_v53 = vcombine.low %v1401_v37, %v1405_v38 }
 0x2ce   :  { %v6138_v36 = vcombine.low %v1521_v20, %v1525_v21  ;;  %v1493_v37 = vld [vmem:[#allocation7 + $0xc38] sm:$0xff] }
 0x2cf   :  { %4735 = vmatpush2.bf16.msra.mxu0 %v5802_v31  ;;  %v1385_v31 = vld [vmem:[#allocation7 + $0x8d8] sm:$0xff] }
 0x2d0   :  { %4776 = vmatpush2.bf16.msra.mxu1 %v5930_v32  ;;  %4736 = vmatprep.subr.bf16.mxu0 %v5795_v33  ;;  %v1389_v32 = vld [vmem:[#allocation7 + $0x8f8] sm:$0xff] }
 0x2d1   :  { %4777 = vmatprep.subr.bf16.mxu1 %v5923_v28  ;;  %v1513_v33 = vld [vmem:[#allocation7 + $0xcd8] sm:$0xff]  ;;  %v6003_v40 = vcombine.high %v1385_v31, %v1389_v32  ;;  %v6002_v58 = vcombine.low %v1385_v31, %v1389_v32 }
 0x2d2   :  { %v1517_v28 = vld [vmem:[#allocation7 + $0xcf8] sm:$0xff] }
 0x2d3   :  { %4737 = vmatpush2.bf16.msra.mxu0 %v5794_v50  ;;  %v6131_v56 = vcombine.high %v1513_v33, %v1517_v28  ;;  %v1377_v50 = vld [vmem:[#allocation7 + $0x898] sm:$0xff]  ;;  %v6130_v41 = vcombine.low %v1513_v33, %v1517_v28 }
 0x2d4   :  { %4778 = vmatpush2.bf16.msra.mxu1 %v5922_v51  ;;  %4738 = vmatprep.subr.bf16.mxu0 %v5787_v54  ;;  %v1381_v51 = vld [vmem:[#allocation7 + $0x8b8] sm:$0xff] }
 0x2d5   :  { %4779 = vmatprep.subr.bf16.mxu1 %v5915_v60  ;;  %v1505_v54 = vld [vmem:[#allocation7 + $0xc98] sm:$0xff]  ;;  %v5995_v62 = vcombine.high %v1377_v50, %v1381_v51  ;;  %v5994_v4 = vcombine.low %v1377_v50, %v1381_v51 }
 0x2d6   :  { %v1509_v60 = vld [vmem:[#allocation7 + $0xcb8] sm:$0xff] }
 0x2d7   :  { %4739 = vmatpush2.bf16.msra.mxu0 %v5786_v0  ;;  %v6123_v63 = vcombine.high %v1505_v54, %v1509_v60  ;;  %v1369_v0 = vld [vmem:[#allocation7 + $0x858] sm:$0xff]  ;;  %v6122_v5 = vcombine.low %v1505_v54, %v1509_v60 }
 0x2d8   :  { %4780 = vmatpush2.bf16.msra.mxu1 %v5914_v1  ;;  %4790 = vmatprep.subr.bf16.mxu0 %v6035_v2  ;;  %v1373_v1 = vld [vmem:[#allocation7 + $0x878] sm:$0xff] }
 0x2d9   :  { %4831 = vmatprep.subr.bf16.mxu1 %v6163_v3  ;;  %v1497_v2 = vld [vmem:[#allocation7 + $0xc58] sm:$0xff]  ;;  %v5986_v38 = vcombine.low %v1369_v0, %v1373_v1 }
 0x2da   :  { %v4496_v43 = vpop.f32.mrf.mxu0  ;;  %4741 = vmatmul.mubr.bf16.vlgmr.msra.gmra.mxu0 %v6739_v59  ;;  %v1501_v3 = vld [vmem:[#allocation7 + $0xc78] sm:$0xff] }
 0x2db   :  { %v4497_v44 = vadd.f32 %v4496_v43, %v6822_v27  ;;  %v4537_v13 = vpop.f32.mrf.mxu1  ;;  %4782 = vmatmul.mubr.bf16.vlgmr.msra.gmra.mxu1 %v6735_v55  ;;  %4791 = vmatpush1.bf16.msra.mxu0 %v6034_v6  ;;  %v6147_v27 = vcombine.high %v1529_v39, %v1533_v57  ;;  %v5987_v6 = vcombine.high %v1369_v0, %v1373_v1  ;;  %v1481_v57 = vld [vmem:[#allocation7 + $0xbd8] sm:$0xff] }
 0x2dc   :  { %4822 = vmatprep.mubr.bf16.mxu0 %v6771_v14  ;;  %4832 = vmatpush1.bf16.msra.mxu1 %v6162_v10  ;;  %v6831_v16 = vpop.f32.mrf.mxu0  ;;  %v6115_v7 = vcombine.high %v1497_v2, %v1501_v3  ;;  %v1365_v10 = vld [vmem:[#allocation7 + $0x838] sm:$0xff]  ;;  %v6114_v43 = vcombine.low %v1497_v2, %v1501_v3 }
 0x2dd   :  { %v6833_v19 = vadd.f32 %v4537_v13, %v4497_v44  ;;  %4863 = vmatprep.mubr.bf16.mxu1 %v6775_v47  ;;  %v6836_v59 = vpop.f32.mrf.mxu1  ;;  %4792 = vmatprep.subr.bf16.mxu0 %v6027_v11  ;;  %v6139_v47 = vcombine.high %v1521_v20, %v1525_v21  ;;  %v1489_v11 = vld [vmem:[#allocation7 + $0xc18] sm:$0xff] }
 0x2de   :  { %v4500_v55 = vpop.f32.mrf.mxu0  ;;  %4833 = vmatprep.subr.bf16.mxu1 %v6155_v12  ;;  %v5979_v12 = vcombine.high %v1361_v9, %v1365_v10  ;;  %v6107_v39 = vcombine.high %v1489_v11, %v1493_v37  ;;  %v1485_v44 = vld [vmem:[#allocation7 + $0xbf8] sm:$0xff] }
 0x2df   :  { %v4541_v14 = vpop.f32.mrf.mxu1  ;;  %4793 = vmatpush1.bf16.msra.mxu0 %v6026_v15  ;;  %v1609_v13 = vld [vmem:[#allocation7 + $0xfd8] sm:$0xff] }
 0x2e0   :  { %4834 = vmatpush1.bf16.msra.mxu1 %v6154_v17  ;;  %v4501_v25 = vpop.f32.mrf.mxu0  ;;  %4794 = vmatprep.subr.bf16.mxu0 %v6019_v18  ;;  %v1613_v15 = vld [vmem:[#allocation7 + $0xff8] sm:$0xff]  ;;  %v5978_v17 = vcombine.low %v1361_v9, %v1365_v10  ;;  %v6106_v18 = vcombine.low %v1489_v11, %v1493_v37  ;;  %v6098_v14 = vcombine.low %v1481_v57, %v1485_v44 }
 0x2e1   :  { %v4542_v30 = vpop.f32.mrf.mxu1  ;;  %4835 = vmatprep.subr.bf16.mxu1 %v6147_v27  ;;  %v6099_v27 = vcombine.high %v1481_v57, %v1485_v44  ;;  %v6227_v23 = vcombine.high %v1609_v13, %v1613_v15  ;;  %v1473_v24 = vld [vmem:[#allocation7 + $0xb98] sm:$0xff] }
 0x2e2   :  { %v1477_v55 = vld [vmem:[#allocation7 + $0xbb8] sm:$0xff] }
 0x2e3   :  { %4795 = vmatpush1.bf16.msra.mxu0 %v6018_v53  ;;  %v1601_v20 = vld [vmem:[#allocation7 + $0xf98] sm:$0xff]  ;;  %v6226_v53 = vcombine.low %v1609_v13, %v1613_v15  ;;  %v6091_v25 = vcombine.high %v1473_v24, %v1477_v55  ;;  %v6090_v32 = vcombine.low %v1473_v24, %v1477_v55  ;;  %v4499_v55 = vadd.f32 %v6831_v16, %v6825_v49 }
 0x2e4   :  { %4836 = vmatpush1.bf16.msra.mxu1 %v6146_v26  ;;  %4796 = vmatprep.subr.bf16.mxu0 %v6011_v8  ;;  %v1605_v21 = vld [vmem:[#allocation7 + $0xfb8] sm:$0xff]  ;;  %v4873_v49 = vmax.f32 %v6811_v42, 0.0 }
 0x2e5   :  { %4837 = vmatprep.subr.bf16.mxu1 %v6139_v47  ;;  %v6219_v26 = vcombine.high %v1601_v20, %v1605_v21  ;;  %v1465_v8 = vld [vmem:[#allocation7 + $0xb58] sm:$0xff]  ;;  %v6218_v33 = vcombine.low %v1601_v20, %v1605_v21 }
 0x2e6   :  { %v1469_v30 = vld [vmem:[#allocation7 + $0xb78] sm:$0xff] }
 0x2e7   :  { %4797 = vmatpush1.bf16.msra.mxu0 %v6010_v34  ;;  %v1593_v47 = vld [vmem:[#allocation7 + $0xf58] sm:$0xff]  ;;  %v6083_v28 = vcombine.high %v1465_v8, %v1469_v30  ;;  %v6082_v51 = vcombine.low %v1465_v8, %v1469_v30  ;;  %v6394_v30 = vld [vmem:[#allocation10 + $0x78] sm:$0xff]  }
 0x2e8   :  { %4838 = vmatpush1.bf16.msra.mxu1 %v6138_v36  ;;  %4798 = vmatprep.subr.bf16.mxu0 %v6003_v40  ;;  %v1597_v31 = vld [vmem:[#allocation7 + $0xf78] sm:$0xff] }
 0x2e9   :  { %4839 = vmatprep.subr.bf16.mxu1 %v6131_v56  ;;  %v6211_v34 = vcombine.high %v1593_v47, %v1597_v31  ;;  %v1457_v36 = vld [vmem:[#allocation7 + $0xb18] sm:$0xff]  ;;  %v6210_v54 = vcombine.low %v1593_v47, %v1597_v31  ;;  %v6395_v47 = vld [vmem:[#allocation10 + $0xf8] sm:$0xff]  }
 0x2ea   :  { %v1461_v40 = vld [vmem:[#allocation7 + $0xb38] sm:$0xff]  ;;  %v6396_v31 = vld [vmem:[#allocation10 + $0x38] sm:$0xff]  }
 0x2eb   :  { %4799 = vmatpush1.bf16.msra.mxu0 %v6002_v58  ;;  %v1585_v56 = vld [vmem:[#allocation7 + $0xf18] sm:$0xff]  ;;  %v6075_v60 = vcombine.high %v1457_v36, %v1461_v40  ;;  %v6074_v1 = vcombine.low %v1457_v36, %v1461_v40 }
 0x2ec   :  { %4840 = vmatpush1.bf16.msra.mxu1 %v6130_v41  ;;  %4800 = vmatprep.subr.bf16.mxu0 %v5995_v62  ;;  %v1589_v50 = vld [vmem:[#allocation7 + $0xf38] sm:$0xff] }
 0x2ed   :  { %4841 = vmatprep.subr.bf16.mxu1 %v6123_v63  ;;  %v6203_v58 = vcombine.high %v1585_v56, %v1589_v50  ;;  %v1449_v41 = vld [vmem:[#allocation7 + $0xad8] sm:$0xff]  ;;  %v6202_v2 = vcombine.low %v1585_v56, %v1589_v50 }
 0x2ee   :  { %v1453_v62 = vld [vmem:[#allocation7 + $0xaf8] sm:$0xff] }
 0x2ef   :  { %4801 = vmatpush1.bf16.msra.mxu0 %v5994_v4  ;;  %v1577_v63 = vld [vmem:[#allocation7 + $0xed8] sm:$0xff]  ;;  %v6067_v3 = vcombine.high %v1449_v41, %v1453_v62  ;;  %v6066_v10 = vcombine.low %v1449_v41, %v1453_v62  ;;  %v6404_v41 = vld [vmem:[#allocation10 + $0x28] sm:$0xff]  }
 0x2f0   :  { %4842 = vmatpush1.bf16.msra.mxu1 %v6122_v5  ;;  %4802 = vmatprep.subr.bf16.mxu0 %v5987_v6  ;;  %v1581_v0 = vld [vmem:[#allocation7 + $0xef8] sm:$0xff]  ;;  %v6405_v62 = vld [vmem:[#allocation10 + $0xa8] sm:$0xff]  }
 0x2f1   :  { %4843 = vmatprep.subr.bf16.mxu1 %v6115_v7  ;;  %v6195_v4 = vcombine.high %v1577_v63, %v1581_v0  ;;  %v1441_v5 = vld [vmem:[#allocation7 + $0xa98] sm:$0xff]  ;;  %v6194_v11 = vcombine.low %v1577_v63, %v1581_v0  ;;  %v6406_v63 = vld [vmem:[#allocation10 + $0x60] sm:$0xff]  }
 0x2f2   :  { %v1445_v6 = vld [vmem:[#allocation7 + $0xab8] sm:$0xff] }
 0x2f3   :  { %4803 = vmatpush1.bf16.msra.mxu0 %v5986_v38  ;;  %v1569_v7 = vld [vmem:[#allocation7 + $0xe98] sm:$0xff]  ;;  %v6059_v37 = vcombine.high %v1441_v5, %v1445_v6  ;;  %v6058_v44 = vcombine.low %v1441_v5, %v1445_v6  ;;  %v6411_v5 = vld [vmem:[#allocation10 + $0xd8] sm:$0xff]  }
 0x2f4   :  { %4844 = vmatpush1.bf16.msra.mxu1 %v6114_v43  ;;  %4804 = vmatprep.subr.bf16.mxu0 %v5979_v12  ;;  %v1573_v9 = vld [vmem:[#allocation7 + $0xeb8] sm:$0xff]  ;;  %v6412_v6 = vld [vmem:[#allocation10 + $0x18] sm:$0xff]  }
 0x2f5   :  { %4845 = vmatprep.subr.bf16.mxu1 %v6107_v39  ;;  %v6187_v38 = vcombine.high %v1569_v7, %v1573_v9  ;;  %v1433_v43 = vld [vmem:[#allocation7 + $0xa58] sm:$0xff]  ;;  %v6186_v13 = vcombine.low %v1569_v7, %v1573_v9  ;;  %v6413_v7 = vld [vmem:[#allocation10 + $0x98] sm:$0xff]  }
 0x2f6   :  { %v1437_v12 = vld [vmem:[#allocation7 + $0xa78] sm:$0xff] }
 0x2f7   :  { %4805 = vmatpush1.bf16.msra.mxu0 %v5978_v17  ;;  %v1561_v39 = vld [vmem:[#allocation7 + $0xe58] sm:$0xff]  ;;  %v6051_v15 = vcombine.high %v1433_v43, %v1437_v12  ;;  %v6050_v20 = vcombine.low %v1433_v43, %v1437_v12  ;;  %v6419_v43 = vld [vmem:[#allocation10 + $0xc8] sm:$0xff]  }
 0x2f8   :  { %4846 = vmatpush1.bf16.msra.mxu1 %v6106_v18  ;;  %4806 = vmatprep.subr.bf16.mxu0 %v6099_v27  ;;  %v1565_v57 = vld [vmem:[#allocation7 + $0xe78] sm:$0xff]  ;;  %v6420_v12 = vld [vmem:[#allocation10 + $0x8] sm:$0xff]  }
 0x2f9   :  { %4847 = vmatprep.subr.bf16.mxu1 %v6227_v23  ;;  %v6179_v17 = vcombine.high %v1561_v39, %v1565_v57  ;;  %v1425_v18 = vld [vmem:[#allocation7 + $0xa18] sm:$0xff]  ;;  %v6178_v21 = vcombine.low %v1561_v39, %v1565_v57  ;;  %v6421_v39 = vld [vmem:[#allocation10 + $0x88] sm:$0xff]   ;;  %v6422_v57 = vld [vmem:[#allocation10 + $0x40] sm:$0xff]  }
 0x2fa   :  { %v1429_v27 = vld [vmem:[#allocation7 + $0xa38] sm:$0xff] }
 0x2fb   :  { %4807 = vmatpush2.bf16.msra.mxu0 %v6098_v14  ;;  %v1553_v23 = vld [vmem:[#allocation7 + $0xe18] sm:$0xff]  ;;  %v6043_v14 = vcombine.high %v1425_v18, %v1429_v27 }
 0x2fc   :  { %4848 = vmatpush2.bf16.msra.mxu1 %v6226_v53  ;;  %4808 = vmatprep.subr.bf16.mxu0 %v6091_v25  ;;  %v1557_v24 = vld [vmem:[#allocation7 + $0xe38] sm:$0xff]  ;;  %v4540_v25 = vadd.f32 %v6836_v59, %v4499_v55 }
 0x2fd   :  { %4849 = vmatprep.subr.bf16.mxu1 %v6219_v26  ;;  %v6171_v53 = vcombine.high %v1553_v23, %v1557_v24  ;;  %v6042_v26 = vcombine.low %v1425_v18, %v1429_v27  ;;  %v6170_v8 = vcombine.low %v1553_v23, %v1557_v24  ;;  %v6400_v42 = vld [vmem:[#allocation10 + $0x30] sm:$0xff]   ;;  %v6426_v18 = vld [vmem:[#allocation10 + $0x178] sm:$0xff]   ;;  %v4874_v27 = vmax.f32 %v6833_v19, 0.0 }
 0x2fe   :  { %v4875_v16 = vmax.f32 %v4540_v25, 0.0  ;;  %v6401_v50 = vld [vmem:[#allocation10 + $0xb0] sm:$0xff]   ;;  %v6442_v23 = vld [vmem:[#allocation10 + $0x1f8] sm:$0xff]   ;;  %v6430_v25 = vld [vmem:[#allocation10 + $0x168] sm:$0xff]  }
 0x2ff   :  { %4809 = vmatpush2.bf16.msra.mxu0 %v6090_v32  ;;  %v6397_v32 = vld [vmem:[#allocation10 + $0xb8] sm:$0xff]   ;;  %v6414_v9 = vld [vmem:[#allocation10 + $0x50] sm:$0xff]  }
 0x300   :  { %4850 = vmatpush2.bf16.msra.mxu1 %v6218_v33  ;;  %4810 = vmatprep.subr.bf16.mxu0 %v6083_v28  ;;  %v6398_v33 = vld [vmem:[#allocation10 + $0x70] sm:$0xff]   ;;  %v4881_v28 = vpack.c.bf16 %v4873_v49, %v4873_v49  ;;  %v4883_v36 = vpack.c.bf16 %v4875_v16, %v4875_v16  ;;  %v6427_v24 = vld [vmem:[#allocation10 + $0x138] sm:$0xff]   ;;  %v6448_v49 = vld [vmem:[#allocation10 + $0x1e0] sm:$0xff]  }
 0x301   :  { %4851 = vmatprep.subr.bf16.mxu1 %v6211_v34  ;;  %v6399_v34 = vld [vmem:[#allocation10 + $0xf0] sm:$0xff]   ;;  %v6433_v16 = vld [vmem:[#allocation10 + $0x120] sm:$0xff]  }
 0x302   :  { %v6445_v19 = vld [vmem:[#allocation10 + $0x1b0] sm:$0xff]  }
 0x303   :  { %4811 = vmatpush2.bf16.msra.mxu0 %v6082_v51  ;;  %v6402_v51 = vld [vmem:[#allocation10 + $0x68] sm:$0xff]  }
 0x304   :  { %4852 = vmatpush2.bf16.msra.mxu1 %v6210_v54  ;;  %4812 = vmatprep.subr.bf16.mxu0 %v6075_v60  ;;  %v6403_v60 = vld [vmem:[#allocation10 + $0xe8] sm:$0xff]  }
 0x305   :  { %4853 = vmatprep.subr.bf16.mxu1 %v6203_v58 }
 0x307   :  { %4813 = vmatpush2.bf16.msra.mxu0 %v6074_v1  ;;  %v6407_v1 = vld [vmem:[#allocation10 + $0xe0] sm:$0xff]  }
 0x308   :  { %4854 = vmatpush2.bf16.msra.mxu1 %v6202_v2  ;;  %4814 = vmatprep.subr.bf16.mxu0 %v6067_v3  ;;  %v6408_v2 = vld [vmem:[#allocation10 + $0x20] sm:$0xff]  }
 0x309   :  { %4855 = vmatprep.subr.bf16.mxu1 %v6195_v4  ;;  %v6409_v3 = vld [vmem:[#allocation10 + $0xa0] sm:$0xff]   ;;  %v6410_v4 = vld [vmem:[#allocation10 + $0x58] sm:$0xff]  }
 0x30b   :  { %4815 = vmatpush2.bf16.msra.mxu0 %v6066_v10  ;;  %v6415_v10 = vld [vmem:[#allocation10 + $0xd0] sm:$0xff]  }
 0x30c   :  { %4856 = vmatpush2.bf16.msra.mxu1 %v6194_v11  ;;  %4816 = vmatprep.subr.bf16.mxu0 %v6059_v37  ;;  %v6416_v11 = vld [vmem:[#allocation10 + $0x10] sm:$0xff]  }
 0x30d   :  { %4857 = vmatprep.subr.bf16.mxu1 %v6187_v38  ;;  %v6417_v37 = vld [vmem:[#allocation10 + $0x90] sm:$0xff]   ;;  %v6418_v38 = vld [vmem:[#allocation10 + $0x48] sm:$0xff]  }
 0x30f   :  { %4817 = vmatpush2.bf16.msra.mxu0 %v6058_v44  ;;  %v6423_v44 = vld [vmem:[#allocation10 + $0xc0] sm:$0xff]  }
 0x310   :  { %4858 = vmatpush2.bf16.msra.mxu1 %v6186_v13  ;;  %4818 = vmatprep.subr.bf16.mxu0 %v6051_v15  ;;  %v6424_v13 = vld [vmem:[#allocation10] sm:$0xff]   ;;  %v4872_v15 = vmax.f32 %v6807_v29, 0.0  ;;  %v6429_v29 = vld [vmem:[#allocation10 + $0x130] sm:$0xff]  }
 0x311   :  { %4859 = vmatprep.subr.bf16.mxu1 %v6179_v17  ;;  %v6425_v17 = vld [vmem:[#allocation10 + $0x80] sm:$0xff]  }
 0x312   :  { %v4880_v55 = vpack.c.bf16 %v4872_v15, %v4872_v15 }
 0x313   :  { %4819 = vmatpush2.bf16.msra.mxu0 %v6050_v20  ;;  %v6428_v20 = vld [vmem:[#allocation10 + $0x170] sm:$0xff]  }
 0x314   :  { %4860 = vmatpush2.bf16.msra.mxu1 %v6178_v21  ;;  %4820 = vmatprep.subr.bf16.mxu0 %v6043_v14  ;;  %v6443_v21 = vld [vmem:[#allocation10 + $0x1b8] sm:$0xff]   ;;  %v4882_v14 = vpack.c.bf16 %v4874_v27, %v4874_v27 }
 0x315   :  { %4861 = vmatprep.subr.bf16.mxu1 %v6171_v53  ;;  %v6444_v53 = vld [vmem:[#allocation10 + $0x1f0] sm:$0xff]  }
 0x317   :  { %4821 = vmatpush2.bf16.msra.mxu0 %v6042_v26  ;;  %v6446_v26 = vld [vmem:[#allocation10 + $0x1e8] sm:$0xff]  }
 0x318   :  { %4862 = vmatpush2.bf16.msra.mxu1 %v6170_v8  ;;  %6293 = vmatprep.subr.bf16.mxu0 %v6394_v30  ;;  %v6431_v8 = vld [vmem:[#allocation10 + $0x128] sm:$0xff]   ;;  %v6432_v30 = vld [vmem:[#allocation10 + $0x160] sm:$0xff]  }
 0x319   :  { %6315 = vmatprep.subr.bf16.mxu1 %v6395_v47  ;;  %v6447_v47 = vld [vmem:[#allocation10 + $0x1a8] sm:$0xff]  }
 0x31a   :  { %v6842_v59 = vpop.f32.mrf.mxu0  ;;  %4823 = vmatmul.mubr.bf16.vlgmr.msra.gmra.mxu0 %v6773_v46 }
 0x31b   :  { %v6845_v40 = vpop.f32.mrf.mxu1  ;;  %4864 = vmatmul.mubr.bf16.vlgmr.msra.gmra.mxu1 %v6769_v35  ;;  %6294 = vmatpush3.bf16.msra.mxu0 %v6396_v31  ;;  %v6434_v31 = vld [vmem:[#allocation10 + $0x158] sm:$0xff]  }
 0x31c   :  { %5439 = vmatprep.mubr.bf16.mxu0 %v4881_v28  ;;  %6316 = vmatpush3.bf16.msra.mxu1 %v6397_v32  ;;  %v6848_v56 = vpop.f32.mrf.mxu0  ;;  %v6449_v32 = vld [vmem:[#allocation10 + $0x1a0] sm:$0xff]   ;;  %v6435_v28 = vld [vmem:[#allocation10 + $0x118] sm:$0xff]  }
 0x31d   :  { %5479 = vmatprep.mubr.bf16.mxu1 %v4883_v36  ;;  %v6850_v54 = vpop.f32.mrf.mxu1  ;;  %6295 = vmatprep.subr.bf16.mxu0 %v6398_v33  ;;  %v6450_v33 = vld [vmem:[#allocation10 + $0x1d8] sm:$0xff]  }
 0x31e   :  { %v4582_v46 = vpop.f32.mrf.mxu0  ;;  %6317 = vmatprep.subr.bf16.mxu1 %v6399_v34  ;;  %v6436_v34 = vld [vmem:[#allocation10 + $0x150] sm:$0xff]   ;;  %v6451_v36 = vld [vmem:[#allocation10 + $0x198] sm:$0xff]  }
 0x31f   :  { %v4623_v58 = vpop.f32.mrf.mxu1  ;;  %6296 = vmatpush3.bf16.msra.mxu0 %v6400_v42  ;;  %v6437_v42 = vld [vmem:[#allocation10 + $0x110] sm:$0xff]   ;;  %v6458_v46 = vld [vmem:[#allocation8] sm:$0xff] }
 0x320   :  { %6318 = vmatpush3.bf16.msra.mxu1 %v6401_v50  ;;  %v4583_v35 = vpop.f32.mrf.mxu0  ;;  %6297 = vmatprep.subr.bf16.mxu0 %v6402_v51  ;;  %v6438_v50 = vld [vmem:[#allocation10 + $0x148] sm:$0xff]   ;;  %v1635_v58 = vrot.slane %v6458_v46, %v253_v45  ;;  %v6453_v45 = vld [vmem:[#allocation10 + $0x190] sm:$0xff]  }
 0x321   :  { %v4624_v0 = vpop.f32.mrf.mxu1  ;;  %6319 = vmatprep.subr.bf16.mxu1 %v6403_v60  ;;  %v6439_v51 = vld [vmem:[#allocation10 + $0x108] sm:$0xff]   ;;  %v6440_v60 = vld [vmem:[#allocation10 + $0x140] sm:$0xff]  }
 0x322   :  { %v6441_v35 = vld [vmem:[#allocation10 + $0x100] sm:$0xff]  }
 0x323   :  { %6298 = vmatpush3.bf16.msra.mxu0 %v6404_v41  ;;  %v1639_v41 = vrot.slane %v6458_v46, %v257_v52 }
 0x324   :  { %6320 = vmatpush3.bf16.msra.mxu1 %v6405_v62  ;;  %6299 = vmatprep.subr.bf16.mxu0 %v6406_v63  ;;  %v4579_v62 = vadd.f32 %v6842_v59, %v1635_v58  ;;  %v6454_v59 = vld [vmem:[#allocation10 + $0x1c8] sm:$0xff]  }
 0x325   :  { %6321 = vmatprep.subr.bf16.mxu1 %v6407_v1  ;;  %v4581_v63 = vadd.f32 %v6848_v56, %v1639_v41 }
 0x326   :  { %v4620_v0 = vadd.f32 %v6845_v40, %v4579_v62 }
 0x327   :  { %6300 = vmatpush3.bf16.msra.mxu0 %v6408_v2  ;;  %v6452_v2 = vld [vmem:[#allocation10 + $0x1d0] sm:$0xff]  }
 0x328   :  { %6322 = vmatpush3.bf16.msra.mxu1 %v6409_v3  ;;  %6301 = vmatprep.subr.bf16.mxu0 %v6410_v4  ;;  %v4622_v3 = vadd.f32 %v6850_v54, %v4581_v63  ;;  %v6456_v54 = vld [vmem:[#allocation10 + $0x1c0] sm:$0xff]  }
 0x329   :  { %6323 = vmatprep.subr.bf16.mxu1 %v6411_v5 }
 0x32b   :  { %6302 = vmatpush3.bf16.msra.mxu0 %v6412_v6 }
 0x32c   :  { %6324 = vmatpush3.bf16.msra.mxu1 %v6413_v7  ;;  %6303 = vmatprep.subr.bf16.mxu0 %v6414_v9 }
 0x32d   :  { %6325 = vmatprep.subr.bf16.mxu1 %v6415_v10 }
 0x32f   :  { %6304 = vmatpush3.bf16.msra.mxu0 %v6416_v11 }
 0x330   :  { %6326 = vmatpush3.bf16.msra.mxu1 %v6417_v37  ;;  %6305 = vmatprep.subr.bf16.mxu0 %v6418_v38  ;;  %v6455_v37 = vld [vmem:[#allocation10 + $0x188] sm:$0xff]  }
 0x331   :  { %6327 = vmatprep.subr.bf16.mxu1 %v6419_v43 }
 0x333   :  { %6306 = vmatpush3.bf16.msra.mxu0 %v6420_v12 }
 0x334   :  { %6328 = vmatpush3.bf16.msra.mxu1 %v6421_v39  ;;  %6307 = vmatprep.subr.bf16.mxu0 %v6422_v57  ;;  %v6457_v57 = vld [vmem:[#allocation10 + $0x180] sm:$0xff]  }
 0x335   :  { %6329 = vmatprep.subr.bf16.mxu1 %v6423_v44 }
 0x337   :  { %6308 = vmatpush3.bf16.msra.mxu0 %v6424_v13 }
 0x338   :  { %6330 = vmatpush3.bf16.msra.mxu1 %v6425_v17  ;;  %6337 = vmatprep.subr.bf16.mxu0 %v6426_v18 }
 0x339   :  { %6359 = vmatprep.subr.bf16.mxu1 %v6442_v23 }
 0x33a   :  { %5440 = vmatmul.mubr.bf16.vlgmr.msra.gmra.mxu0 %v4880_v55 }
 0x33b   :  { %5480 = vmatmul.mubr.bf16.vlgmr.msra.gmra.mxu1 %v4882_v14  ;;  %6338 = vmatpush3.bf16.msra.mxu0 %v6427_v24 }
 0x33c   :  { %6339 = vmatprep.subr.bf16.mxu0 %v6428_v20  ;;  %6360 = vmatpush3.bf16.msra.mxu1 %v6443_v21  ;;  %v1643_v20 = vrot.slane %v6458_v46, %v261_v48  ;;  %v1647_v21 = vrot.slane %v6458_v46, %v265_v61 }
 0x33d   :  { %6361 = vmatprep.subr.bf16.mxu1 %v6444_v53 }
 0x33f   :  { %6340 = vmatpush3.bf16.msra.mxu0 %v6429_v29 }
 0x340   :  { %6341 = vmatprep.subr.bf16.mxu0 %v6430_v25  ;;  %6362 = vmatpush3.bf16.msra.mxu1 %v6445_v19 }
 0x341   :  { %6363 = vmatprep.subr.bf16.mxu1 %v6446_v26 }
 0x343   :  { %6342 = vmatpush3.bf16.msra.mxu0 %v6431_v8 }
 0x344   :  { %6343 = vmatprep.subr.bf16.mxu0 %v6432_v30  ;;  %6364 = vmatpush3.bf16.msra.mxu1 %v6447_v47 }
 0x345   :  { %6365 = vmatprep.subr.bf16.mxu1 %v6448_v49 }
 0x347   :  { %6344 = vmatpush3.bf16.msra.mxu0 %v6433_v16 }
 0x348   :  { %6345 = vmatprep.subr.bf16.mxu0 %v6434_v31  ;;  %6366 = vmatpush3.bf16.msra.mxu1 %v6449_v32 }
 0x349   :  { %6367 = vmatprep.subr.bf16.mxu1 %v6450_v33 }
 0x34b   :  { %6346 = vmatpush3.bf16.msra.mxu0 %v6435_v28 }
 0x34c   :  { %6347 = vmatprep.subr.bf16.mxu0 %v6436_v34  ;;  %6368 = vmatpush3.bf16.msra.mxu1 %v6451_v36 }
 0x34d   :  { %6369 = vmatprep.subr.bf16.mxu1 %v6452_v2 }
 0x34f   :  { %6348 = vmatpush3.bf16.msra.mxu0 %v6437_v42 }
 0x350   :  { %6349 = vmatprep.subr.bf16.mxu0 %v6438_v50  ;;  %6370 = vmatpush3.bf16.msra.mxu1 %v6453_v45 }
 0x351   :  { %6371 = vmatprep.subr.bf16.mxu1 %v6454_v59 }
 0x353   :  { %6350 = vmatpush3.bf16.msra.mxu0 %v6439_v51  ;;  %v6228_v51 = vld [vmem:[#allocation11] ss:$0 sm:$0xff] }
 0x354   :  { %6351 = vmatprep.subr.bf16.mxu0 %v6440_v60  ;;  %6372 = vmatpush3.bf16.msra.mxu1 %v6455_v37 }
 0x355   :  { %6373 = vmatprep.subr.bf16.mxu1 %v6456_v54 }
 0x357   :  { %6352 = vmatpush3.bf16.msra.mxu0 %v6441_v35 }
 0x358   :  { %6374 = vmatpush3.bf16.msra.mxu1 %v6457_v57 }
 0x35a   :  { %v4660_v1 = vpop.f32.mrf.mxu0 }
 0x35b   :  { %v4661_v4 = vadd.f32 %v4660_v1, %v4620_v0  ;;  %v4701_v5 = vpop.f32.mrf.mxu1 }
 0x35c   :  { %v4662_v6 = vpop.f32.mrf.mxu0 }
 0x35d   :  { %v4702_v52 = vadd.f32 %v4701_v5, %v4661_v4  ;;  %v4663_v7 = vadd.f32 %v4662_v6, %v4622_v3  ;;  %v4703_v9 = vpop.f32.mrf.mxu1 }
 0x35e   :  { %v4664_v10 = vpop.f32.mrf.mxu0 }
 0x35f   :  { %v4704_v11 = vadd.f32 %v4703_v9, %v4663_v7  ;;  %v4705_v56 = vpop.f32.mrf.mxu1  ;;  %v4876_v38 = vmax.f32 %v4702_v52, 0.0 }
 0x360   :  { %v4665_v40 = vpop.f32.mrf.mxu0 }
 0x361   :  { %v4877_v43 = vmax.f32 %v4704_v11, 0.0  ;;  %v4706_v12 = vpop.f32.mrf.mxu1  ;;  %v4884_v44 = vpack.c.bf16 %v4876_v38, %v4876_v38 }
 0x363   :  { %v4885_v39 = vpack.c.bf16 %v4877_v43, %v4877_v43 }
 0x365   :  { %5519 = vmatprep.mubr.bf16.mxu0 %v4885_v39 }
 0x366   :  { %5520 = vmatmul.mubr.bf16.vlgmr.msra.gmra.mxu0 %v4884_v44 }
 0x39a   :  { %v4742_v13 = vpop.f32.mrf.mxu0 }
 0x39b   :  { %v4783_v15 = vpop.f32.mrf.mxu1  ;;  %v4743_v14 = vadd.f32 %v4742_v13, %v1643_v20 }
 0x39c   :  { %v4744_v17 = vpop.f32.mrf.mxu0 }
 0x39d   :  { %v4785_v18 = vpop.f32.mrf.mxu1  ;;  %v4745_v53 = vadd.f32 %v4744_v17, %v1647_v21  ;;  %v4784_v29 = vadd.f32 %v4783_v15, %v4743_v14 }
 0x39e   :  { %v4746_v27 = vpop.f32.mrf.mxu0 }
 0x39f   :  { %v4787_v23 = vpop.f32.mrf.mxu1  ;;  %v4786_v19 = vadd.f32 %v4785_v18, %v4745_v53 }
 0x3a0   :  { %v4747_v24 = vpop.f32.mrf.mxu0 }
 0x3a1   :  { %v4788_v55 = vpop.f32.mrf.mxu1 }
 0x3da   :  { %v4824_v25 = vpop.f32.mrf.mxu0 }
 0x3db   :  { %v4825_v26 = vadd.f32 %v4824_v25, %v4784_v29  ;;  %v4865_v8 = vpop.f32.mrf.mxu1 }
 0x3dc   :  { %v4826_v30 = vpop.f32.mrf.mxu0 }
 0x3dd   :  { %v4866_v47 = vadd.f32 %v4865_v8, %v4825_v26  ;;  %v4827_v49 = vadd.f32 %v4826_v30, %v4786_v19  ;;  %v4867_v16 = vpop.f32.mrf.mxu1 }
 0x3de   :  { %v4828_v31 = vpop.f32.mrf.mxu0 }
 0x3df   :  { %v4868_v32 = vadd.f32 %v4867_v16, %v4827_v49  ;;  %v4869_v33 = vpop.f32.mrf.mxu1  ;;  %v4878_v28 = vmax.f32 %v4866_v47, 0.0 }
 0x3e0   :  { %v4829_v34 = vpop.f32.mrf.mxu0 }
 0x3e1   :  { %v4879_v48 = vmax.f32 %v4868_v32, 0.0  ;;  %v4870_v36 = vpop.f32.mrf.mxu1  ;;  %v4886_v61 = vpack.c.bf16 %v4878_v28, %v4878_v28 }
 0x3e3   :  { %v4887_v22 = vpack.c.bf16 %v4879_v48, %v4879_v48 }
 0x3e5   :  { %5559 = vmatprep.mubr.bf16.mxu1 %v4887_v22 }
 0x3e6   :  { %5560 = vmatmul.mubr.bf16.vlgmr.msra.gmra.mxu1 %v4886_v61 }
 0x3fa   :  { %v6309_v42 = vpop.f32.mrf.mxu0 }
 0x3fb   :  { %v6331_v50 = vpop.f32.mrf.mxu1 }
 0x3fc   :  { %v6310_v60 = vpop.f32.mrf.mxu0 }
 0x3fd   :  { %v6311_v46 = vadd.f32 %v6310_v60, %v6309_v42  ;;  %v6332_v58 = vpop.f32.mrf.mxu1 }
 0x3fe   :  { %v6333_v41 = vadd.f32 %v6332_v58, %v6331_v50  ;;  %v6312_v35 = vpop.f32.mrf.mxu0 }
 0x3ff   :  { %v5442_v62 = vadd.f32 %v6311_v46, %v6228_v51  ;;  %v6334_v63 = vpop.f32.mrf.mxu1 }
 0x400   :  { %v6313_v0 = vpop.f32.mrf.mxu0 }
 0x401   :  { %v5482_v1 = vadd.f32 %v6333_v41, %v5442_v62  ;;  %v6335_v2 = vpop.f32.mrf.mxu1 }
 0x426   :  { %v6353_v3 = vpop.f32.mrf.mxu0 }
 0x428   :  { %v6354_v4 = vpop.f32.mrf.mxu0 }
 0x429   :  { %v6355_v5 = vadd.f32 %v6354_v4, %v6353_v3 }
 0x42a   :  { %v6356_v45 = vpop.f32.mrf.mxu0 }
 0x42b   :  { %v5522_v6 = vadd.f32 %v6355_v5, %v5482_v1 }
 0x42c   :  { %v6357_v52 = vpop.f32.mrf.mxu0 }
 0x4a6   :  { %v6375_v7 = vpop.f32.mrf.mxu1 }
 0x4a8   :  { %v6376_v9 = vpop.f32.mrf.mxu1 }
 0x4a9   :  { %v6377_v10 = vadd.f32 %v6376_v9, %v6375_v7 }
 0x4aa   :  { %v6378_v59 = vpop.f32.mrf.mxu1 }
 0x4ab   :  { %v5562_v11 = vadd.f32 %v6377_v10, %v5522_v6 }
 0x4ac   :  { %v6379_v56 = vpop.f32.mrf.mxu1 }
 0x4ad   :  { %5567 = vst [vmem:[#allocation13] sm:$0xff] %v5562_v11 }
 0x4ae   :  { %6590 = shalt.err (!%p6587_p6)
}
 0x4af   :  { %5577 = dma.vmem_to_hbm [thread:$0]  %s5575_s9, 128, %s6876_s7, [#allocation4]  }
 0x4b0   :  { %6607 = dma.done.wait [#allocation4], 128  }
 0x4b1   :  { %6608 = vsyncadd [#allocation4], 4294967168 }
 0x4b2   :  { %5581 = vsyncpa [#allocation3], 1 }
 0x4b3   :  { %5582 = vsyncpa [#allocation6], 1 }
 0x4b4   :  { %5583 = vsyncpa [#allocation9], 1 }
 0x4b5   :  { %5584 = vsyncpa [#allocation12], 1 }
 0x4b6   :  { %5585 = vsyncpa [#allocation4], 1 }

</bundles_post_ra>
